<compile_context>
chip_gen: v7x
topology: tpu7x:2x2x1
jax: 0.10.0
libtpu: 0.0.40
codegen_flags: <defaults>
</compile_context>

<pallas_src>
import functools
import math

import jax
import jax.numpy as jnp
import numpy as np
from jax.experimental import pallas as pl
from jax.experimental.pallas import tpu as pltpu


def _gelu_exact(x):
    # PyTorch nn.GELU() default: exact erf-based GELU.
    return 0.5 * x * (1.0 + jax.lax.erf(x * (1.0 / math.sqrt(2.0))))


def value_head_kernel(x_ref, w1_ref, b1_ref, w2_ref, b2_ref, w3_ref, b3_ref,
                      o_ref, *, seq, bpad):
    # ---- dense1 + GELU for the whole (padded) seq*batch in one matmul ------
    # x_ref: (seq*bpad, D), rows ordered seq-major then batch.
    h1 = jnp.dot(x_ref[...], w1_ref[...],
                 preferred_element_type=jnp.float32) + b1_ref[...]
    h1 = _gelu_exact(h1)                                     # (seq*bpad, 128) f32

    # ---- dense2 (the x.view(b, -1) flatten) as one batched contraction -----
    # bpad == 8 == one sublane tile, so this reshape is a tile-aligned (free)
    # shape cast.  W2 is fed as (seq, 128, 128) f32; the flattened matmul
    # h1_flat @ W2 becomes sum_s h1[s] @ W2[s].
    h1_3d = h1.reshape(seq, bpad, 128)
    p = jnp.einsum('sbk,skj->sbj', h1_3d, w2_ref[...],
                   preferred_element_type=jnp.float32)       # (seq, bpad, 128)
    acc = jnp.sum(p, axis=0)                                  # (bpad, 128)

    # ---- bias + GELU + dense3 ----------------------------------------------
    h2 = _gelu_exact(acc + b2_ref[...])                       # (bpad, 128)
    out = jnp.dot(h2, w3_ref[...],
                  preferred_element_type=jnp.float32) + b3_ref[...]
    o_ref[...] = out.astype(o_ref.dtype)                      # (bpad, 3)


def value_head(x, w1, b1, w2, b2, w3, b3):
    """x: (B, S, D) float32 with S == 64 (fixed by dense2).  Returns (B, 3)."""
    B, S, D = x.shape
    assert w2.shape == (S * 128, 128), "dense2 expects flatten of (S, 128)"

    bpad = max(8, ((B + 7) // 8) * 8)   # round batch up to one sublane tile

    # Tiny (<=64 KiB) layout plumbing on x only; the large operand (W2, 4 MiB)
    # is passed through untouched — reshape (S*128,128)->(S,128,128) is a free
    # row-major view and there is no per-call dtype cast.
    x_sm = jnp.transpose(x, (1, 0, 2))                        # (S, B, D)
    if bpad != B:
        x_sm = jnp.pad(x_sm, ((0, 0), (0, bpad - B), (0, 0)))
    x2d = x_sm.reshape(S * bpad, D)                           # (S*bpad, D)

    w2_3d = w2.reshape(S, 128, 128)
    b1_2d = b1.reshape(1, 128)
    b2_2d = b2.reshape(1, 128)
    b3_2d = b3.reshape(1, 3)

    kernel = functools.partial(value_head_kernel, seq=S, bpad=bpad)

    flops = 2 * (S * bpad * D * 128 + bpad * S * 128 * 128 + bpad * 128 * 3)
    transcendentals = S * bpad * 128 + bpad * 128
    bytes_accessed = (x2d.size * 4 + w1.size * 4 + 128 * 4
                      + w2.size * 4 + 128 * 4 + w3.size * 4 + 3 * 4
                      + bpad * 3 * 4)

    out = pl.pallas_call(
        kernel,
        out_shape=jax.ShapeDtypeStruct((bpad, 3), jnp.float32),
        grid_spec=pltpu.PrefetchScalarGridSpec(
            num_scalar_prefetch=0,
            grid=(1,),                                        # single step
            in_specs=[
                pl.BlockSpec((S * bpad, D), lambda c: (0, 0)),      # x
                pl.BlockSpec((D, 128), lambda c: (0, 0)),           # W1
                pl.BlockSpec((1, 128), lambda c: (0, 0)),           # b1
                pl.BlockSpec((S, 128, 128), lambda c: (0, 0, 0)),   # W2 (f32)
                pl.BlockSpec((1, 128), lambda c: (0, 0)),           # b2
                pl.BlockSpec((128, 3), lambda c: (0, 0)),           # W3
                pl.BlockSpec((1, 3), lambda c: (0, 0)),             # b3
            ],
            out_specs=pl.BlockSpec((bpad, 3), lambda c: (0, 0)),
        ),
        compiler_params=pltpu.CompilerParams(
            dimension_semantics=("arbitrary",)),
        cost_estimate=pl.CostEstimate(flops=flops,
                                      transcendentals=transcendentals,
                                      bytes_accessed=bytes_accessed),
    )(x2d, w1, b1_2d, w2_3d, b2_2d, w3, b3_2d)

    return out[:B]


def value_head_ref(x, w1, b1, w2, b2, w3, b3):
    """Pure-JAX reference matching the PyTorch forward exactly (f32)."""
    B = x.shape[0]
    h1 = jax.nn.gelu(jnp.einsum("bsd,dk->bsk", x, w1) + b1, approximate=False)
    h1_flat = h1.reshape(B, -1)
    h2 = jax.nn.gelu(h1_flat @ w2 + b2, approximate=False)
    return h2 @ w3 + b3


if __name__ == "__main__":
    # seq = 64 is structurally fixed by dense2 = Linear(128 * 64, 128);
    # d_model is a constructor arg -> use a small 32 for the test.
    B, S, D = 2, 64, 32

    key = jax.random.PRNGKey(0)
    k = jax.random.split(key, 8)
    x = jax.random.normal(k[0], (B, S, D), jnp.float32)

    # Deterministic glorot-normal-ish init (weights stored as (in, out), i.e.
    # the transpose of torch.nn.Linear.weight).
    def glorot(kk, fan_in, fan_out):
        std = math.sqrt(2.0 / (fan_in + fan_out))
        return jax.random.normal(kk, (fan_in, fan_out), jnp.float32) * std

    w1 = glorot(k[1], D, 128)
    b1 = jax.random.normal(k[2], (128,), jnp.float32) * 0.01
    w2 = glorot(k[3], 128 * S, 128)
    b2 = jax.random.normal(k[4], (128,), jnp.float32) * 0.01
    w3 = glorot(k[5], 128, 3)
    b3 = jax.random.normal(k[6], (3,), jnp.float32) * 0.01

    out = value_head(x, w1, b1, w2, b2, w3, b3)
    out = jax.block_until_ready(out)

    ref = jax.block_until_ready(value_head_ref(x, w1, b1, w2, b2, w3, b3))
    # Kernel streams/accumulates in f32; tolerance mainly covers XLA's default
    # (reduced-precision) TPU matmuls in the pure-JAX reference itself.
    np.testing.assert_allclose(np.asarray(out), np.asarray(ref),
                               rtol=1e-2, atol=1e-2)

    assert out.shape == (B, 3)
    print("KERNEL_OK")
</pallas_src>

<mosaic_0001>
module attributes {stable_mosaic.version = 11 : i64} {
  func.func @value_head_kernel(%arg0: i32, %arg1: memref<512x32xf32, #tpu.memory_space<vmem>>, %arg2: memref<32x128xf32, #tpu.memory_space<vmem>>, %arg3: memref<1x128xf32, #tpu.memory_space<vmem>>, %arg4: memref<64x128x128xf32, #tpu.memory_space<vmem>>, %arg5: memref<1x128xf32, #tpu.memory_space<vmem>>, %arg6: memref<128x3xf32, #tpu.memory_space<vmem>>, %arg7: memref<1x3xf32, #tpu.memory_space<vmem>>, %arg8: memref<8x3xf32, #tpu.memory_space<vmem>>) attributes {dimension_semantics = [#tpu.dimension_semantics<arbitrary>], iteration_bounds = array<i64: 1>, scalar_prefetch = 0 : i64, scratch_operands = 0 : i64, tpu.core_type = #tpu.core_type<tc>, window_params = [{pipeline_mode = #tpu.pipeline_mode<synchronous>, transform_indices = @transform_0, window_bounds = array<i64: 512, 32>}, {pipeline_mode = #tpu.pipeline_mode<synchronous>, transform_indices = @transform_1, window_bounds = array<i64: 32, 128>}, {pipeline_mode = #tpu.pipeline_mode<synchronous>, transform_indices = @transform_2, window_bounds = array<i64: 1, 128>}, {pipeline_mode = #tpu.pipeline_mode<synchronous>, transform_indices = @transform_3, window_bounds = array<i64: 64, 128, 128>}, {pipeline_mode = #tpu.pipeline_mode<synchronous>, transform_indices = @transform_4, window_bounds = array<i64: 1, 128>}, {pipeline_mode = #tpu.pipeline_mode<synchronous>, transform_indices = @transform_5, window_bounds = array<i64: 128, 3>}, {pipeline_mode = #tpu.pipeline_mode<synchronous>, transform_indices = @transform_6, window_bounds = array<i64: 1, 3>}, {pipeline_mode = #tpu.pipeline_mode<synchronous>, transform_indices = @transform_7, window_bounds = array<i64: 8, 3>}]} {
    %c0 = arith.constant 0 : index
    %c0_0 = arith.constant 0 : index
    %0 = vector.load %arg1[%c0, %c0_0] : memref<512x32xf32, #tpu.memory_space<vmem>>, vector<512x32xf32>
    %c0_1 = arith.constant 0 : index
    %c0_2 = arith.constant 0 : index
    %1 = vector.load %arg2[%c0_1, %c0_2] : memref<32x128xf32, #tpu.memory_space<vmem>>, vector<32x128xf32>
    %cst = arith.constant dense<0.000000e+00> : vector<512x128xf32>
    %2 = tpu.matmul %0, %1, %cst {dimension_numbers = #tpu.dot_dimension_numbers<[1], [0], [0], [1], [0, 0, 1, 1], [], []>} : vector<512x32xf32>, vector<32x128xf32>, vector<512x128xf32> -> vector<512x128xf32>
    %c0_3 = arith.constant 0 : index
    %c0_4 = arith.constant 0 : index
    %3 = vector.load %arg3[%c0_3, %c0_4] : memref<1x128xf32, #tpu.memory_space<vmem>>, vector<1x128xf32>
    %4 = vector.broadcast %3 : vector<1x128xf32> to vector<512x128xf32>
    %5 = arith.addf %2, %4 : vector<512x128xf32>
    %cst_5 = arith.constant 5.000000e-01 : f32
    %6 = vector.broadcast %cst_5 : f32 to vector<512x128xf32>
    %7 = arith.mulf %6, %5 : vector<512x128xf32>
    %cst_6 = arith.constant 0.707106769 : f32
    %8 = vector.broadcast %cst_6 : f32 to vector<512x128xf32>
    %9 = arith.mulf %5, %8 : vector<512x128xf32>
    %10 = math.erf %9 : vector<512x128xf32>
    %cst_7 = arith.constant 1.000000e+00 : f32
    %11 = vector.broadcast %cst_7 : f32 to vector<512x128xf32>
    %12 = arith.addf %11, %10 : vector<512x128xf32>
    %13 = arith.mulf %7, %12 : vector<512x128xf32>
    %14 = vector.shape_cast %13 : vector<512x128xf32> to vector<64x8x128xf32>
    %c0_8 = arith.constant 0 : index
    %c0_9 = arith.constant 0 : index
    %c0_10 = arith.constant 0 : index
    %15 = vector.load %arg4[%c0_8, %c0_9, %c0_10] : memref<64x128x128xf32, #tpu.memory_space<vmem>>, vector<64x128x128xf32>
    "tpu.trace_start"() <{level = 10 : i32, message = "sbk,skj->sbj"}> : () -> ()
    %cst_11 = arith.constant dense<0.000000e+00> : vector<64x8x128xf32>
    %16 = tpu.matmul %14, %15, %cst_11 {dimension_numbers = #tpu.dot_dimension_numbers<[2], [1], [1], [2], [0, 0, 0, 1, 1, 2], [0], [0]>} : vector<64x8x128xf32>, vector<64x128x128xf32>, vector<64x8x128xf32> -> vector<64x8x128xf32>
    "tpu.trace_stop"() : () -> ()
    %cst_12 = arith.constant dense<0.000000e+00> : vector<8x128xf32>
    %17 = vector.multi_reduction <add>, %16, %cst_12 [0] : vector<64x8x128xf32> to vector<8x128xf32>
    %c0_13 = arith.constant 0 : index
    %c0_14 = arith.constant 0 : index
    %18 = vector.load %arg5[%c0_13, %c0_14] : memref<1x128xf32, #tpu.memory_space<vmem>>, vector<1x128xf32>
    %19 = vector.broadcast %18 : vector<1x128xf32> to vector<8x128xf32>
    %20 = arith.addf %17, %19 : vector<8x128xf32>
    %cst_15 = arith.constant 5.000000e-01 : f32
    %21 = vector.broadcast %cst_15 : f32 to vector<8x128xf32>
    %22 = arith.mulf %21, %20 : vector<8x128xf32>
    %cst_16 = arith.constant 0.707106769 : f32
    %23 = vector.broadcast %cst_16 : f32 to vector<8x128xf32>
    %24 = arith.mulf %20, %23 : vector<8x128xf32>
    %25 = math.erf %24 : vector<8x128xf32>
    %cst_17 = arith.constant 1.000000e+00 : f32
    %26 = vector.broadcast %cst_17 : f32 to vector<8x128xf32>
    %27 = arith.addf %26, %25 : vector<8x128xf32>
    %28 = arith.mulf %22, %27 : vector<8x128xf32>
    %c0_18 = arith.constant 0 : index
    %c0_19 = arith.constant 0 : index
    %29 = vector.load %arg6[%c0_18, %c0_19] : memref<128x3xf32, #tpu.memory_space<vmem>>, vector<128x3xf32>
    %cst_20 = arith.constant dense<0.000000e+00> : vector<8x3xf32>
    %30 = tpu.matmul %28, %29, %cst_20 {dimension_numbers = #tpu.dot_dimension_numbers<[1], [0], [0], [1], [0, 0, 1, 1], [], []>} : vector<8x128xf32>, vector<128x3xf32>, vector<8x3xf32> -> vector<8x3xf32>
    %c0_21 = arith.constant 0 : index
    %c0_22 = arith.constant 0 : index
    %31 = vector.load %arg7[%c0_21, %c0_22] : memref<1x3xf32, #tpu.memory_space<vmem>>, vector<1x3xf32>
    %32 = vector.broadcast %31 : vector<1x3xf32> to vector<8x3xf32>
    %33 = arith.addf %30, %32 : vector<8x3xf32>
    %c0_23 = arith.constant 0 : index
    %c0_24 = arith.constant 0 : index
    %34 = vector.load %arg8[%c0_23, %c0_24] : memref<8x3xf32, #tpu.memory_space<vmem>>, vector<8x3xf32>
    tpu.vector_store %arg8[%c0_23, %c0_24], %33 {strides = array<i32>} : memref<8x3xf32, #tpu.memory_space<vmem>>, vector<8x3xf32>,
    return
  }
  func.func @transform_0(%arg0: i32) -> (i32, i32) {
    %c0_i32 = arith.constant 0 : i32
    %c0_i32_0 = arith.constant 0 : i32
    %c0_i32_1 = arith.constant 0 : i32
    return %c0_i32, %c0_i32_0 : i32, i32
  }
  func.func @transform_1(%arg0: i32) -> (i32, i32) {
    %c0_i32 = arith.constant 0 : i32
    %c0_i32_0 = arith.constant 0 : i32
    %c0_i32_1 = arith.constant 0 : i32
    return %c0_i32, %c0_i32_0 : i32, i32
  }
  func.func @transform_2(%arg0: i32) -> (i32, i32) {
    %c0_i32 = arith.constant 0 : i32
    %c0_i32_0 = arith.constant 0 : i32
    %c0_i32_1 = arith.constant 0 : i32
    return %c0_i32, %c0_i32_0 : i32, i32
  }
  func.func @transform_3(%arg0: i32) -> (i32, i32, i32) {
    %c0_i32 = arith.constant 0 : i32
    %c0_i32_0 = arith.constant 0 : i32
    %c0_i32_1 = arith.constant 0 : i32
    %c0_i32_2 = arith.constant 0 : i32
    return %c0_i32, %c0_i32_0, %c0_i32_1 : i32, i32, i32
  }
  func.func @transform_4(%arg0: i32) -> (i32, i32) {
    %c0_i32 = arith.constant 0 : i32
    %c0_i32_0 = arith.constant 0 : i32
    %c0_i32_1 = arith.constant 0 : i32
    return %c0_i32, %c0_i32_0 : i32, i32
  }
  func.func @transform_5(%arg0: i32) -> (i32, i32) {
    %c0_i32 = arith.constant 0 : i32
    %c0_i32_0 = arith.constant 0 : i32
    %c0_i32_1 = arith.constant 0 : i32
    return %c0_i32, %c0_i32_0 : i32, i32
  }
  func.func @transform_6(%arg0: i32) -> (i32, i32) {
    %c0_i32 = arith.constant 0 : i32
    %c0_i32_0 = arith.constant 0 : i32
    %c0_i32_1 = arith.constant 0 : i32
    return %c0_i32, %c0_i32_0 : i32, i32
  }
  func.func @transform_7(%arg0: i32) -> (i32, i32) {
    %c0_i32 = arith.constant 0 : i32
    %c0_i32_0 = arith.constant 0 : i32
    %c0_i32_1 = arith.constant 0 : i32
    return %c0_i32, %c0_i32_0 : i32, i32
  }
}

</mosaic_0001>

<bundles_post_ra>
// kernel: tpu_custom_call.1
= control target key start
LH: loop header
LB: loop body
LE: loop exit
PB: predicated region body
PF: predicated region fallthrough
CT: control target
= control target key end

     0   :  { %12 = vsyncpa [#allocation3], 0  ;;  %s13880_s0 = inlined_call_operand.vmem [shape: f32[512,32], index: 0, kind: input, shape index: {}]   ;;  %s13881_s1 = inlined_call_operand.hbm [shape: f32[32,128], index: 1, kind: input, shape index: {}]   ;;  %s13882_s2 = inlined_call_operand.hbm [shape: f32[1,128], index: 2, kind: input, shape index: {}]   ;;  %s13883_s3 = inlined_call_operand.hbm [shape: f32[64,128,128], index: 3, kind: input, shape index: {}]   ;;  %s13884_s4 = inlined_call_operand.hbm [shape: f32[1,128], index: 4, kind: input, shape index: {}]   ;;  %s13885_s5 = inlined_call_operand.vmem [shape: f32[128,3], index: 5, kind: input, shape index: {}]   ;;  %s13886_s6 = inlined_call_operand.hbm [shape: f32[1,3], index: 6, kind: input, shape index: {}]   ;;  %s13887_s7 = inlined_call_operand.vmem [shape: f32[8,3], index: 7, kind: output, shape index: {}]  }
   0x1   :  { %13 = vsyncpa [#allocation5], 0 }
   0x2   :  { %14 = vsyncpa [#allocation8], 0  ;;  %s12192_s24 = smov [#allocation4]   ;;  %s12193_s26 = smov [#allocation7]  }
   0x3   :  { %s35_s25 = sshll.u32 %s12192_s24, 4  ;;  %s57_s27 = sshll.u32 %s12193_s26, 4  ;;  %s36_s25 = int_to_ptr.vmem [resolvable:$true] %s35_s25  ;;  %s58_s27 = int_to_ptr.vmem [resolvable:$true] %s57_s27 }
   0x4   :  { %s12076_s30 = scalar_lea.hbm %s13882_s2, 16 }
   0x5   :  { %p12077_p0 = scmp.ne.s32.totalorder %s13882_s2, %s12076_s30  ;;  %p12080_p1 = scmp.lt.u32.totalorder %s12076_s30, %s13882_s2 }
   0x7   :  { %p12082_p2 = pnand %p12080_p1, %p12077_p0 }
   0x9   :  { %12085 = shalt.err (!%p12082_p2)
}
   0xa   :  { %s12086_s12 = scalar_lea.vmem %s36_s25, 16  ;;  %s12090_s13 = scalar_lea.vmem %s36_s25, 32 }
   0xb   :  { %p12087_p3 = scmp.ne.s32.totalorder %s36_s25, %s12086_s12  ;;  %p12091_p4 = scmp.lt.s32.totalorder %s36_s25, %s36_s25 }
   0xc   :  { %p12092_p5 = scmp.lt.s32.totalorder %s12090_s13, %s12086_s12 }
   0xe   :  { %p12093_p6 = por %p12092_p5, %p12091_p4 }
  0x10   :  { %p12094_p7 = pnand %p12093_p6, %p12087_p3 }
  0x12   :  { %12097 = shalt.err (!%p12094_p7)
}
  0x13   :  { %38 = dma.hbm_to_vmem [thread:$0]  %s13882_s2, 16, %s36_s25, [#allocation5]  }
  0x14   :  { %s12098_s18 = scalar_lea.hbm %s13884_s4, 16 }
  0x15   :  { %p12099_p8 = scmp.ne.s32.totalorder %s13884_s4, %s12098_s18  ;;  %p12102_p9 = scmp.lt.u32.totalorder %s12098_s18, %s13884_s4 }
  0x17   :  { %p12104_p10 = pnand %p12102_p9, %p12099_p8 }
  0x19   :  { %12107 = shalt.err (!%p12104_p10)
}
  0x1a   :  { %s12108_s23 = scalar_lea.vmem %s58_s27, 16  ;;  %s12112_s24 = scalar_lea.vmem %s58_s27, 32 }
  0x1b   :  { %p12109_p11 = scmp.ne.s32.totalorder %s58_s27, %s12108_s23  ;;  %p12113_p12 = scmp.lt.s32.totalorder %s58_s27, %s58_s27 }
  0x1c   :  { %p12114_p13 = scmp.lt.s32.totalorder %s12112_s24, %s12108_s23 }
  0x1e   :  { %p12115_p0 = por %p12114_p13, %p12113_p12 }
  0x20   :  { %p12116_p1 = pnand %p12115_p0, %p12109_p11 }
  0x22   :  { %12119 = shalt.err (!%p12116_p1)
}
  0x23   :  { %60 = dma.hbm_to_vmem [thread:$0]  %s13884_s4, 16, %s58_s27, [#allocation8]  }
  0x24   :  { %s12194_s26 = smov [#allocation2]   ;;  %s12120_s8 = scalar_lea.hbm %s13881_s1, 512 }
  0x25   :  { %s22_s28 = sshll.u32 %s12194_s26, 4  ;;  %p12121_p2 = scmp.ne.s32.totalorder %s13881_s1, %s12120_s8  ;;  %s23_s28 = int_to_ptr.vmem [resolvable:$true] %s22_s28 }
  0x26   :  { %p12124_p3 = scmp.lt.u32.totalorder %s12120_s8, %s13881_s1 }
  0x28   :  { %p12126_p4 = pnand %p12124_p3, %p12121_p2 }
  0x2a   :  { %12129 = shalt.err (!%p12126_p4)
}
  0x2b   :  { %s12130_s13 = scalar_lea.vmem %s23_s28, 512  ;;  %p12135_p6 = scmp.lt.s32.totalorder %s23_s28, %s23_s28 }
  0x2c   :  { %p12131_p5 = scmp.ne.s32.totalorder %s23_s28, %s12130_s13  ;;  %p12136_p7 = scmp.lt.s32.totalorder %s12130_s13, %s12130_s13 }
  0x2e   :  { %p12137_p8 = por %p12136_p7, %p12135_p6 }
  0x30   :  { %p12138_p9 = pnand %p12137_p8, %p12131_p5 }
  0x32   :  { %12141 = shalt.err (!%p12138_p9)
}
  0x33   :  { %s12195_s4 = smov 128   ;;  %s12196_s27 = smov 8  }
  0x34   :  { %28 = dma.hbm_to_vmem [thread:$0]  %s13881_s1, 512, %s23_s28, [#allocation3], %s12195_s4, %s12195_s4, %s12196_s27  }
  0x35   :  { %s12197_s16 = smov [#allocation6]   ;;  %s12198_s18 = smov [#allocation9]  }
  0x36   :  { %s44_s17 = sshll.u32 %s12197_s16, 4  ;;  %s69_s19 = sshll.u32 %s12198_s18, 4  ;;  %s45_s17 = int_to_ptr.vmem [resolvable:$true] %s44_s17  ;;  %s70_s19 = int_to_ptr.vmem [resolvable:$true] %s69_s19 }
  0x37   :  { %s12142_s22 = scalar_lea.hbm %s13883_s3, 131072 }
  0x38   :  { %p12143_p10 = scmp.ne.s32.totalorder %s13883_s3, %s12142_s22  ;;  %p12146_p11 = scmp.lt.u32.totalorder %s12142_s22, %s13883_s3 }
  0x3a   :  { %p12148_p12 = pnand %p12146_p11, %p12143_p10 }
  0x3c   :  { %12151 = shalt.err (!%p12148_p12)
}
  0x3d   :  { %s12152_s1 = scalar_lea.vmem %s45_s17, 131072  ;;  %p12157_p0 = scmp.lt.s32.totalorder %s45_s17, %s45_s17 }
  0x3e   :  { %p12153_p13 = scmp.ne.s32.totalorder %s45_s17, %s12152_s1  ;;  %p12158_p1 = scmp.lt.s32.totalorder %s12152_s1, %s12152_s1 }
  0x40   :  { %p12159_p2 = por %p12158_p1, %p12157_p0 }
  0x42   :  { %p12160_p3 = pnand %p12159_p2, %p12153_p13 }
  0x44   :  { %12163 = shalt.err (!%p12160_p3)
}
  0x45   :  { %50 = dma.hbm_to_vmem [thread:$0]  %s13883_s3, 131072, %s45_s17, [#allocation5], %s12195_s4, %s12195_s4, %s12196_s27  }
  0x46   :  { %s12164_s8 = scalar_lea.hbm %s13886_s6, 16 }
  0x47   :  { %p12165_p4 = scmp.ne.s32.totalorder %s13886_s6, %s12164_s8  ;;  %p12168_p5 = scmp.lt.u32.totalorder %s12164_s8, %s13886_s6 }
  0x49   :  { %p12170_p6 = pnand %p12168_p5, %p12165_p4 }
  0x4b   :  { %12173 = shalt.err (!%p12170_p6)
}
  0x4c   :  { %s12174_s13 = scalar_lea.vmem %s70_s19, 16  ;;  %s12178_s14 = scalar_lea.vmem %s70_s19, 32 }
  0x4d   :  { %p12175_p7 = scmp.ne.s32.totalorder %s70_s19, %s12174_s13  ;;  %p12179_p8 = scmp.lt.s32.totalorder %s70_s19, %s70_s19 }
  0x4e   :  { %p12180_p9 = scmp.lt.s32.totalorder %s12178_s14, %s12174_s13 }
  0x50   :  { %p12181_p10 = por %p12180_p9, %p12179_p8 }
  0x52   :  { %p12182_p11 = pnand %p12181_p10, %p12175_p7 }
  0x54   :  { %12185 = shalt.err (!%p12182_p11)
}
  0x55   :  { %72 = dma.hbm_to_vmem [thread:$0]  %s13886_s6, 16, %s70_s19, [#allocation8]  }
  0x56   :  { %12186 = dma.done.wait [#allocation3], 512  }
  0x57   :  { %12187 = vsyncadd [#allocation3], 4294966784 }
  0x58   :  { %12188 = dma.done.wait [#allocation5], 131088  }
  0x59   :  { %12189 = vsyncadd [#allocation5], 4294836208 }
  0x5a   :  { %12190 = dma.done.wait [#allocation8], 32  }
  0x5b   :  { %12191 = vsyncadd [#allocation8], 4294967264  ;;  %v12199_v0 = vmov 0.0|0.0   ;;  %vm163_vm0 = vcmask 261120   ;;  %v152_v1 = vld [vmem:[#allocation2] sm:$0xff]  ;;  %v153_v2 = vld [vmem:[#allocation2 + $0x8] sm:$0xff] }
  0x5c   :  { %10370 = vmatprep.subr.bf16.mxu1 %v12199_v0  ;;  %v154_v3 = vld [vmem:[#allocation2 + $0x10] sm:$0xff]  ;;  %v10362_v4 = vpack.c.bf16 %v153_v2, %v152_v1  ;;  %v155_v5 = vld [vmem:[#allocation2 + $0x18] sm:$0xff]  ;;  %v88_v6 = vld [vmem:[%s13880_s0] sm:$0xff]  ;;  %vm12200_vm1 = vmmov 0   ;;  %vm6734_vm2 = vcmask 23552  }
  0x5d   :  { %v10366_v7 = vpack.c.bf16 %v155_v5, %v154_v3  ;;  %7991 = vmatprep.mubr.msk.f32.mxu0 %vm163_vm0, %v88_v6  ;;  %v89_v8 = vld [vmem:[%s13880_s0 + $0x8] sm:$0xff]  ;;  %v90_v9 = vld [vmem:[%s13880_s0 + $0x10] sm:$0xff]  ;;  %v91_v10 = vld [vmem:[%s13880_s0 + $0x18] sm:$0xff] }
  0x5e   :  { %10363 = vmatprep.subr.bf16.mxu0 %v10362_v4  ;;  %v92_v11 = vld [vmem:[%s13880_s0 + $0x20] sm:$0xff]  ;;  %v93_v12 = vld [vmem:[%s13880_s0 + $0x28] sm:$0xff]  ;;  %v94_v14 = vld [vmem:[%s13880_s0 + $0x30] sm:$0xff] }
  0x5f   :  { %10365 = vmatpush3.bf16.msra.mxu0 %v10362_v4  ;;  %v1061_v13 = vld [vmem:[#allocation6] sm:$0xff]  ;;  %v1062_v15 = vld [vmem:[#allocation6 + $0x8] sm:$0xff]  ;;  %v1063_v17 = vld [vmem:[#allocation6 + $0x10] sm:$0xff] }
  0x60   :  { %10367 = vmatprep.subr.bf16.mxu0 %v10366_v7  ;;  %v10371_v16 = vpack.c.bf16 %v1062_v15, %v1061_v13  ;;  %v1064_v18 = vld [vmem:[#allocation6 + $0x18] sm:$0xff]  ;;  %v1125_v21 = vld [vmem:[#allocation6 + $0x200] sm:$0xff]  ;;  %v1126_v22 = vld [vmem:[#allocation6 + $0x208] sm:$0xff] }
  0x61   :  { %v95_v19 = vld [vmem:[%s13880_s0 + $0x38] sm:$0xff]  ;;  %v10374_v20 = vpack.c.bf16 %v1064_v18, %v1063_v17  ;;  %v96_v23 = vld [vmem:[%s13880_s0 + $0x40] sm:$0xff]  ;;  %v1066_v25 = vld [vmem:[#allocation6 + $0x28] sm:$0xff]  ;;  %v10467_v26 = vpack.c.bf16 %v1126_v22, %v1125_v21 }
  0x62   :  { %10372 = vmatpush3.bf16.msra.mxu1 %v10371_v16  ;;  %v1065_v24 = vld [vmem:[#allocation6 + $0x20] sm:$0xff]  ;;  %v98_v29 = vld [vmem:[%s13880_s0 + $0x50] sm:$0xff]  ;;  %v99_v30 = vld [vmem:[%s13880_s0 + $0x58] sm:$0xff] }
  0x63   :  { %10369 = vmatpush3.bf16.msra.mxu0 %v10366_v7  ;;  %10373 = vmatprep.subr.bf16.mxu1 %v12199_v0  ;;  %v97_v27 = vld [vmem:[%s13880_s0 + $0x48] sm:$0xff]  ;;  %v10377_v28 = vpack.c.bf16 %v1066_v25, %v1065_v24  ;;  %v100_v31 = vld [vmem:[%s13880_s0 + $0x60] sm:$0xff]  ;;  %v102_v33 = vld [vmem:[%s13880_s0 + $0x70] sm:$0xff] }
  0x64   :  { %10466 = vmatprep.subr.bf16.mxu0 %v12199_v0  ;;  %v101_v32 = vld [vmem:[%s13880_s0 + $0x68] sm:$0xff]  ;;  %v103_v34 = vld [vmem:[%s13880_s0 + $0x78] sm:$0xff]  ;;  %v104_v35 = vld [vmem:[%s13880_s0 + $0x80] sm:$0xff] }
  0x65   :  { %v105_v36 = vld [vmem:[%s13880_s0 + $0x88] sm:$0xff]  ;;  %v106_v37 = vld [vmem:[%s13880_s0 + $0x90] sm:$0xff]  ;;  %v107_v38 = vld [vmem:[%s13880_s0 + $0x98] sm:$0xff] }
  0x66   :  { %7992 = vmatmul.mubr.msk.f32.vlgmr.msra.gmra.mrb[0].mxu0 %vm163_vm0, %v89_v8  ;;  %10375 = vmatpush3.bf16.msra.mxu1 %v10374_v20  ;;  %v108_v39 = vld [vmem:[%s13880_s0 + $0xa0] sm:$0xff]  ;;  %v109_v40 = vld [vmem:[%s13880_s0 + $0xa8] sm:$0xff]  ;;  %v110_v41 = vld [vmem:[%s13880_s0 + $0xb0] sm:$0xff] }
  0x67   :  { %7994 = vmatprep.mubr.msk.f32.mxu0 %vm163_vm0, %v90_v9  ;;  %10376 = vmatprep.subr.bf16.mxu1 %v12199_v0  ;;  %v111_v42 = vld [vmem:[%s13880_s0 + $0xb8] sm:$0xff]  ;;  %v112_v43 = vld [vmem:[%s13880_s0 + $0xc0] sm:$0xff]  ;;  %v113_v44 = vld [vmem:[%s13880_s0 + $0xc8] sm:$0xff] }
  0x68   :  { %10468 = vmatpush3.bf16.msra.mxu0 %v10467_v26  ;;  %v114_v45 = vld [vmem:[%s13880_s0 + $0xd0] sm:$0xff]  ;;  %v115_v46 = vld [vmem:[%s13880_s0 + $0xd8] sm:$0xff]  ;;  %v116_v47 = vld [vmem:[%s13880_s0 + $0xe0] sm:$0xff] }
  0x69   :  { %10469 = vmatprep.subr.bf16.mxu0 %v12199_v0  ;;  %v117_v48 = vld [vmem:[%s13880_s0 + $0xe8] sm:$0xff]  ;;  %v118_v49 = vld [vmem:[%s13880_s0 + $0xf0] sm:$0xff]  ;;  %v119_v50 = vld [vmem:[%s13880_s0 + $0xf8] sm:$0xff] }
  0x6a   :  { %7995 = vmatmul.mubr.msk.f32.gmra.mrb[2].mxu0 %vm163_vm0, %v91_v10  ;;  %10378 = vmatpush3.bf16.msra.mxu1 %v10377_v28  ;;  %v120_v51 = vld [vmem:[%s13880_s0 + $0x100] sm:$0xff]  ;;  %v121_v52 = vld [vmem:[%s13880_s0 + $0x108] sm:$0xff]  ;;  %v122_v53 = vld [vmem:[%s13880_s0 + $0x110] sm:$0xff] }
  0x6b   :  { %7997 = vmatprep.mubr.msk.f32.mxu0 %vm163_vm0, %v92_v11  ;;  %10379 = vmatprep.subr.bf16.mxu1 %v12199_v0  ;;  %v123_v54 = vld [vmem:[%s13880_s0 + $0x118] sm:$0xff]  ;;  %v124_v55 = vld [vmem:[%s13880_s0 + $0x120] sm:$0xff]  ;;  %v125_v56 = vld [vmem:[%s13880_s0 + $0x128] sm:$0xff] }
  0x6c   :  { %v126_v57 = vld [vmem:[%s13880_s0 + $0x130] sm:$0xff]  ;;  %v127_v58 = vld [vmem:[%s13880_s0 + $0x138] sm:$0xff]  ;;  %v128_v59 = vld [vmem:[%s13880_s0 + $0x140] sm:$0xff] }
  0x6d   :  { %v129_v60 = vld [vmem:[%s13880_s0 + $0x148] sm:$0xff]  ;;  %v130_v61 = vld [vmem:[%s13880_s0 + $0x150] sm:$0xff]  ;;  %v131_v62 = vld [vmem:[%s13880_s0 + $0x158] sm:$0xff] }
  0x6e   :  { %7998 = vmatmul.mubr.msk.f32.gmra.mrb[4].mxu0 %vm163_vm0, %v93_v12  ;;  %v1067_v63 = vld [vmem:[#allocation6 + $0x30] sm:$0xff]  ;;  %v1068_v1 = vld [vmem:[#allocation6 + $0x38] sm:$0xff]  ;;  %v133_v7 = vld [vmem:[%s13880_s0 + $0x168] sm:$0xff] }
  0x6f   :  { %8000 = vmatprep.mubr.msk.f32.mxu0 %vm163_vm0, %v94_v14  ;;  %v1127_v2 = vld [vmem:[#allocation6 + $0x210] sm:$0xff]  ;;  %v132_v3 = vld [vmem:[%s13880_s0 + $0x160] sm:$0xff]  ;;  %v10380_v4 = vpack.c.bf16 %v1068_v1, %v1067_v63  ;;  %v1070_v9 = vld [vmem:[#allocation6 + $0x48] sm:$0xff] }
  0x70   :  { %v1128_v5 = vld [vmem:[#allocation6 + $0x218] sm:$0xff]  ;;  %v1069_v8 = vld [vmem:[#allocation6 + $0x40] sm:$0xff]  ;;  %v134_v11 = vld [vmem:[%s13880_s0 + $0x170] sm:$0xff] }
  0x71   :  { %v10470_v6 = vpack.c.bf16 %v1128_v5, %v1127_v2  ;;  %10381 = vmatpush3.bf16.msra.mxu1 %v10380_v4  ;;  %v1129_v10 = vld [vmem:[#allocation6 + $0x220] sm:$0xff]  ;;  %v10383_v12 = vpack.c.bf16 %v1070_v9, %v1069_v8  ;;  %v1130_v13 = vld [vmem:[#allocation6 + $0x228] sm:$0xff]  ;;  %v135_v15 = vld [vmem:[%s13880_s0 + $0x178] sm:$0xff] }
  0x72   :  { %8001 = vmatmul.mubr.msk.f32.gmra.mrb[6].mxu0 %vm163_vm0, %v95_v19  ;;  %10382 = vmatprep.subr.bf16.mxu1 %v12199_v0  ;;  %v10473_v14 = vpack.c.bf16 %v1130_v13, %v1129_v10  ;;  %v1071_v16 = vld [vmem:[#allocation6 + $0x50] sm:$0xff]  ;;  %v1072_v17 = vld [vmem:[#allocation6 + $0x58] sm:$0xff]  ;;  %v1073_v24 = vld [vmem:[#allocation6 + $0x60] sm:$0xff] }
  0x73   :  { %8003 = vmatprep.mubr.msk.f32.mxu0 %vm163_vm0, %v96_v23  ;;  %10471 = vmatpush3.bf16.msra.mxu0 %v10470_v6  ;;  %v1131_v18 = vld [vmem:[#allocation6 + $0x230] sm:$0xff]  ;;  %v136_v19 = vld [vmem:[%s13880_s0 + $0x180] sm:$0xff]  ;;  %v10386_v20 = vpack.c.bf16 %v1072_v17, %v1071_v16  ;;  %v137_v23 = vld [vmem:[%s13880_s0 + $0x188] sm:$0xff] }
  0x74   :  { %10472 = vmatprep.subr.bf16.mxu0 %v12199_v0  ;;  %v1132_v21 = vld [vmem:[#allocation6 + $0x238] sm:$0xff]  ;;  %v1074_v25 = vld [vmem:[#allocation6 + $0x68] sm:$0xff]  ;;  %v1133_v26 = vld [vmem:[#allocation6 + $0x240] sm:$0xff] }
  0x75   :  { %10384 = vmatpush3.bf16.msra.mxu1 %v10383_v12  ;;  %v10476_v22 = vpack.c.bf16 %v1132_v21, %v1131_v18  ;;  %v10389_v28 = vpack.c.bf16 %v1074_v25, %v1073_v24  ;;  %v1078_v8 = vld [vmem:[#allocation6 + $0x88] sm:$0xff]  ;;  %v1079_v16 = vld [vmem:[#allocation6 + $0x90] sm:$0xff]  ;;  %v1080_v17 = vld [vmem:[#allocation6 + $0x98] sm:$0xff] }
  0x76   :  { %8004 = vmatmul.mubr.msk.f32.gmra.mrb[8].mxu0 %vm163_vm0, %v97_v27  ;;  %10385 = vmatprep.subr.bf16.mxu1 %v12199_v0  ;;  %v138_v27 = vld [vmem:[%s13880_s0 + $0x190] sm:$0xff]  ;;  %v1081_v21 = vld [vmem:[#allocation6 + $0xa0] sm:$0xff] }
  0x77   :  { %8006 = vmatprep.mubr.msk.f32.mxu0 %vm163_vm0, %v98_v29  ;;  %10474 = vmatpush3.bf16.msra.mxu0 %v10473_v14  ;;  %v1134_v29 = vld [vmem:[#allocation6 + $0x248] sm:$0xff]  ;;  %v1157_v24 = vld [vmem:[#allocation6 + $0x300] sm:$0xff] }
  0x78   :  { %10475 = vmatprep.subr.bf16.mxu0 %v12199_v0  ;;  %v1158_v25 = vld [vmem:[#allocation6 + $0x308] sm:$0xff] }
  0x79   :  { %10387 = vmatpush3.bf16.msra.mxu1 %v10386_v20  ;;  %v10398_v20 = vpack.c.bf16 %v1080_v17, %v1079_v16  ;;  %v1094_v17 = vld [vmem:[#allocation6 + $0x108] sm:$0xff] }
  0x7a   :  { %8007 = vmatmul.mubr.msk.f32.gmra.mrb[10].mxu0 %vm163_vm0, %v99_v30  ;;  %10388 = vmatprep.subr.bf16.mxu1 %v12199_v0  ;;  %v10479_v30 = vpack.c.bf16 %v1134_v29, %v1133_v26 }
  0x7b   :  { %8009 = vmatprep.mubr.msk.f32.mxu0 %vm163_vm0, %v100_v31  ;;  %10477 = vmatpush3.bf16.msra.mxu0 %v10476_v22  ;;  %v139_v31 = vld [vmem:[%s13880_s0 + $0x198] sm:$0xff] }
  0x7c   :  { %10478 = vmatprep.subr.bf16.mxu0 %v12199_v0 }
  0x7d   :  { %10390 = vmatpush3.bf16.msra.mxu1 %v10389_v28 }
  0x7e   :  { %8010 = vmatmul.mubr.msk.f32.gmra.mrb[12].mxu0 %vm163_vm0, %v101_v32  ;;  %v1075_v32 = vld [vmem:[#allocation6 + $0x70] sm:$0xff]  ;;  %10391 = vmatprep.subr.bf16.mxu1 %v12199_v0 }
  0x7f   :  { %8012 = vmatprep.mubr.msk.f32.mxu0 %vm163_vm0, %v102_v33  ;;  %10480 = vmatpush3.bf16.msra.mxu0 %v10479_v30  ;;  %v1076_v33 = vld [vmem:[#allocation6 + $0x78] sm:$0xff] }
  0x80   :  { %10481 = vmatprep.subr.bf16.mxu0 %v12199_v0 }
  0x82   :  { %8013 = vmatmul.mubr.msk.f32.gmra.mrb[14].mxu0 %vm163_vm0, %v103_v34  ;;  %v1135_v34 = vld [vmem:[#allocation6 + $0x250] sm:$0xff] }
  0x83   :  { %8015 = vmatprep.mubr.msk.f32.mxu0 %vm163_vm0, %v104_v35  ;;  %v140_v35 = vld [vmem:[%s13880_s0 + $0x1a0] sm:$0xff] }
  0x86   :  { %8016 = vmatmul.mubr.msk.f32.gmra.mrb[16].mxu0 %vm163_vm0, %v105_v36  ;;  %v10392_v36 = vpack.c.bf16 %v1076_v33, %v1075_v32  ;;  %v10515_v32 = vpack.c.bf16 %v1158_v25, %v1157_v24  ;;  %v1083_v33 = vld [vmem:[#allocation6 + $0xb0] sm:$0xff] }
  0x87   :  { %8018 = vmatprep.mubr.msk.f32.mxu0 %vm163_vm0, %v106_v37  ;;  %v1136_v37 = vld [vmem:[#allocation6 + $0x258] sm:$0xff] }
  0x88   :  { %10393 = vmatpush3.bf16.msra.mxu1 %v10392_v36  ;;  %v1159_v36 = vld [vmem:[#allocation6 + $0x310] sm:$0xff] }
  0x89   :  { %10394 = vmatprep.subr.bf16.mxu1 %v12199_v0 }
  0x8a   :  { %8019 = vmatmul.mubr.msk.f32.gmra.mrb[18].mxu0 %vm163_vm0, %v107_v38  ;;  %v10482_v38 = vpack.c.bf16 %v1136_v37, %v1135_v34  ;;  %v1160_v37 = vld [vmem:[#allocation6 + $0x318] sm:$0xff] }
  0x8b   :  { %8021 = vmatprep.mubr.msk.f32.mxu0 %vm163_vm0, %v108_v39  ;;  %v141_v39 = vld [vmem:[%s13880_s0 + $0x1a8] sm:$0xff] }
  0x8c   :  { %10483 = vmatpush3.bf16.msra.mxu0 %v10482_v38 }
  0x8d   :  { %10484 = vmatprep.subr.bf16.mxu0 %v12199_v0 }
  0x8e   :  { %8022 = vmatmul.mubr.msk.f32.gmra.mrb[20].mxu0 %vm163_vm0, %v109_v40  ;;  %v142_v40 = vld [vmem:[%s13880_s0 + $0x1b0] sm:$0xff] }
  0x8f   :  { %8024 = vmatprep.mubr.msk.f32.mxu0 %vm163_vm0, %v110_v41  ;;  %v1137_v41 = vld [vmem:[#allocation6 + $0x260] sm:$0xff] }
  0x92   :  { %8025 = vmatmul.mubr.msk.f32.gmra.mrb[22].mxu0 %vm163_vm0, %v111_v42  ;;  %v1138_v42 = vld [vmem:[#allocation6 + $0x268] sm:$0xff] }
  0x93   :  { %8027 = vmatprep.mubr.msk.f32.mxu0 %vm163_vm0, %v112_v43  ;;  %v13888_v43 = vmov 0.0  }
  0x94   :  { %8119 = vmatprep.mubr.msk.f32.mxu1 %vm12200_vm1, %v13888_v43 }
  0x96   :  { %8028 = vmatmul.mubr.msk.f32.gmra.mrb[24].mxu0 %vm163_vm0, %v113_v44  ;;  %v10485_v44 = vpack.c.bf16 %v1138_v42, %v1137_v41  ;;  %v1085_v41 = vld [vmem:[#allocation6 + $0xc0] sm:$0xff]  ;;  %v1086_v42 = vld [vmem:[#allocation6 + $0xc8] sm:$0xff] }
  0x97   :  { %8030 = vmatprep.mubr.msk.f32.mxu0 %vm163_vm0, %v114_v45  ;;  %v143_v45 = vld [vmem:[%s13880_s0 + $0x1b8] sm:$0xff] }
  0x98   :  { %10486 = vmatpush3.bf16.msra.mxu0 %v10485_v44  ;;  %v1161_v44 = vld [vmem:[#allocation6 + $0x320] sm:$0xff] }
  0x99   :  { %10487 = vmatprep.subr.bf16.mxu0 %v12199_v0 }
  0x9a   :  { %8031 = vmatmul.mubr.msk.f32.gmra.mrb[26].mxu0 %vm163_vm0, %v115_v46  ;;  %v144_v46 = vld [vmem:[%s13880_s0 + $0x1c0] sm:$0xff] }
  0x9b   :  { %8033 = vmatprep.mubr.msk.f32.mxu0 %vm163_vm0, %v116_v47  ;;  %v1139_v47 = vld [vmem:[#allocation6 + $0x270] sm:$0xff] }
  0x9e   :  { %8034 = vmatmul.mubr.msk.f32.gmra.mrb[28].mxu0 %vm163_vm0, %v117_v48  ;;  %v1140_v48 = vld [vmem:[#allocation6 + $0x278] sm:$0xff] }
  0x9f   :  { %8036 = vmatprep.mubr.msk.f32.mxu0 %vm163_vm0, %v118_v49  ;;  %v10488_v49 = vpack.c.bf16 %v1140_v48, %v1139_v47  ;;  %v10407_v47 = vpack.c.bf16 %v1086_v42, %v1085_v41 }
  0xa1   :  { %10489 = vmatpush3.bf16.msra.mxu0 %v10488_v49  ;;  %v1087_v49 = vld [vmem:[#allocation6 + $0xd0] sm:$0xff] }
  0xa2   :  { %8037 = vmatmul.mubr.msk.f32.gmra.mrb[30].mxu0 %vm163_vm0, %v119_v50  ;;  %v145_v50 = vld [vmem:[%s13880_s0 + $0x1c8] sm:$0xff]  ;;  %10514 = vmatprep.subr.bf16.mxu0 %v12199_v0 }
  0xa3   :  { %8039 = vmatprep.mubr.msk.f32.mxu0 %vm163_vm0, %v120_v51  ;;  %v146_v51 = vld [vmem:[%s13880_s0 + $0x1d0] sm:$0xff] }
  0xa6   :  { %8040 = vmatmul.mubr.msk.f32.gmra.mrb[32].mxu0 %vm163_vm0, %v121_v52  ;;  %v147_v52 = vld [vmem:[%s13880_s0 + $0x1d8] sm:$0xff] }
  0xa7   :  { %8042 = vmatprep.mubr.msk.f32.mxu0 %vm163_vm0, %v122_v53  ;;  %v148_v53 = vld [vmem:[%s13880_s0 + $0x1e0] sm:$0xff] }
  0xaa   :  { %8043 = vmatmul.mubr.msk.f32.gmra.mrb[34].mxu0 %vm163_vm0, %v123_v54  ;;  %v149_v54 = vld [vmem:[%s13880_s0 + $0x1e8] sm:$0xff] }
  0xab   :  { %8045 = vmatprep.mubr.msk.f32.mxu0 %vm163_vm0, %v124_v55  ;;  %v150_v55 = vld [vmem:[%s13880_s0 + $0x1f0] sm:$0xff] }
  0xae   :  { %8046 = vmatmul.mubr.msk.f32.gmra.mrb[36].mxu0 %vm163_vm0, %v125_v56  ;;  %v151_v56 = vld [vmem:[%s13880_s0 + $0x1f8] sm:$0xff] }
  0xaf   :  { %8048 = vmatprep.mubr.msk.f32.mxu0 %vm163_vm0, %v126_v57  ;;  %v12580_v57 = vld [vmem:[#allocation4] ss:$0 sm:$0xff] }
  0xb2   :  { %8049 = vmatmul.mubr.msk.f32.gmra.mrb[38].mxu0 %vm163_vm0, %v127_v58 }
  0xb3   :  { %8051 = vmatprep.mubr.msk.f32.mxu0 %vm163_vm0, %v128_v59 }
  0xb6   :  { %8052 = vmatmul.mubr.msk.f32.gmra.mrb[40].mxu0 %vm163_vm0, %v129_v60 }
  0xb7   :  { %8054 = vmatprep.mubr.msk.f32.mxu0 %vm163_vm0, %v130_v61 }
  0xba   :  { %8055 = vmatmul.mubr.msk.f32.gmra.mrb[42].mxu0 %vm163_vm0, %v131_v62 }
  0xbb   :  { %8057 = vmatprep.mubr.msk.f32.mxu0 %vm163_vm0, %v132_v3 }
  0xbe   :  { %8058 = vmatmul.mubr.msk.f32.gmra.mrb[44].mxu0 %vm163_vm0, %v133_v7  ;;  %v1077_v7 = vld [vmem:[#allocation6 + $0x80] sm:$0xff] }
  0xbf   :  { %8060 = vmatprep.mubr.msk.f32.mxu0 %vm163_vm0, %v134_v11  ;;  %v10395_v14 = vpack.c.bf16 %v1078_v8, %v1077_v7  ;;  %v1092_v7 = vld [vmem:[#allocation6 + $0xf8] sm:$0xff]  ;;  %v1167_v8 = vld [vmem:[#allocation6 + $0x350] sm:$0xff] }
  0xc2   :  { %8061 = vmatmul.mubr.msk.f32.gmra.mrb[46].mxu0 %vm163_vm0, %v135_v15 }
  0xc3   :  { %8063 = vmatprep.mubr.msk.f32.mxu0 %vm163_vm0, %v136_v19 }
  0xc6   :  { %8064 = vmatmul.mubr.msk.f32.gmra.mrb[48].mxu0 %vm163_vm0, %v137_v23  ;;  %v1082_v23 = vld [vmem:[#allocation6 + $0xa8] sm:$0xff] }
  0xc7   :  { %8066 = vmatprep.mubr.msk.f32.mxu0 %vm163_vm0, %v138_v27 }
  0xca   :  { %8067 = vmatmul.mubr.msk.f32.gmra.mrb[50].mxu0 %vm163_vm0, %v139_v31  ;;  %v10401_v31 = vpack.c.bf16 %v1082_v23, %v1081_v21  ;;  %v1170_v21 = vld [vmem:[#allocation6 + $0x368] sm:$0xff] }
  0xcb   :  { %8069 = vmatprep.mubr.msk.f32.mxu0 %vm163_vm0, %v140_v35  ;;  %v1084_v35 = vld [vmem:[#allocation6 + $0xb8] sm:$0xff] }
  0xce   :  { %8070 = vmatmul.mubr.msk.f32.gmra.mrb[52].mxu0 %vm163_vm0, %v141_v39  ;;  %v10404_v39 = vpack.c.bf16 %v1084_v35, %v1083_v33  ;;  %v1172_v33 = vld [vmem:[#allocation6 + $0x378] sm:$0xff] }
  0xcf   :  { %8072 = vmatprep.mubr.msk.f32.mxu0 %vm163_vm0, %v142_v40  ;;  %v10518_v40 = vpack.c.bf16 %v1160_v37, %v1159_v36  ;;  %v1097_v37 = vld [vmem:[#allocation6 + $0x120] sm:$0xff] }
  0xd2   :  { %8073 = vmatmul.mubr.msk.f32.gmra.mrb[54].mxu0 %vm163_vm0, %v143_v45  ;;  %v1162_v45 = vld [vmem:[#allocation6 + $0x328] sm:$0xff] }
  0xd3   :  { %8075 = vmatprep.mubr.msk.f32.mxu0 %vm163_vm0, %v144_v46  ;;  %v10521_v48 = vpack.c.bf16 %v1162_v45, %v1161_v44 }
  0xd6   :  { %8076 = vmatmul.mubr.msk.f32.gmra.mrb[56].mxu0 %vm163_vm0, %v145_v50  ;;  %v1088_v50 = vld [vmem:[#allocation6 + $0xd8] sm:$0xff] }
  0xd7   :  { %8078 = vmatprep.mubr.msk.f32.mxu0 %vm163_vm0, %v146_v51  ;;  %v1163_v51 = vld [vmem:[#allocation6 + $0x330] sm:$0xff] }
  0xda   :  { %8079 = vmatmul.mubr.msk.f32.gmra.mrb[58].mxu0 %vm163_vm0, %v147_v52  ;;  %v1164_v52 = vld [vmem:[#allocation6 + $0x338] sm:$0xff] }
  0xdb   :  { %8081 = vmatprep.mubr.msk.f32.mxu0 %vm163_vm0, %v148_v53 }
  0xde   :  { %8082 = vmatmul.mubr.msk.f32.gmra.mrb[60].mxu0 %vm163_vm0, %v149_v54  ;;  %v10410_v54 = vpack.c.bf16 %v1088_v50, %v1087_v49  ;;  %v1192_v49 = vld [vmem:[#allocation6 + $0x418] sm:$0xff] }
  0xdf   :  { %8084 = vmatprep.mubr.msk.f32.mxu0 %vm163_vm0, %v150_v55  ;;  %v10524_v55 = vpack.c.bf16 %v1164_v52, %v1163_v51  ;;  %v1101_v52 = vld [vmem:[#allocation6 + $0x140] sm:$0xff] }
  0xe2   :  { %8085 = vmatmul.mubr.msk.f32.gmra.mrb[62].mxu0 %vm163_vm0, %v151_v56  ;;  %v1089_v56 = vld [vmem:[#allocation6 + $0xe0] sm:$0xff] }
  0xe3   :  { %8259 = vmatprep.mubr.msk.f32.mxu0 %vm12200_vm1, %v13888_v43 }
 0x139   :  { %v7993_v58 = vpop.f32.mrb[0].mxu0 }
 0x13a   :  { %v422_v59 = vpop.f32.mrb[1].mxu0  ;;  %v12608_v30 = vadd.f32 %v7993_v58, %v12580_v57 }
 0x13b   :  { %v423_v60 = vadd.f32 %v12580_v57, %v422_v59  ;;  %v1090_v59 = vld [vmem:[#allocation6 + $0xe8] sm:$0xff] }
 0x13c   :  { %v806_v38 = vmul.f32 0.70710677, %v12608_v30 }
 0x13d   :  { %v805_v61 = vmul.f32 0.70710677, %v423_v60  ;;  %v12583_v62 = vpop.f32.mrb[2].mxu0  ;;  %v741_v11 = vmul.f32 0.5, %v423_v60  ;;  %v1165_v60 = vld [vmem:[#allocation6 + $0x340] sm:$0xff] }
 0x13e   :  { %v12585_v63 = vpop.f32.mrb[3].mxu0 }
 0x13f   :  { %11940 = verf.f32 %v805_v61  ;;  %v1166_v61 = vld [vmem:[#allocation6 + $0x348] sm:$0xff]  ;;  %v12638_v42 = vadd.f32 %v12580_v57, %v12585_v63 }
 0x141   :  { %v12587_v1 = vpop.f32.mrb[4].mxu0  ;;  %v807_v50 = vmul.f32 0.70710677, %v12638_v42 }
 0x142   :  { %v442_v2 = vpop.f32.mrb[5].mxu0 }
 0x143   :  { %v443_v3 = vadd.f32 %v12580_v57, %v442_v2 }
 0x145   :  { %v809_v4 = vmul.f32 0.70710677, %v443_v3  ;;  %v12590_v5 = vpop.f32.mrb[6].mxu0  ;;  %v745_v22 = vmul.f32 0.5, %v443_v3  ;;  %v10413_v3 = vpack.c.bf16 %v1090_v59, %v1089_v56 }
 0x146   :  { %v452_v6 = vpop.f32.mrb[7].mxu0 }
 0x147   :  { %11942 = verf.f32 %v809_v4  ;;  %v453_v46 = vadd.f32 %v12580_v57, %v452_v6  ;;  %v10527_v4 = vpack.c.bf16 %v1166_v61, %v1165_v60  ;;  %v1091_v6 = vld [vmem:[#allocation6 + $0xf0] sm:$0xff] }
 0x148   :  { %11944 = verf.f32 %v806_v38  ;;  %v1098_v38 = vld [vmem:[#allocation6 + $0x128] sm:$0xff]  ;;  %v1103_v61 = vld [vmem:[#allocation6 + $0x150] sm:$0xff] }
 0x149   :  { %v11941_v9 = vpop.eup %11940  ;;  %v12592_v10 = vpop.f32.mrb[8].mxu0  ;;  %v811_v53 = vmul.f32 0.70710677, %v453_v46  ;;  %v10425_v44 = vpack.c.bf16 %v1098_v38, %v1097_v37 }
 0x14a   :  { %v933_v12 = vadd.f32 1.0, %v11941_v9  ;;  %v12594_v13 = vpop.f32.mrb[9].mxu0  ;;  %v1168_v9 = vld [vmem:[#allocation6 + $0x358] sm:$0xff] }
 0x14b   :  { %11946 = verf.f32 %v811_v53  ;;  %v1102_v53 = vld [vmem:[#allocation6 + $0x148] sm:$0xff]  ;;  %v463_v56 = vadd.f32 %v12580_v57, %v12594_v13 }
 0x14c   :  { %v997_v15 = vmul.f32 %v933_v12, %v741_v11  ;;  %v10416_v12 = vpack.c.bf16 %v1092_v7, %v1091_v6  ;;  %11948 = verf.f32 %v807_v50  ;;  %v10431_v59 = vpack.c.bf16 %v1102_v53, %v1101_v52  ;;  %v1196_v6 = vld [vmem:[#allocation6 + $0x438] sm:$0xff]  ;;  %v1114_v50 = vld [vmem:[#allocation6 + $0x1a8] sm:$0xff] }
 0x14d   :  { %v12596_v18 = vpop.f32.mrb[10].mxu0  ;;  %v813_v7 = vmul.f32 0.70710677, %v463_v56  ;;  %v12670_v53 = vadd.f32 %v12583_v62, %v12580_v57 }
 0x14e   :  { %8120 = vmatmul.mubr.f32.vlgmr.msra.gmra.mrb[0].mxu1 %v997_v15  ;;  %v12598_v19 = vpop.f32.mrb[11].mxu0  ;;  %v1093_v15 = vld [vmem:[#allocation6 + $0x100] sm:$0xff] }
 0x14f   :  { %10396 = vmatpush3.bf16.msra.mxu1 %v10395_v14  ;;  %8154 = vmatprep.mubr.msk.f32.mxu1 %vm12200_vm1, %v13888_v43  ;;  %v10530_v14 = vpack.c.bf16 %v1168_v9, %v1167_v8  ;;  %v10419_v24 = vpack.c.bf16 %v1094_v17, %v1093_v15  ;;  %v1105_v9 = vld [vmem:[#allocation6 + $0x160] sm:$0xff]  ;;  %v1198_v15 = vld [vmem:[#allocation6 + $0x448] sm:$0xff]  ;;  %11950 = verf.f32 %v813_v7 }
 0x150   :  { %10397 = vmatprep.subr.bf16.mxu1 %v12199_v0  ;;  %v1118_v7 = vld [vmem:[#allocation6 + $0x1c8] sm:$0xff] }
 0x151   :  { %v11943_v26 = vpop.eup %11942  ;;  %v12603_v27 = vpop.f32.mrb[12].mxu0 }
 0x152   :  { %v937_v28 = vadd.f32 1.0, %v11943_v26  ;;  %v12605_v29 = vpop.f32.mrb[13].mxu0  ;;  %v11945_v11 = vpop.eup %11944  ;;  %v1095_v26 = vld [vmem:[#allocation6 + $0x110] sm:$0xff] }
 0x153   :  { %10399 = vmatpush3.bf16.msra.mxu1 %v10398_v20  ;;  %v934_v16 = vadd.f32 1.0, %v11945_v11  ;;  %v1169_v20 = vld [vmem:[#allocation6 + $0x360] sm:$0xff] }
 0x154   :  { %v1001_v34 = vmul.f32 %v937_v28, %v745_v22  ;;  %10400 = vmatprep.subr.bf16.mxu1 %v12199_v0  ;;  %v742_v22 = vmul.f32 0.5, %v12608_v30  ;;  %v10533_v25 = vpack.c.bf16 %v1170_v21, %v1169_v20  ;;  %v1107_v21 = vld [vmem:[#allocation6 + $0x170] sm:$0xff] }
 0x155   :  { %v12619_v58 = vpop.f32.mrb[14].mxu0  ;;  %v11947_v23 = vpop.eup %11946 }
 0x156   :  { %8260 = vmatmul.mubr.f32.vlgmr.msra.gmra.mrb[64].mxu0 %v1001_v34  ;;  %v12623_v2 = vpop.f32.mrb[15].mxu0  ;;  %v998_v28 = vmul.f32 %v934_v16, %v742_v22  ;;  %v747_v34 = vmul.f32 0.5, %v453_v46  ;;  %v939_v35 = vadd.f32 1.0, %v11947_v23  ;;  %v1099_v46 = vld [vmem:[#allocation6 + $0x130] sm:$0xff]  ;;  %v1108_v22 = vld [vmem:[#allocation6 + $0x178] sm:$0xff] }
 0x157   :  { %10402 = vmatpush3.bf16.msra.mxu1 %v10401_v31  ;;  %10516 = vmatpush3.bf16.msra.mxu0 %v10515_v32  ;;  %v1096_v31 = vld [vmem:[#allocation6 + $0x118] sm:$0xff]  ;;  %v1171_v32 = vld [vmem:[#allocation6 + $0x370] sm:$0xff] }
 0x158   :  { %10403 = vmatprep.subr.bf16.mxu1 %v12199_v0  ;;  %10517 = vmatprep.subr.bf16.mxu0 %v12199_v0  ;;  %v10422_v30 = vpack.c.bf16 %v1096_v31, %v1095_v26  ;;  %v10536_v36 = vpack.c.bf16 %v1172_v33, %v1171_v32  ;;  %v1003_v41 = vmul.f32 %v939_v35, %v747_v34  ;;  %v1199_v23 = vld [vmem:[#allocation6 + $0x450] sm:$0xff]  ;;  %v1109_v31 = vld [vmem:[#allocation6 + $0x180] sm:$0xff]  ;;  %v743_v32 = vmul.f32 0.5, %v12638_v42  ;;  %v1110_v34 = vld [vmem:[#allocation6 + $0x188] sm:$0xff] }
 0x159   :  { %8329 = vmatprep.mubr.msk.f32.mxu0 %vm12200_vm1, %v13888_v43  ;;  %v12651_v11 = vpop.f32.mrb[16].mxu0  ;;  %v10440_v26 = vpack.c.bf16 %v1108_v22, %v1107_v21  ;;  %v1201_v35 = vld [vmem:[#allocation6 + $0x460] sm:$0xff]  ;;  %v10443_v37 = vpack.c.bf16 %v1110_v34, %v1109_v31  ;;  %v1203_v42 = vld [vmem:[#allocation6 + $0x470] sm:$0xff]  ;;  %v1228_v21 = vld [vmem:[#allocation6 + $0x538] sm:$0xff] }
 0x15a   :  { %v12655_v16 = vpop.f32.mrb[17].mxu0  ;;  %v1230_v31 = vld [vmem:[#allocation6 + $0x548] sm:$0xff] }
 0x15b   :  { %10405 = vmatpush3.bf16.msra.mxu1 %v10404_v39  ;;  %10519 = vmatpush3.bf16.msra.mxu0 %v10518_v40  ;;  %v1189_v39 = vld [vmem:[#allocation6 + $0x400] sm:$0xff]  ;;  %v1190_v40 = vld [vmem:[#allocation6 + $0x408] sm:$0xff] }
 0x15c   :  { %10406 = vmatprep.subr.bf16.mxu1 %v12199_v0  ;;  %10520 = vmatprep.subr.bf16.mxu0 %v12199_v0  ;;  %v10563_v45 = vpack.c.bf16 %v1190_v40, %v1189_v39  ;;  %v1111_v39 = vld [vmem:[#allocation6 + $0x190] sm:$0xff] }
 0x15f   :  { %10408 = vmatpush3.bf16.msra.mxu1 %v10407_v47  ;;  %10522 = vmatpush3.bf16.msra.mxu0 %v10521_v48  ;;  %v1100_v47 = vld [vmem:[#allocation6 + $0x138] sm:$0xff]  ;;  %v1191_v48 = vld [vmem:[#allocation6 + $0x410] sm:$0xff] }
 0x160   :  { %10409 = vmatprep.subr.bf16.mxu1 %v12199_v0  ;;  %10523 = vmatprep.subr.bf16.mxu0 %v12199_v0  ;;  %v10428_v51 = vpack.c.bf16 %v1100_v47, %v1099_v46  ;;  %v10566_v63 = vpack.c.bf16 %v1192_v49, %v1191_v48  ;;  %v1113_v49 = vld [vmem:[#allocation6 + $0x1a0] sm:$0xff] }
 0x163   :  { %10411 = vmatpush3.bf16.msra.mxu1 %v10410_v54  ;;  %10525 = vmatpush3.bf16.msra.mxu0 %v10524_v55  ;;  %v1193_v54 = vld [vmem:[#allocation6 + $0x420] sm:$0xff]  ;;  %v1194_v55 = vld [vmem:[#allocation6 + $0x428] sm:$0xff] }
 0x164   :  { %10412 = vmatprep.subr.bf16.mxu1 %v12199_v0  ;;  %10526 = vmatprep.subr.bf16.mxu0 %v12199_v0  ;;  %v10569_v60 = vpack.c.bf16 %v1194_v55, %v1193_v54  ;;  %v10449_v54 = vpack.c.bf16 %v1114_v50, %v1113_v49 }
 0x167   :  { %10414 = vmatpush3.bf16.msra.mxu1 %v10413_v3  ;;  %10528 = vmatpush3.bf16.msra.mxu0 %v10527_v4  ;;  %v1104_v3 = vld [vmem:[#allocation6 + $0x158] sm:$0xff]  ;;  %v1195_v4 = vld [vmem:[#allocation6 + $0x430] sm:$0xff] }
 0x168   :  { %10415 = vmatprep.subr.bf16.mxu1 %v12199_v0  ;;  %10529 = vmatprep.subr.bf16.mxu0 %v12199_v0  ;;  %v10434_v13 = vpack.c.bf16 %v1104_v3, %v1103_v61  ;;  %v10572_v8 = vpack.c.bf16 %v1196_v6, %v1195_v4  ;;  %v1224_v61 = vld [vmem:[#allocation6 + $0x518] sm:$0xff]  ;;  %v808_v3 = vmul.f32 0.70710677, %v12670_v53  ;;  %v1117_v6 = vld [vmem:[#allocation6 + $0x1c0] sm:$0xff] }
 0x16a   :  { %11952 = verf.f32 %v808_v3  ;;  %v1146_v3 = vld [vmem:[#allocation6 + $0x2a8] sm:$0xff] }
 0x16b   :  { %10417 = vmatpush3.bf16.msra.mxu1 %v10416_v12  ;;  %10531 = vmatpush3.bf16.msra.mxu0 %v10530_v14  ;;  %v1106_v12 = vld [vmem:[#allocation6 + $0x168] sm:$0xff]  ;;  %v1197_v14 = vld [vmem:[#allocation6 + $0x440] sm:$0xff] }
 0x16c   :  { %10418 = vmatprep.subr.bf16.mxu1 %v12199_v0  ;;  %10532 = vmatprep.subr.bf16.mxu0 %v12199_v0  ;;  %v10437_v17 = vpack.c.bf16 %v1106_v12, %v1105_v9  ;;  %v10575_v20 = vpack.c.bf16 %v1198_v15, %v1197_v14  ;;  %v473_v9 = vadd.f32 %v12580_v57, %v12598_v19  ;;  %v1119_v15 = vld [vmem:[#allocation6 + $0x1d0] sm:$0xff] }
 0x16d   :  { %v10455_v12 = vpack.c.bf16 %v1118_v7, %v1117_v6  ;;  %v12702_v7 = vadd.f32 %v12587_v1, %v12580_v57 }
 0x16e   :  { %8155 = vmatmul.mubr.f32.vlgmr.msra.gmra.mrb[2].mxu1 %v998_v28  ;;  %v815_v22 = vmul.f32 0.70710677, %v473_v9 }
 0x16f   :  { %10420 = vmatpush3.bf16.msra.mxu1 %v10419_v24  ;;  %10534 = vmatpush3.bf16.msra.mxu0 %v10533_v25  ;;  %v1200_v24 = vld [vmem:[#allocation6 + $0x458] sm:$0xff]  ;;  %v11949_v25 = vpop.eup %11948 }
 0x170   :  { %10421 = vmatprep.subr.bf16.mxu1 %v12199_v0  ;;  %10535 = vmatprep.subr.bf16.mxu0 %v12199_v0  ;;  %v10578_v28 = vpack.c.bf16 %v1200_v24, %v1199_v23  ;;  %v935_v33 = vadd.f32 1.0, %v11949_v25  ;;  %v1121_v24 = vld [vmem:[#allocation6 + $0x1e0] sm:$0xff]  ;;  %v12683_v25 = vpop.f32.mrb[18].mxu0  ;;  %11954 = verf.f32 %v815_v22 }
 0x171   :  { %8189 = vmatprep.mubr.msk.f32.mxu1 %vm12200_vm1, %v13888_v43 }
 0x172   :  { %v999_v40 = vmul.f32 %v935_v33, %v743_v32  ;;  %v12687_v32 = vpop.f32.mrb[19].mxu0 }
 0x173   :  { %10423 = vmatpush3.bf16.msra.mxu1 %v10422_v30  ;;  %10537 = vmatpush3.bf16.msra.mxu0 %v10536_v36  ;;  %v1202_v30 = vld [vmem:[#allocation6 + $0x468] sm:$0xff]  ;;  %v11951_v36 = vpop.eup %11950  ;;  %v12707_v22 = vpop.f32.mrb[20].mxu0 }
 0x174   :  { %10424 = vmatprep.subr.bf16.mxu1 %v12199_v0  ;;  %10562 = vmatprep.subr.bf16.mxu0 %v12199_v0  ;;  %v10581_v38 = vpack.c.bf16 %v1202_v30, %v1201_v35  ;;  %v941_v46 = vadd.f32 1.0, %v11951_v36  ;;  %v1123_v35 = vld [vmem:[#allocation6 + $0x1f0] sm:$0xff]  ;;  %v1124_v30 = vld [vmem:[#allocation6 + $0x1f8] sm:$0xff] }
 0x175   :  { %v1231_v36 = vld [vmem:[#allocation6 + $0x550] sm:$0xff] }
 0x176   :  { %8330 = vmatmul.mubr.f32.vlgmr.msra.gmra.mrb[66].mxu0 %v1003_v41  ;;  %v1112_v41 = vld [vmem:[#allocation6 + $0x198] sm:$0xff] }
 0x177   :  { %10426 = vmatpush3.bf16.msra.mxu1 %v10425_v44  ;;  %10564 = vmatpush3.bf16.msra.mxu0 %v10563_v45  ;;  %v1204_v44 = vld [vmem:[#allocation6 + $0x478] sm:$0xff]  ;;  %v749_v45 = vmul.f32 0.5, %v463_v56  ;;  %v10446_v47 = vpack.c.bf16 %v1112_v41, %v1111_v39  ;;  %v1115_v56 = vld [vmem:[#allocation6 + $0x1b0] sm:$0xff]  ;;  %v10464_v39 = vpack.c.bf16 %v1124_v30, %v1123_v35  ;;  %v1141_v41 = vld [vmem:[#allocation6 + $0x280] sm:$0xff] }
 0x178   :  { %10427 = vmatprep.subr.bf16.mxu1 %v12199_v0  ;;  %10565 = vmatprep.subr.bf16.mxu0 %v12199_v0  ;;  %v10584_v48 = vpack.c.bf16 %v1204_v44, %v1203_v42  ;;  %v744_v42 = vmul.f32 0.5, %v12670_v53  ;;  %v1235_v53 = vld [vmem:[#allocation6 + $0x570] sm:$0xff]  ;;  %v1152_v30 = vld [vmem:[#allocation6 + $0x2d8] sm:$0xff] }
 0x179   :  { %8399 = vmatprep.mubr.msk.f32.mxu0 %vm12200_vm1, %v13888_v43  ;;  %v1005_v52 = vmul.f32 %v941_v46, %v749_v45  ;;  %v1142_v45 = vld [vmem:[#allocation6 + $0x288] sm:$0xff]  ;;  %v1233_v46 = vld [vmem:[#allocation6 + $0x560] sm:$0xff] }
 0x17a   :  { %v10491_v49 = vpack.c.bf16 %v1142_v45, %v1141_v41  ;;  %v1153_v41 = vld [vmem:[#allocation6 + $0x2e0] sm:$0xff]  ;;  %v1262_v45 = vld [vmem:[#allocation6 + $0x648] sm:$0xff] }
 0x17b   :  { %10429 = vmatpush3.bf16.msra.mxu1 %v10428_v51  ;;  %10567 = vmatpush3.bf16.msra.mxu0 %v10566_v63  ;;  %v1221_v51 = vld [vmem:[#allocation6 + $0x500] sm:$0xff]  ;;  %v1222_v63 = vld [vmem:[#allocation6 + $0x508] sm:$0xff] }
 0x17c   :  { %10430 = vmatprep.subr.bf16.mxu1 %v12199_v0  ;;  %10568 = vmatprep.subr.bf16.mxu0 %v12199_v0  ;;  %v10611_v55 = vpack.c.bf16 %v1222_v63, %v1221_v51  ;;  %v1143_v51 = vld [vmem:[#allocation6 + $0x290] sm:$0xff] }
 0x17f   :  { %10432 = vmatpush3.bf16.msra.mxu1 %v10431_v59  ;;  %10570 = vmatpush3.bf16.msra.mxu0 %v10569_v60  ;;  %v1116_v59 = vld [vmem:[#allocation6 + $0x1b8] sm:$0xff]  ;;  %v1223_v60 = vld [vmem:[#allocation6 + $0x510] sm:$0xff] }
 0x180   :  { %10433 = vmatprep.subr.bf16.mxu1 %v12199_v0  ;;  %10571 = vmatprep.subr.bf16.mxu0 %v12199_v0  ;;  %v10452_v4 = vpack.c.bf16 %v1116_v59, %v1115_v56  ;;  %v10614_v62 = vpack.c.bf16 %v1224_v61, %v1223_v60  ;;  %v1145_v61 = vld [vmem:[#allocation6 + $0x2a0] sm:$0xff] }
 0x183   :  { %10435 = vmatpush3.bf16.msra.mxu1 %v10434_v13  ;;  %10573 = vmatpush3.bf16.msra.mxu0 %v10572_v8  ;;  %v1225_v13 = vld [vmem:[#allocation6 + $0x520] sm:$0xff]  ;;  %v1226_v8 = vld [vmem:[#allocation6 + $0x528] sm:$0xff] }
 0x184   :  { %10436 = vmatprep.subr.bf16.mxu1 %v12199_v0  ;;  %10574 = vmatprep.subr.bf16.mxu0 %v12199_v0  ;;  %v10617_v14 = vpack.c.bf16 %v1226_v8, %v1225_v13  ;;  %v10497_v13 = vpack.c.bf16 %v1146_v3, %v1145_v61  ;;  %v746_v3 = vmul.f32 0.5, %v12702_v7 }
 0x187   :  { %10438 = vmatpush3.bf16.msra.mxu1 %v10437_v17  ;;  %10576 = vmatpush3.bf16.msra.mxu0 %v10575_v20  ;;  %v1120_v17 = vld [vmem:[#allocation6 + $0x1d8] sm:$0xff]  ;;  %v1227_v20 = vld [vmem:[#allocation6 + $0x530] sm:$0xff] }
 0x188   :  { %10439 = vmatprep.subr.bf16.mxu1 %v12199_v0  ;;  %10577 = vmatprep.subr.bf16.mxu0 %v12199_v0  ;;  %v10458_v19 = vpack.c.bf16 %v1120_v17, %v1119_v15  ;;  %v10620_v23 = vpack.c.bf16 %v1228_v21, %v1227_v20  ;;  %v1256_v15 = vld [vmem:[#allocation6 + $0x618] sm:$0xff]  ;;  %v810_v17 = vmul.f32 0.70710677, %v12702_v7  ;;  %v1149_v21 = vld [vmem:[#allocation6 + $0x2c0] sm:$0xff] }
 0x189   :  { %v1176_v7 = vld [vmem:[#allocation6 + $0x398] sm:$0xff] }
 0x18a   :  { %11956 = verf.f32 %v810_v17 }
 0x18b   :  { %10441 = vmatpush3.bf16.msra.mxu1 %v10440_v26  ;;  %10579 = vmatpush3.bf16.msra.mxu0 %v10578_v28  ;;  %v1122_v26 = vld [vmem:[#allocation6 + $0x1e8] sm:$0xff]  ;;  %v1229_v28 = vld [vmem:[#allocation6 + $0x540] sm:$0xff] }
 0x18c   :  { %10442 = vmatprep.subr.bf16.mxu1 %v12199_v0  ;;  %10580 = vmatprep.subr.bf16.mxu0 %v12199_v0  ;;  %v10461_v33 = vpack.c.bf16 %v1122_v26, %v1121_v24  ;;  %v10623_v34 = vpack.c.bf16 %v1230_v31, %v1229_v28  ;;  %v1258_v24 = vld [vmem:[#allocation6 + $0x628] sm:$0xff]  ;;  %v12711_v26 = vpop.f32.mrb[21].mxu0  ;;  %v12715_v28 = vadd.f32 %v12580_v57, %v12605_v29 }
 0x18d   :  { %v12719_v35 = vpop.f32.mrb[22].mxu0 }
 0x18e   :  { %8190 = vmatmul.mubr.f32.vlgmr.msra.gmra.mrb[4].mxu1 %v999_v40  ;;  %v12723_v29 = vpop.f32.mrb[23].mxu0 }
 0x18f   :  { %10444 = vmatpush3.bf16.msra.mxu1 %v10443_v37  ;;  %10582 = vmatpush3.bf16.msra.mxu0 %v10581_v38  ;;  %v1232_v37 = vld [vmem:[#allocation6 + $0x558] sm:$0xff]  ;;  %v11953_v38 = vpop.eup %11952 }
 0x190   :  { %10445 = vmatprep.subr.bf16.mxu1 %v12199_v0  ;;  %10583 = vmatprep.subr.bf16.mxu0 %v12199_v0  ;;  %v10626_v40 = vpack.c.bf16 %v1232_v37, %v1231_v36  ;;  %v936_v44 = vadd.f32 1.0, %v11953_v38  ;;  %v1259_v36 = vld [vmem:[#allocation6 + $0x630] sm:$0xff]  ;;  %v1260_v37 = vld [vmem:[#allocation6 + $0x638] sm:$0xff]  ;;  %v817_v38 = vmul.f32 0.70710677, %v12715_v28 }
 0x191   :  { %8224 = vmatprep.mubr.msk.f32.mxu1 %vm12200_vm1, %v13888_v43 }
 0x192   :  { %v1000_v63 = vmul.f32 %v936_v44, %v744_v42  ;;  %v1154_v42 = vld [vmem:[#allocation6 + $0x2e8] sm:$0xff]  ;;  %v1261_v44 = vld [vmem:[#allocation6 + $0x640] sm:$0xff]  ;;  %11958 = verf.f32 %v817_v38 }
 0x193   :  { %10447 = vmatpush3.bf16.msra.mxu1 %v10446_v47  ;;  %10585 = vmatpush3.bf16.msra.mxu0 %v10584_v48  ;;  %v1234_v47 = vld [vmem:[#allocation6 + $0x568] sm:$0xff]  ;;  %v11955_v48 = vpop.eup %11954 }
 0x194   :  { %10448 = vmatprep.subr.bf16.mxu1 %v12199_v0  ;;  %10610 = vmatprep.subr.bf16.mxu0 %v12199_v0  ;;  %v10629_v50 = vpack.c.bf16 %v1234_v47, %v1233_v46  ;;  %v943_v56 = vadd.f32 1.0, %v11955_v48  ;;  %v12728_v46 = vpop.f32.mrb[24].mxu0  ;;  %v10509_v47 = vpack.c.bf16 %v1154_v42, %v1153_v41  ;;  %v10671_v48 = vpack.c.bf16 %v1262_v45, %v1261_v44  ;;  %v1286_v38 = vld [vmem:[#allocation6 + $0x708] sm:$0xff]  ;;  %v1179_v44 = vld [vmem:[#allocation6 + $0x3b0] sm:$0xff] }
 0x196   :  { %8400 = vmatmul.mubr.f32.vlgmr.msra.gmra.mrb[68].mxu0 %v1005_v52  ;;  %v1144_v52 = vld [vmem:[#allocation6 + $0x298] sm:$0xff] }
 0x197   :  { %10450 = vmatpush3.bf16.msra.mxu1 %v10449_v54  ;;  %10612 = vmatpush3.bf16.msra.mxu0 %v10611_v55  ;;  %v1236_v54 = vld [vmem:[#allocation6 + $0x578] sm:$0xff]  ;;  %v751_v55 = vmul.f32 0.5, %v473_v9  ;;  %v10494_v59 = vpack.c.bf16 %v1144_v52, %v1143_v51  ;;  %v1147_v9 = vld [vmem:[#allocation6 + $0x2b0] sm:$0xff] }
 0x198   :  { %10451 = vmatprep.subr.bf16.mxu1 %v12199_v0  ;;  %10613 = vmatprep.subr.bf16.mxu0 %v12199_v0  ;;  %v10632_v60 = vpack.c.bf16 %v1236_v54, %v1235_v53  ;;  %v1156_v51 = vld [vmem:[#allocation6 + $0x2f8] sm:$0xff]  ;;  %v11957_v54 = vpop.eup %11956 }
 0x199   :  { %8469 = vmatprep.mubr.msk.f32.mxu0 %vm12200_vm1, %v13888_v43  ;;  %v1007_v6 = vmul.f32 %v943_v56, %v751_v55  ;;  %v1264_v52 = vld [vmem:[#allocation6 + $0x658] sm:$0xff] }
 0x19b   :  { %10453 = vmatpush3.bf16.msra.mxu1 %v10452_v4  ;;  %10615 = vmatpush3.bf16.msra.mxu0 %v10614_v62  ;;  %v1253_v4 = vld [vmem:[#allocation6 + $0x600] sm:$0xff]  ;;  %v1254_v62 = vld [vmem:[#allocation6 + $0x608] sm:$0xff] }
 0x19c   :  { %10454 = vmatprep.subr.bf16.mxu1 %v12199_v0  ;;  %10616 = vmatprep.subr.bf16.mxu0 %v12199_v0  ;;  %v10659_v8 = vpack.c.bf16 %v1254_v62, %v1253_v4  ;;  %v938_v4 = vadd.f32 1.0, %v11957_v54  ;;  %v1174_v62 = vld [vmem:[#allocation6 + $0x388] sm:$0xff]  ;;  %v1181_v54 = vld [vmem:[#allocation6 + $0x3c0] sm:$0xff] }
 0x19f   :  { %10456 = vmatpush3.bf16.msra.mxu1 %v10455_v12  ;;  %10618 = vmatpush3.bf16.msra.mxu0 %v10617_v14  ;;  %v1148_v12 = vld [vmem:[#allocation6 + $0x2b8] sm:$0xff]  ;;  %v1255_v14 = vld [vmem:[#allocation6 + $0x610] sm:$0xff] }
 0x1a0   :  { %10457 = vmatprep.subr.bf16.mxu1 %v12199_v0  ;;  %10619 = vmatprep.subr.bf16.mxu0 %v12199_v0  ;;  %v10500_v20 = vpack.c.bf16 %v1148_v12, %v1147_v9  ;;  %v10662_v1 = vpack.c.bf16 %v1256_v15, %v1255_v14  ;;  %v11959_v9 = vpop.eup %11958  ;;  %v1175_v15 = vld [vmem:[#allocation6 + $0x390] sm:$0xff] }
 0x1a3   :  { %10459 = vmatpush3.bf16.msra.mxu1 %v10458_v19  ;;  %10621 = vmatpush3.bf16.msra.mxu0 %v10620_v23  ;;  %v1150_v19 = vld [vmem:[#allocation6 + $0x2c8] sm:$0xff]  ;;  %v1257_v23 = vld [vmem:[#allocation6 + $0x620] sm:$0xff] }
 0x1a4   :  { %10460 = vmatprep.subr.bf16.mxu1 %v12199_v0  ;;  %10622 = vmatprep.subr.bf16.mxu0 %v12199_v0  ;;  %v10503_v31 = vpack.c.bf16 %v1150_v19, %v1149_v21  ;;  %v1268_v21 = vld [vmem:[#allocation6 + $0x678] sm:$0xff]  ;;  %v753_v19 = vmul.f32 0.5, %v12715_v28 }
 0x1a7   :  { %10462 = vmatpush3.bf16.msra.mxu1 %v10461_v33  ;;  %10624 = vmatpush3.bf16.msra.mxu0 %v10623_v34  ;;  %v10665_v33 = vpack.c.bf16 %v1258_v24, %v1257_v23  ;;  %v1151_v34 = vld [vmem:[#allocation6 + $0x2d0] sm:$0xff]  ;;  %v945_v23 = vadd.f32 1.0, %v11959_v9 }
 0x1a8   :  { %10463 = vmatprep.subr.bf16.mxu1 %v12199_v0  ;;  %10625 = vmatprep.subr.bf16.mxu0 %v12199_v0  ;;  %v1183_v9 = vld [vmem:[#allocation6 + $0x3d0] sm:$0xff] }
 0x1a9   :  { %v1009_v28 = vmul.f32 %v945_v23, %v753_v19  ;;  %v1186_v19 = vld [vmem:[#allocation6 + $0x3e8] sm:$0xff]  ;;  %v1293_v23 = vld [vmem:[#allocation6 + $0x740] sm:$0xff] }
 0x1ab   :  { %10465 = vmatpush3.bf16.msra.mxu1 %v10464_v39  ;;  %10627 = vmatpush3.bf16.msra.mxu0 %v10626_v40  ;;  %v10506_v39 = vpack.c.bf16 %v1152_v30, %v1151_v34  ;;  %v10668_v40 = vpack.c.bf16 %v1260_v37, %v1259_v36  ;;  %v1177_v34 = vld [vmem:[#allocation6 + $0x3a0] sm:$0xff]  ;;  %v1178_v36 = vld [vmem:[#allocation6 + $0x3a8] sm:$0xff] }
 0x1ac   :  { %10490 = vmatprep.subr.bf16.mxu1 %v12199_v0  ;;  %10628 = vmatprep.subr.bf16.mxu0 %v12199_v0  ;;  %v1285_v37 = vld [vmem:[#allocation6 + $0x700] sm:$0xff]  ;;  %v10545_v41 = vpack.c.bf16 %v1178_v36, %v1177_v34 }
 0x1ad   :  { %v10707_v42 = vpack.c.bf16 %v1286_v38, %v1285_v37  ;;  %v1187_v37 = vld [vmem:[#allocation6 + $0x3f0] sm:$0xff] }
 0x1ae   :  { %8225 = vmatmul.mubr.f32.vlgmr.msra.gmra.mrb[6].mxu1 %v1000_v63  ;;  %v1263_v63 = vld [vmem:[#allocation6 + $0x650] sm:$0xff] }
 0x1af   :  { %10492 = vmatpush3.bf16.msra.mxu1 %v10491_v49  ;;  %10630 = vmatpush3.bf16.msra.mxu0 %v10629_v50  ;;  %v1155_v49 = vld [vmem:[#allocation6 + $0x2f0] sm:$0xff]  ;;  %v12730_v50 = vpop.f32.mrb[25].mxu0 }
 0x1b0   :  { %10493 = vmatprep.subr.bf16.mxu1 %v12199_v0  ;;  %10631 = vmatprep.subr.bf16.mxu0 %v12199_v0  ;;  %v12734_v53 = vpop.f32.mrb[26].mxu0  ;;  %v10512_v56 = vpack.c.bf16 %v1156_v51, %v1155_v49  ;;  %v1288_v49 = vld [vmem:[#allocation6 + $0x718] sm:$0xff] }
 0x1b1   :  { %8294 = vmatprep.mubr.msk.f32.mxu1 %vm12200_vm1, %v13888_v43  ;;  %v12736_v55 = vpop.f32.mrb[27].mxu0 }
 0x1b2   :  { %v12738_v61 = vpop.f32.mrb[28].mxu0 }
 0x1b3   :  { %10495 = vmatpush3.bf16.msra.mxu1 %v10494_v59  ;;  %10633 = vmatpush3.bf16.msra.mxu0 %v10632_v60  ;;  %v10674_v59 = vpack.c.bf16 %v1264_v52, %v1263_v63  ;;  %v1173_v60 = vld [vmem:[#allocation6 + $0x380] sm:$0xff] }
 0x1b4   :  { %10496 = vmatprep.subr.bf16.mxu1 %v12199_v0  ;;  %10658 = vmatprep.subr.bf16.mxu0 %v12199_v0  ;;  %v10539_v12 = vpack.c.bf16 %v1174_v62, %v1173_v60  ;;  %v1289_v60 = vld [vmem:[#allocation6 + $0x720] sm:$0xff]  ;;  %v12779_v62 = vadd.f32 %v12580_v57, %v12623_v2 }
 0x1b6   :  { %8470 = vmatmul.mubr.f32.vlgmr.msra.gmra.mrb[70].mxu0 %v1007_v6  ;;  %v1265_v6 = vld [vmem:[#allocation6 + $0x660] sm:$0xff]  ;;  %v819_v2 = vmul.f32 0.70710677, %v12779_v62 }
 0x1b7   :  { %10498 = vmatpush3.bf16.msra.mxu1 %v10497_v13  ;;  %10660 = vmatpush3.bf16.msra.mxu0 %v10659_v8  ;;  %v1266_v13 = vld [vmem:[#allocation6 + $0x668] sm:$0xff]  ;;  %v12743_v8 = vpop.f32.mrb[29].mxu0 }
 0x1b8   :  { %10499 = vmatprep.subr.bf16.mxu1 %v12199_v0  ;;  %10661 = vmatprep.subr.bf16.mxu0 %v12199_v0  ;;  %v10677_v14 = vpack.c.bf16 %v1266_v13, %v1265_v6  ;;  %v12745_v17 = vpop.f32.mrb[30].mxu0 }
 0x1b9   :  { %8539 = vmatprep.mubr.msk.f32.mxu0 %vm12200_vm1, %v13888_v43  ;;  %v12750_v24 = vpop.f32.mrb[31].mxu0 }
 0x1ba   :  { %v12752_v30 = vpop.f32.mrb[32].mxu0 }
 0x1bb   :  { %10501 = vmatpush3.bf16.msra.mxu1 %v10500_v20  ;;  %10663 = vmatpush3.bf16.msra.mxu0 %v10662_v1  ;;  %v1002_v20 = vmul.f32 %v938_v4, %v746_v3  ;;  %v1267_v1 = vld [vmem:[#allocation6 + $0x670] sm:$0xff]  ;;  %v1290_v3 = vld [vmem:[#allocation6 + $0x728] sm:$0xff] }
 0x1bc   :  { %10502 = vmatprep.subr.bf16.mxu1 %v12199_v0  ;;  %10664 = vmatprep.subr.bf16.mxu0 %v12199_v0  ;;  %v10713_v13 = vpack.c.bf16 %v1290_v3, %v1289_v60  ;;  %v1206_v60 = vld [vmem:[#allocation6 + $0x488] sm:$0xff]  ;;  %v1297_v3 = vld [vmem:[#allocation6 + $0x760] sm:$0xff] }
 0x1bf   :  { %10504 = vmatpush3.bf16.msra.mxu1 %v10503_v31  ;;  %10666 = vmatpush3.bf16.msra.mxu0 %v10665_v33  ;;  %v10542_v31 = vpack.c.bf16 %v1176_v7, %v1175_v15  ;;  %v10680_v33 = vpack.c.bf16 %v1268_v21, %v1267_v1  ;;  %v1291_v15 = vld [vmem:[#allocation6 + $0x730] sm:$0xff]  ;;  %v1185_v21 = vld [vmem:[#allocation6 + $0x3e0] sm:$0xff] }
 0x1c0   :  { %10505 = vmatprep.subr.bf16.mxu1 %v12199_v0  ;;  %10667 = vmatprep.subr.bf16.mxu0 %v12199_v0  ;;  %v10557_v34 = vpack.c.bf16 %v1186_v19, %v1185_v21  ;;  %v1300_v21 = vld [vmem:[#allocation6 + $0x778] sm:$0xff]  ;;  %v755_v19 = vmul.f32 0.5, %v12779_v62 }
 0x1c3   :  { %10507 = vmatpush3.bf16.msra.mxu1 %v10506_v39  ;;  %10669 = vmatpush3.bf16.msra.mxu0 %v10668_v40  ;;  %v12756_v39 = vpop.f32.mrb[33].mxu0  ;;  %v12762_v40 = vadd.f32 %v12590_v5, %v12580_v57 }
 0x1c4   :  { %10508 = vmatprep.subr.bf16.mxu1 %v12199_v0  ;;  %10670 = vmatprep.subr.bf16.mxu0 %v12199_v0  ;;  %v12764_v45 = vpop.f32.mrb[34].mxu0 }
 0x1c5   :  { %v12768_v51 = vpop.f32.mrb[35].mxu0  ;;  %v812_v5 = vmul.f32 0.70710677, %v12762_v40 }
 0x1c7   :  { %10510 = vmatpush3.bf16.msra.mxu1 %v10509_v47  ;;  %10672 = vmatpush3.bf16.msra.mxu0 %v10671_v48  ;;  %v1180_v47 = vld [vmem:[#allocation6 + $0x3b8] sm:$0xff]  ;;  %v1287_v48 = vld [vmem:[#allocation6 + $0x710] sm:$0xff]  ;;  %11960 = verf.f32 %v812_v5 }
 0x1c8   :  { %10511 = vmatprep.subr.bf16.mxu1 %v12199_v0  ;;  %10673 = vmatprep.subr.bf16.mxu0 %v12199_v0  ;;  %v10548_v63 = vpack.c.bf16 %v1180_v47, %v1179_v44  ;;  %v10710_v52 = vpack.c.bf16 %v1288_v49, %v1287_v48  ;;  %11962 = verf.f32 %v819_v2 }
 0x1cb   :  { %10513 = vmatpush3.bf16.msra.mxu1 %v10512_v56  ;;  %10675 = vmatpush3.bf16.msra.mxu0 %v10674_v59  ;;  %v12771_v56 = vpop.f32.mrb[36].mxu0  ;;  %v1182_v59 = vld [vmem:[#allocation6 + $0x3c8] sm:$0xff] }
 0x1cc   :  { %10538 = vmatprep.subr.bf16.mxu1 %v12199_v0  ;;  %10676 = vmatprep.subr.bf16.mxu0 %v12199_v0  ;;  %v12775_v4 = vpop.f32.mrb[37].mxu0  ;;  %v10551_v6 = vpack.c.bf16 %v1182_v59, %v1181_v54  ;;  %v748_v54 = vmul.f32 0.5, %v12762_v40  ;;  %v1208_v40 = vld [vmem:[#allocation6 + $0x498] sm:$0xff] }
 0x1ce   :  { %8295 = vmatmul.mubr.f32.vlgmr.msra.gmra.mrb[8].mxu1 %v1002_v20  ;;  %v1292_v20 = vld [vmem:[#allocation6 + $0x738] sm:$0xff] }
 0x1cf   :  { %10540 = vmatpush3.bf16.msra.mxu1 %v10539_v12  ;;  %10678 = vmatpush3.bf16.msra.mxu0 %v10677_v14  ;;  %v12783_v12 = vpop.f32.mrb[38].mxu0  ;;  %v1184_v14 = vld [vmem:[#allocation6 + $0x3d8] sm:$0xff]  ;;  %v10716_v1 = vpack.c.bf16 %v1292_v20, %v1291_v15  ;;  %v1207_v20 = vld [vmem:[#allocation6 + $0x490] sm:$0xff] }
 0x1d0   :  { %10541 = vmatprep.subr.bf16.mxu1 %v12199_v0  ;;  %10679 = vmatprep.subr.bf16.mxu0 %v12199_v0  ;;  %v12787_v57 = vpop.f32.mrb[39].mxu0  ;;  %v10554_v7 = vpack.c.bf16 %v1184_v14, %v1183_v9 }
 0x1d1   :  { %8364 = vmatprep.mubr.msk.f32.mxu1 %vm12200_vm1, %v13888_v43  ;;  %v11961_v47 = vpop.eup %11960 }
 0x1d2   :  { %v940_v59 = vadd.f32 1.0, %v11961_v47  ;;  %v11963_v9 = vpop.eup %11962  ;;  %v1318_v47 = vld [vmem:[#allocation6 + $0x808] sm:$0xff] }
 0x1d3   :  { %10543 = vmatpush3.bf16.msra.mxu1 %v10542_v31  ;;  %10681 = vmatpush3.bf16.msra.mxu0 %v10680_v33  ;;  %v1294_v31 = vld [vmem:[#allocation6 + $0x748] sm:$0xff]  ;;  %v12792_v33 = vpop.f32.mrb[40].mxu0 }
 0x1d4   :  { %10544 = vmatprep.subr.bf16.mxu1 %v12199_v0  ;;  %10706 = vmatprep.subr.bf16.mxu0 %v12199_v0  ;;  %v10719_v36 = vpack.c.bf16 %v1294_v31, %v1293_v23  ;;  %v12794_v38 = vpop.f32.mrb[41].mxu0  ;;  %v947_v23 = vadd.f32 1.0, %v11963_v9  ;;  %v1319_v9 = vld [vmem:[#allocation6 + $0x810] sm:$0xff] }
 0x1d5   :  { %v12798_v44 = vpop.f32.mrb[42].mxu0 }
 0x1d6   :  { %8540 = vmatmul.mubr.f32.vlgmr.msra.gmra.mrb[72].mxu0 %v1009_v28  ;;  %v1188_v28 = vld [vmem:[#allocation6 + $0x3f8] sm:$0xff]  ;;  %v12800_v48 = vpop.f32.mrb[43].mxu0  ;;  %v1011_v62 = vmul.f32 %v947_v23, %v755_v19  ;;  %v1214_v19 = vld [vmem:[#allocation6 + $0x4c8] sm:$0xff]  ;;  %v1321_v23 = vld [vmem:[#allocation6 + $0x820] sm:$0xff] }
 0x1d7   :  { %10546 = vmatpush3.bf16.msra.mxu1 %v10545_v41  ;;  %10708 = vmatpush3.bf16.msra.mxu0 %v10707_v42  ;;  %v1295_v41 = vld [vmem:[#allocation6 + $0x750] sm:$0xff]  ;;  %v1296_v42 = vld [vmem:[#allocation6 + $0x758] sm:$0xff]  ;;  %v10560_v49 = vpack.c.bf16 %v1188_v28, %v1187_v37  ;;  %v1209_v37 = vld [vmem:[#allocation6 + $0x4a0] sm:$0xff] }
 0x1d8   :  { %10547 = vmatprep.subr.bf16.mxu1 %v12199_v0  ;;  %10709 = vmatprep.subr.bf16.mxu0 %v12199_v0  ;;  %v10722_v5 = vpack.c.bf16 %v1296_v42, %v1295_v41  ;;  %v1210_v41 = vld [vmem:[#allocation6 + $0x4a8] sm:$0xff]  ;;  %v1317_v42 = vld [vmem:[#allocation6 + $0x800] sm:$0xff] }
 0x1d9   :  { %8609 = vmatprep.mubr.msk.f32.mxu0 %vm12200_vm1, %v13888_v43 }
 0x1db   :  { %10549 = vmatpush3.bf16.msra.mxu1 %v10548_v63  ;;  %10711 = vmatpush3.bf16.msra.mxu0 %v10710_v52  ;;  %v1205_v63 = vld [vmem:[#allocation6 + $0x480] sm:$0xff]  ;;  %v12802_v52 = vpop.f32.mrb[44].mxu0 }
 0x1dc   :  { %10550 = vmatprep.subr.bf16.mxu1 %v12199_v0  ;;  %10712 = vmatprep.subr.bf16.mxu0 %v12199_v0  ;;  %v10587_v14 = vpack.c.bf16 %v1206_v60, %v1205_v63  ;;  %v1211_v60 = vld [vmem:[#allocation6 + $0x4b0] sm:$0xff] }
 0x1df   :  { %10552 = vmatpush3.bf16.msra.mxu1 %v10551_v6  ;;  %10714 = vmatpush3.bf16.msra.mxu0 %v10713_v13  ;;  %v1298_v6 = vld [vmem:[#allocation6 + $0x768] sm:$0xff]  ;;  %v12807_v13 = vpop.f32.mrb[45].mxu0 }
 0x1e0   :  { %10553 = vmatprep.subr.bf16.mxu1 %v12199_v0  ;;  %10715 = vmatprep.subr.bf16.mxu0 %v12199_v0  ;;  %v10725_v15 = vpack.c.bf16 %v1298_v6, %v1297_v3  ;;  %v12809_v2 = vpop.f32.mrb[46].mxu0  ;;  %v1212_v6 = vld [vmem:[#allocation6 + $0x4b8] sm:$0xff] }
 0x1e1   :  { %v12814_v31 = vpop.f32.mrb[47].mxu0 }
 0x1e2   :  { %v12816_v28 = vpop.f32.mrb[48].mxu0 }
 0x1e3   :  { %10555 = vmatpush3.bf16.msra.mxu1 %v10554_v7  ;;  %10717 = vmatpush3.bf16.msra.mxu0 %v10716_v1  ;;  %v1004_v7 = vmul.f32 %v940_v59, %v748_v54  ;;  %v1299_v1 = vld [vmem:[#allocation6 + $0x770] sm:$0xff]  ;;  %v10593_v54 = vpack.c.bf16 %v1210_v41, %v1209_v37  ;;  %v10755_v59 = vpack.c.bf16 %v1318_v47, %v1317_v42 }
 0x1e4   :  { %10556 = vmatprep.subr.bf16.mxu1 %v12199_v0  ;;  %10718 = vmatprep.subr.bf16.mxu0 %v12199_v0 }
 0x1e7   :  { %10558 = vmatpush3.bf16.msra.mxu1 %v10557_v34  ;;  %10720 = vmatpush3.bf16.msra.mxu0 %v10719_v36  ;;  %v10590_v34 = vpack.c.bf16 %v1208_v40, %v1207_v20  ;;  %v10728_v36 = vpack.c.bf16 %v1300_v21, %v1299_v1  ;;  %v1213_v1 = vld [vmem:[#allocation6 + $0x4c0] sm:$0xff] }
 0x1e8   :  { %10559 = vmatprep.subr.bf16.mxu1 %v12199_v0  ;;  %10721 = vmatprep.subr.bf16.mxu0 %v12199_v0  ;;  %v10599_v47 = vpack.c.bf16 %v1214_v19, %v1213_v1  ;;  %v1218_v19 = vld [vmem:[#allocation6 + $0x4e8] sm:$0xff] }
 0x1eb   :  { %10561 = vmatpush3.bf16.msra.mxu1 %v10560_v49  ;;  %10723 = vmatpush3.bf16.msra.mxu0 %v10722_v5  ;;  %v12820_v49 = vpop.f32.mrb[49].mxu0  ;;  %v12824_v5 = vld [vmem:[#allocation4] ss:$0 sm:$0xff] }
 0x1ec   :  { %10586 = vmatprep.subr.bf16.mxu1 %v12199_v0  ;;  %10724 = vmatprep.subr.bf16.mxu0 %v12199_v0  ;;  %v12828_v63 = vadd.f32 %v12824_v5, %v12592_v10  ;;  %v12830_v3 = vpop.f32.mrb[50].mxu0  ;;  %v12847_v37 = vadd.f32 %v12824_v5, %v12655_v16  ;;  %v1216_v16 = vld [vmem:[#allocation6 + $0x4d8] sm:$0xff] }
 0x1ee   :  { %8365 = vmatmul.mubr.f32.vlgmr.msra.gmra.mrb[10].mxu1 %v1004_v7  ;;  %v814_v10 = vmul.f32 0.70710677, %v12828_v63  ;;  %v10596_v7 = vpack.c.bf16 %v1212_v6, %v1211_v60  ;;  %v1323_v60 = vld [vmem:[#allocation6 + $0x830] sm:$0xff]  ;;  %v1324_v6 = vld [vmem:[#allocation6 + $0x838] sm:$0xff] }
 0x1ef   :  { %10588 = vmatpush3.bf16.msra.mxu1 %v10587_v14  ;;  %10726 = vmatpush3.bf16.msra.mxu0 %v10725_v15  ;;  %v1320_v14 = vld [vmem:[#allocation6 + $0x818] sm:$0xff]  ;;  %v12834_v15 = vpop.f32.mrb[51].mxu0 }
 0x1f0   :  { %10589 = vmatprep.subr.bf16.mxu1 %v12199_v0  ;;  %10727 = vmatprep.subr.bf16.mxu0 %v12199_v0  ;;  %v12836_v20 = vpop.f32.mrb[52].mxu0  ;;  %v10758_v40 = vpack.c.bf16 %v1320_v14, %v1319_v9  ;;  %11964 = verf.f32 %v814_v10  ;;  %v821_v14 = vmul.f32 0.70710677, %v12847_v37 }
 0x1f1   :  { %8434 = vmatprep.mubr.msk.f32.mxu1 %vm12200_vm1, %v13888_v43  ;;  %13890 = vst [vmem:[#allocation13_spill] sm:$0xff] %v12836_v20  ;;  %v12839_v21 = vpop.f32.mrb[53].mxu0 }
 0x1f2   :  { %11966 = verf.f32 %v821_v14 }
 0x1f3   :  { %10591 = vmatpush3.bf16.msra.mxu1 %v10590_v34  ;;  %10729 = vmatpush3.bf16.msra.mxu0 %v10728_v36  ;;  %v1322_v34 = vld [vmem:[#allocation6 + $0x828] sm:$0xff]  ;;  %v12843_v36 = vpop.f32.mrb[54].mxu0 }
 0x1f4   :  { %10592 = vmatprep.subr.bf16.mxu1 %v12199_v0  ;;  %10754 = vmatprep.subr.bf16.mxu0 %v12199_v0  ;;  %13891 = vst [vmem:[#allocation14_spill] sm:$0xff] %v12843_v36  ;;  %v12851_v41 = vpop.f32.mrb[55].mxu0 }
 0x1f5   :  { %v12853_v42 = vpop.f32.mrb[56].mxu0 }
 0x1f6   :  { %8610 = vmatmul.mubr.f32.vlgmr.msra.gmra.mrb[74].mxu0 %v1011_v62  ;;  %13892 = vst [vmem:[#allocation15_spill] sm:$0xff] %v12853_v42  ;;  %v10761_v62 = vpack.c.bf16 %v1322_v34, %v1321_v23  ;;  %v1325_v23 = vld [vmem:[#allocation6 + $0x840] sm:$0xff]  ;;  %v1326_v34 = vld [vmem:[#allocation6 + $0x848] sm:$0xff] }
 0x1f7   :  { %10594 = vmatpush3.bf16.msra.mxu1 %v10593_v54  ;;  %10756 = vmatpush3.bf16.msra.mxu0 %v10755_v59  ;;  %v1215_v54 = vld [vmem:[#allocation6 + $0x4d0] sm:$0xff]  ;;  %v12855_v59 = vpop.f32.mrb[57].mxu0 }
 0x1f8   :  { %10595 = vmatprep.subr.bf16.mxu1 %v12199_v0  ;;  %10757 = vmatprep.subr.bf16.mxu0 %v12199_v0  ;;  %v12859_v9 = vpop.f32.mrb[58].mxu0  ;;  %v10602_v10 = vpack.c.bf16 %v1216_v16, %v1215_v54  ;;  %v1219_v54 = vld [vmem:[#allocation6 + $0x4f0] sm:$0xff]  ;;  %v1220_v16 = vld [vmem:[#allocation6 + $0x4f8] sm:$0xff] }
 0x1f9   :  { %8679 = vmatprep.mubr.msk.f32.mxu0 %vm12200_vm1, %v13888_v43  ;;  %13893 = vst [vmem:[#allocation16_spill] sm:$0xff] %v12859_v9  ;;  %v12862_v43 = vpop.f32.mrb[59].mxu0  ;;  %v10608_v14 = vpack.c.bf16 %v1220_v16, %v1219_v54  ;;  %v1332_v54 = vld [vmem:[#allocation6 + $0x878] sm:$0xff]  ;;  %v757_v16 = vmul.f32 0.5, %v12847_v37  ;;  %v12888_v37 = vadd.f32 %v12824_v5, %v12596_v18 }
 0x1fa   :  { %13894 = vst [vmem:[#allocation17_spill] sm:$0xff] %v12862_v43  ;;  %v12864_v1 = vpop.f32.mrb[60].mxu0 }
 0x1fb   :  { %10597 = vmatpush3.bf16.msra.mxu1 %v10596_v7  ;;  %10759 = vmatpush3.bf16.msra.mxu0 %v10758_v40  ;;  %v10764_v7 = vpack.c.bf16 %v1324_v6, %v1323_v60  ;;  %v1217_v40 = vld [vmem:[#allocation6 + $0x4e0] sm:$0xff]  ;;  %13895 = vst [vmem:[#allocation18_spill] sm:$0xff] %v12864_v1  ;;  %v12868_v42 = vpop.f32.mrb[61].mxu0  ;;  %v1327_v60 = vld [vmem:[#allocation6 + $0x850] sm:$0xff]  ;;  %v1328_v6 = vld [vmem:[#allocation6 + $0x858] sm:$0xff]  ;;  %v11965_v1 = vpop.eup %11964 }
 0x1fc   :  { %10598 = vmatprep.subr.bf16.mxu1 %v12199_v0  ;;  %10760 = vmatprep.subr.bf16.mxu0 %v12199_v0  ;;  %13896 = vst [vmem:[#allocation19_spill] sm:$0xff] %v12868_v42  ;;  %v12870_v9 = vpop.f32.mrb[62].mxu0  ;;  %v10770_v42 = vpack.c.bf16 %v1328_v6, %v1327_v60 }
 0x1fd   :  { %13897 = vst [vmem:[#allocation20_spill] sm:$0xff] %v12870_v9  ;;  %v12872_v36 = vpop.f32.mrb[63].mxu0  ;;  %v1237_v9 = vld [vmem:[#allocation6 + $0x580] sm:$0xff] }
 0x1fe   :  { %13898 = vst [vmem:[#allocation21_spill] sm:$0xff] %v12872_v36  ;;  %v750_v36 = vmul.f32 0.5, %v12828_v63  ;;  %v1240_v63 = vld [vmem:[#allocation6 + $0x598] sm:$0xff] }
 0x1ff   :  { %10600 = vmatpush3.bf16.msra.mxu1 %v10599_v47  ;;  %10762 = vmatpush3.bf16.msra.mxu0 %v10761_v62  ;;  %v10605_v47 = vpack.c.bf16 %v1218_v19, %v1217_v40  ;;  %v10767_v62 = vpack.c.bf16 %v1326_v34, %v1325_v23  ;;  %v1329_v40 = vld [vmem:[#allocation6 + $0x860] sm:$0xff]  ;;  %v1330_v19 = vld [vmem:[#allocation6 + $0x868] sm:$0xff]  ;;  %v11967_v23 = vpop.eup %11966 }
 0x200   :  { %10601 = vmatprep.subr.bf16.mxu1 %v12199_v0  ;;  %10763 = vmatprep.subr.bf16.mxu0 %v12199_v0  ;;  %v10773_v20 = vpack.c.bf16 %v1330_v19, %v1329_v40  ;;  %v949_v60 = vadd.f32 1.0, %v11967_v23  ;;  %v1243_v23 = vld [vmem:[#allocation6 + $0x5b0] sm:$0xff] }
 0x202   :  { %v1013_v40 = vmul.f32 %v949_v60, %v757_v16  ;;  %v1246_v16 = vld [vmem:[#allocation6 + $0x5c8] sm:$0xff]  ;;  %v1353_v60 = vld [vmem:[#allocation6 + $0x920] sm:$0xff] }
 0x203   :  { %10603 = vmatpush3.bf16.msra.mxu1 %v10602_v10  ;;  %10765 = vmatpush3.bf16.msra.mxu0 %v10764_v7  ;;  %v942_v10 = vadd.f32 1.0, %v11965_v1  ;;  %v1238_v7 = vld [vmem:[#allocation6 + $0x588] sm:$0xff]  ;;  %v1331_v1 = vld [vmem:[#allocation6 + $0x870] sm:$0xff] }
 0x204   :  { %10604 = vmatprep.subr.bf16.mxu1 %v12199_v0  ;;  %10766 = vmatprep.subr.bf16.mxu0 %v12199_v0  ;;  %v10635_v34 = vpack.c.bf16 %v1238_v7, %v1237_v9  ;;  %v1349_v9 = vld [vmem:[#allocation6 + $0x900] sm:$0xff]  ;;  %v13899_v7 = vmov 0.0  }
 0x207   :  { %10606 = vmatpush3.bf16.msra.mxu1 %v10605_v47  ;;  %10768 = vmatpush3.bf16.msra.mxu0 %v10767_v62  ;;  %v1239_v47 = vld [vmem:[#allocation6 + $0x590] sm:$0xff]  ;;  %v1006_v62 = vmul.f32 %v942_v10, %v750_v36  ;;  %v1242_v36 = vld [vmem:[#allocation6 + $0x5a8] sm:$0xff] }
 0x208   :  { %10607 = vmatprep.subr.bf16.mxu1 %v12199_v0  ;;  %10769 = vmatprep.subr.bf16.mxu0 %v12199_v0  ;;  %v10638_v6 = vpack.c.bf16 %v1240_v63, %v1239_v47  ;;  %v1350_v10 = vld [vmem:[#allocation6 + $0x908] sm:$0xff]  ;;  %v1351_v47 = vld [vmem:[#allocation6 + $0x910] sm:$0xff]  ;;  %v816_v63 = vmul.f32 0.70710677, %v12888_v37 }
 0x209   :  { %v10803_v19 = vpack.c.bf16 %v1350_v10, %v1349_v9  ;;  %v1247_v9 = vld [vmem:[#allocation6 + $0x5d0] sm:$0xff]  ;;  %v1248_v10 = vld [vmem:[#allocation6 + $0x5d8] sm:$0xff] }
 0x20a   :  { %11968 = verf.f32 %v816_v63  ;;  %v1358_v63 = vld [vmem:[#allocation6 + $0x948] sm:$0xff] }
 0x20b   :  { %10609 = vmatpush3.bf16.msra.mxu1 %v10608_v14  ;;  %10771 = vmatpush3.bf16.msra.mxu0 %v10770_v42  ;;  %v10776_v14 = vpack.c.bf16 %v1332_v54, %v1331_v1  ;;  %v1241_v42 = vld [vmem:[#allocation6 + $0x5a0] sm:$0xff] }
 0x20c   :  { %10634 = vmatprep.subr.bf16.mxu1 %v12199_v0  ;;  %10772 = vmatprep.subr.bf16.mxu0 %v12199_v0  ;;  %v1245_v54 = vld [vmem:[#allocation6 + $0x5c0] sm:$0xff] }
 0x20e   :  { %8435 = vmatmul.mubr.f32.vlgmr.msra.gmra.mrb[12].mxu1 %v1006_v62  ;;  %v1352_v62 = vld [vmem:[#allocation6 + $0x918] sm:$0xff] }
 0x20f   :  { %10636 = vmatpush3.bf16.msra.mxu1 %v10635_v34  ;;  %10774 = vmatpush3.bf16.msra.mxu0 %v10773_v20  ;;  %v10641_v20 = vpack.c.bf16 %v1242_v36, %v1241_v42  ;;  %v1244_v34 = vld [vmem:[#allocation6 + $0x5b8] sm:$0xff]  ;;  %v10806_v18 = vpack.c.bf16 %v1352_v62, %v1351_v47  ;;  %v10647_v42 = vpack.c.bf16 %v1246_v16, %v1245_v54  ;;  %v1250_v47 = vld [vmem:[#allocation6 + $0x5e8] sm:$0xff]  ;;  %v1357_v62 = vld [vmem:[#allocation6 + $0x940] sm:$0xff] }
 0x210   :  { %10637 = vmatprep.subr.bf16.mxu1 %v12199_v0  ;;  %10775 = vmatprep.subr.bf16.mxu0 %v12199_v0  ;;  %v10644_v1 = vpack.c.bf16 %v1244_v34, %v1243_v23  ;;  %v1249_v34 = vld [vmem:[#allocation6 + $0x5e0] sm:$0xff]  ;;  %v10815_v16 = vpack.c.bf16 %v1358_v63, %v1357_v62 }
 0x211   :  { %8504 = vmatprep.mubr.msk.f32.mxu1 %vm12200_vm1, %v13899_v7  ;;  %v10653_v54 = vpack.c.bf16 %v1250_v47, %v1249_v34  ;;  %v1361_v34 = vld [vmem:[#allocation6 + $0x960] sm:$0xff]  ;;  %v1362_v47 = vld [vmem:[#allocation6 + $0x968] sm:$0xff] }
 0x213   :  { %10639 = vmatpush3.bf16.msra.mxu1 %v10638_v6  ;;  %10777 = vmatpush3.bf16.msra.mxu0 %v10776_v14  ;;  %v1354_v6 = vld [vmem:[#allocation6 + $0x928] sm:$0xff]  ;;  %v12897_v14 = vadd.f32 %v12824_v5, %v12687_v32  ;;  %v10650_v32 = vpack.c.bf16 %v1248_v10, %v1247_v9 }
 0x214   :  { %10640 = vmatprep.subr.bf16.mxu1 %v12199_v0  ;;  %10802 = vmatprep.subr.bf16.mxu0 %v12199_v0  ;;  %v10809_v36 = vpack.c.bf16 %v1354_v6, %v1353_v60  ;;  %v1251_v60 = vld [vmem:[#allocation6 + $0x5f0] sm:$0xff]  ;;  %v1252_v6 = vld [vmem:[#allocation6 + $0x5f8] sm:$0xff]  ;;  %v11969_v9 = vpop.eup %11968 }
 0x215   :  { %v10656_v10 = vpack.c.bf16 %v1252_v6, %v1251_v60  ;;  %v1271_v60 = vld [vmem:[#allocation6 + $0x690] sm:$0xff] }
 0x216   :  { %8680 = vmatmul.mubr.f32.vlgmr.msra.gmra.mrb[76].mxu0 %v1013_v40  ;;  %v1355_v40 = vld [vmem:[#allocation6 + $0x930] sm:$0xff] }
 0x217   :  { %10642 = vmatpush3.bf16.msra.mxu1 %v10641_v20  ;;  %10804 = vmatpush3.bf16.msra.mxu0 %v10803_v19  ;;  %v1356_v20 = vld [vmem:[#allocation6 + $0x938] sm:$0xff]  ;;  %v823_v19 = vmul.f32 0.70710677, %v12897_v14 }
 0x218   :  { %10643 = vmatprep.subr.bf16.mxu1 %v12199_v0  ;;  %10805 = vmatprep.subr.bf16.mxu0 %v12199_v0  ;;  %v10812_v23 = vpack.c.bf16 %v1356_v20, %v1355_v40  ;;  %v1269_v20 = vld [vmem:[#allocation6 + $0x680] sm:$0xff] }
 0x219   :  { %8749 = vmatprep.mubr.msk.f32.mxu0 %vm12200_vm1, %v13899_v7  ;;  %11970 = verf.f32 %v823_v19  ;;  %v752_v19 = vmul.f32 0.5, %v12888_v37  ;;  %v1272_v37 = vld [vmem:[#allocation6 + $0x698] sm:$0xff] }
 0x21b   :  { %10645 = vmatpush3.bf16.msra.mxu1 %v10644_v1  ;;  %10807 = vmatpush3.bf16.msra.mxu0 %v10806_v18 }
 0x21c   :  { %10646 = vmatprep.subr.bf16.mxu1 %v12199_v0  ;;  %10808 = vmatprep.subr.bf16.mxu0 %v12199_v0 }
 0x21f   :  { %10648 = vmatpush3.bf16.msra.mxu1 %v10647_v42  ;;  %10810 = vmatpush3.bf16.msra.mxu0 %v10809_v36  ;;  %v1359_v42 = vld [vmem:[#allocation6 + $0x950] sm:$0xff]  ;;  %v1360_v36 = vld [vmem:[#allocation6 + $0x958] sm:$0xff] }
 0x220   :  { %10649 = vmatprep.subr.bf16.mxu1 %v12199_v0  ;;  %10811 = vmatprep.subr.bf16.mxu0 %v12199_v0  ;;  %v10818_v40 = vpack.c.bf16 %v1360_v36, %v1359_v42  ;;  %v1363_v42 = vld [vmem:[#allocation6 + $0x970] sm:$0xff]  ;;  %v1364_v36 = vld [vmem:[#allocation6 + $0x978] sm:$0xff] }
 0x221   :  { %v12906_v1 = vpop.f32.mrb[0].mxu1 }
 0x222   :  { %v8121_v18 = vpop.f32.mrb[1].mxu1 }
 0x223   :  { %10651 = vmatpush3.bf16.msra.mxu1 %v10650_v32  ;;  %10813 = vmatpush3.bf16.msra.mxu0 %v10812_v23  ;;  %v944_v32 = vadd.f32 1.0, %v11969_v9  ;;  %v1270_v23 = vld [vmem:[#allocation6 + $0x688] sm:$0xff]  ;;  %v11971_v18 = vpop.eup %11970  ;;  %v759_v9 = vmul.f32 0.5, %v12897_v14  ;;  %v12924_v14 = vadd.f32 %v12824_v5, %v12603_v27 }
 0x224   :  { %10652 = vmatprep.subr.bf16.mxu1 %v12199_v0  ;;  %10814 = vmatprep.subr.bf16.mxu0 %v12199_v0  ;;  %v951_v43 = vadd.f32 1.0, %v11971_v18  ;;  %v1275_v18 = vld [vmem:[#allocation6 + $0x6b0] sm:$0xff] }
 0x225   :  { %v1008_v6 = vmul.f32 %v944_v32, %v752_v19  ;;  %v1381_v19 = vld [vmem:[#allocation6 + $0xa00] sm:$0xff]  ;;  %v1382_v32 = vld [vmem:[#allocation6 + $0xa08] sm:$0xff] }
 0x227   :  { %10654 = vmatpush3.bf16.msra.mxu1 %v10653_v54  ;;  %10816 = vmatpush3.bf16.msra.mxu0 %v10815_v16  ;;  %v10683_v54 = vpack.c.bf16 %v1270_v23, %v1269_v20  ;;  %v10821_v16 = vpack.c.bf16 %v1362_v47, %v1361_v34  ;;  %v1274_v20 = vld [vmem:[#allocation6 + $0x6a8] sm:$0xff]  ;;  %v1015_v23 = vmul.f32 %v951_v43, %v759_v9 }
 0x228   :  { %10655 = vmatprep.subr.bf16.mxu1 %v12199_v0  ;;  %10817 = vmatprep.subr.bf16.mxu0 %v12199_v0  ;;  %v10851_v47 = vpack.c.bf16 %v1382_v32, %v1381_v19  ;;  %v1386_v9 = vld [vmem:[#allocation6 + $0xa28] sm:$0xff]  ;;  %v1280_v19 = vld [vmem:[#allocation6 + $0x6d8] sm:$0xff]  ;;  %v1387_v32 = vld [vmem:[#allocation6 + $0xa30] sm:$0xff] }
 0x229   :  { %v12913_v62 = vpop.f32.mrb[64].mxu0 }
 0x22a   :  { %v8261_v63 = vpop.f32.mrb[65].mxu0 }
 0x22b   :  { %10657 = vmatpush3.bf16.msra.mxu1 %v10656_v10  ;;  %10819 = vmatpush3.bf16.msra.mxu0 %v10818_v40  ;;  %v10686_v63 = vpack.c.bf16 %v1272_v37, %v1271_v60  ;;  %v10824_v10 = vpack.c.bf16 %v1364_v36, %v1363_v42  ;;  %v1273_v40 = vld [vmem:[#allocation6 + $0x6a0] sm:$0xff]  ;;  %v1384_v60 = vld [vmem:[#allocation6 + $0xa18] sm:$0xff]  ;;  %v1278_v42 = vld [vmem:[#allocation6 + $0x6c8] sm:$0xff] }
 0x22c   :  { %10682 = vmatprep.subr.bf16.mxu1 %v12199_v0  ;;  %10820 = vmatprep.subr.bf16.mxu0 %v12199_v0  ;;  %v10689_v34 = vpack.c.bf16 %v1274_v20, %v1273_v40  ;;  %v1277_v37 = vld [vmem:[#allocation6 + $0x6c0] sm:$0xff]  ;;  %v1279_v20 = vld [vmem:[#allocation6 + $0x6d0] sm:$0xff] }
 0x22d   :  { %v1385_v36 = vld [vmem:[#allocation6 + $0xa20] sm:$0xff] }
 0x22e   :  { %8505 = vmatmul.mubr.f32.vlgmr.msra.gmra.mrb[14].mxu1 %v1008_v6  ;;  %v818_v6 = vmul.f32 0.70710677, %v12924_v14  ;;  %v10857_v40 = vpack.c.bf16 %v1386_v9, %v1385_v36  ;;  %v1283_v36 = vld [vmem:[#allocation6 + $0x6f0] sm:$0xff]  ;;  %v1284_v9 = vld [vmem:[#allocation6 + $0x6f8] sm:$0xff] }
 0x22f   :  { %10684 = vmatpush3.bf16.msra.mxu1 %v10683_v54  ;;  %10822 = vmatpush3.bf16.msra.mxu0 %v10821_v16  ;;  %v1276_v54 = vld [vmem:[#allocation6 + $0x6b8] sm:$0xff]  ;;  %v1383_v16 = vld [vmem:[#allocation6 + $0xa10] sm:$0xff] }
 0x230   :  { %10685 = vmatprep.subr.bf16.mxu1 %v12199_v0  ;;  %10823 = vmatprep.subr.bf16.mxu0 %v12199_v0  ;;  %v10692_v43 = vpack.c.bf16 %v1276_v54, %v1275_v18  ;;  %v10854_v27 = vpack.c.bf16 %v1384_v60, %v1383_v16  ;;  %11972 = verf.f32 %v818_v6  ;;  %v1282_v54 = vld [vmem:[#allocation6 + $0x6e8] sm:$0xff]  ;;  %v1389_v16 = vld [vmem:[#allocation6 + $0xa40] sm:$0xff] }
 0x231   :  { %8574 = vmatprep.mubr.msk.f32.mxu1 %vm12200_vm1, %v13899_v7  ;;  %v1390_v60 = vld [vmem:[#allocation6 + $0xa48] sm:$0xff] }
 0x233   :  { %10687 = vmatpush3.bf16.msra.mxu1 %v10686_v63  ;;  %10825 = vmatpush3.bf16.msra.mxu0 %v10824_v10  ;;  %v12935_v63 = vadd.f32 %v12824_v5, %v12711_v26  ;;  %v10695_v10 = vpack.c.bf16 %v1278_v42, %v1277_v37  ;;  %v1281_v26 = vld [vmem:[#allocation6 + $0x6e0] sm:$0xff]  ;;  %v10863_v42 = vpack.c.bf16 %v1390_v60, %v1389_v16 }
 0x234   :  { %10688 = vmatprep.subr.bf16.mxu1 %v12199_v0  ;;  %10850 = vmatprep.subr.bf16.mxu0 %v12199_v0  ;;  %v10701_v37 = vpack.c.bf16 %v1282_v54, %v1281_v26  ;;  %v1394_v26 = vld [vmem:[#allocation6 + $0xa68] sm:$0xff] }
 0x236   :  { %8750 = vmatmul.mubr.f32.vlgmr.msra.gmra.mrb[78].mxu0 %v1015_v23  ;;  %v1388_v23 = vld [vmem:[#allocation6 + $0xa38] sm:$0xff] }
 0x237   :  { %10690 = vmatpush3.bf16.msra.mxu1 %v10689_v34  ;;  %10852 = vmatpush3.bf16.msra.mxu0 %v10851_v47  ;;  %v825_v34 = vmul.f32 0.70710677, %v12935_v63  ;;  %v10698_v47 = vpack.c.bf16 %v1280_v19, %v1279_v20  ;;  %v10860_v18 = vpack.c.bf16 %v1388_v23, %v1387_v32  ;;  %v10704_v19 = vpack.c.bf16 %v1284_v9, %v1283_v36  ;;  %v1301_v32 = vld [vmem:[#allocation6 + $0x780] sm:$0xff]  ;;  %v1396_v36 = vld [vmem:[#allocation6 + $0xa78] sm:$0xff] }
 0x238   :  { %10691 = vmatprep.subr.bf16.mxu1 %v12199_v0  ;;  %10853 = vmatprep.subr.bf16.mxu0 %v12199_v0  ;;  %v754_v23 = vmul.f32 0.5, %v12924_v14  ;;  %v1304_v14 = vld [vmem:[#allocation6 + $0x798] sm:$0xff] }
 0x239   :  { %8819 = vmatprep.mubr.msk.f32.mxu0 %vm12200_vm1, %v13899_v7  ;;  %11974 = verf.f32 %v825_v34 }
 0x23a   :  { %v11973_v20 = vpop.eup %11972 }
 0x23b   :  { %10693 = vmatpush3.bf16.msra.mxu1 %v10692_v43  ;;  %10855 = vmatpush3.bf16.msra.mxu0 %v10854_v27  ;;  %v946_v34 = vadd.f32 1.0, %v11973_v20  ;;  %v1305_v20 = vld [vmem:[#allocation6 + $0x7a0] sm:$0xff] }
 0x23c   :  { %10694 = vmatprep.subr.bf16.mxu1 %v12199_v0  ;;  %10856 = vmatprep.subr.bf16.mxu0 %v12199_v0 }
 0x23f   :  { %10696 = vmatpush3.bf16.msra.mxu1 %v10695_v10  ;;  %10858 = vmatpush3.bf16.msra.mxu0 %v10857_v40  ;;  %v1391_v10 = vld [vmem:[#allocation6 + $0xa50] sm:$0xff]  ;;  %v1392_v40 = vld [vmem:[#allocation6 + $0xa58] sm:$0xff] }
 0x240   :  { %10697 = vmatprep.subr.bf16.mxu1 %v12199_v0  ;;  %10859 = vmatprep.subr.bf16.mxu0 %v12199_v0 }
 0x241   :  { %v2221_v6 = vpop.f32.mrb[2].mxu1 }
 0x242   :  { %v12943_v43 = vadd.f32 %v2221_v6, %v12906_v1  ;;  %v8156_v27 = vpop.f32.mrb[3].mxu1  ;;  %v10866_v1 = vpack.c.bf16 %v1392_v40, %v1391_v10 }
 0x243   :  { %10699 = vmatpush3.bf16.msra.mxu1 %v10698_v47  ;;  %10861 = vmatpush3.bf16.msra.mxu0 %v10860_v18  ;;  %v1302_v47 = vld [vmem:[#allocation6 + $0x788] sm:$0xff]  ;;  %v1393_v18 = vld [vmem:[#allocation6 + $0xa60] sm:$0xff]  ;;  %v1303_v27 = vld [vmem:[#allocation6 + $0x790] sm:$0xff]  ;;  %v11975_v9 = vpop.eup %11974 }
 0x244   :  { %10700 = vmatprep.subr.bf16.mxu1 %v12199_v0  ;;  %10862 = vmatprep.subr.bf16.mxu0 %v12199_v0  ;;  %v10731_v60 = vpack.c.bf16 %v1302_v47, %v1301_v32  ;;  %v10869_v6 = vpack.c.bf16 %v1394_v26, %v1393_v18  ;;  %v10734_v10 = vpack.c.bf16 %v1304_v14, %v1303_v27  ;;  %v1306_v32 = vld [vmem:[#allocation6 + $0x7a8] sm:$0xff]  ;;  %v1416_v27 = vld [vmem:[#allocation6 + $0xb18] sm:$0xff] }
 0x245   :  { %v12961_v47 = vadd.f32 %v12824_v5, %v12619_v58  ;;  %v10737_v18 = vpack.c.bf16 %v1306_v32, %v1305_v20  ;;  %v1312_v32 = vld [vmem:[#allocation6 + $0x7d8] sm:$0xff] }
 0x247   :  { %10702 = vmatpush3.bf16.msra.mxu1 %v10701_v37  ;;  %10864 = vmatpush3.bf16.msra.mxu0 %v10863_v42  ;;  %v1010_v37 = vmul.f32 %v946_v34, %v754_v23  ;;  %v1395_v42 = vld [vmem:[#allocation6 + $0xa70] sm:$0xff]  ;;  %v1413_v23 = vld [vmem:[#allocation6 + $0xb00] sm:$0xff]  ;;  %v1414_v34 = vld [vmem:[#allocation6 + $0xb08] sm:$0xff] }
 0x248   :  { %10703 = vmatprep.subr.bf16.mxu1 %v12199_v0  ;;  %10865 = vmatprep.subr.bf16.mxu0 %v12199_v0  ;;  %v10872_v40 = vpack.c.bf16 %v1396_v36, %v1395_v42  ;;  %v10899_v26 = vpack.c.bf16 %v1414_v34, %v1413_v23  ;;  %v1309_v42 = vld [vmem:[#allocation6 + $0x7c0] sm:$0xff]  ;;  %v1310_v36 = vld [vmem:[#allocation6 + $0x7c8] sm:$0xff]  ;;  %v1419_v23 = vld [vmem:[#allocation6 + $0xb30] sm:$0xff] }
 0x249   :  { %v12950_v54 = vpop.f32.mrb[66].mxu0  ;;  %v10743_v20 = vpack.c.bf16 %v1310_v36, %v1309_v42  ;;  %v1420_v34 = vld [vmem:[#allocation6 + $0xb38] sm:$0xff]  ;;  %v1315_v36 = vld [vmem:[#allocation6 + $0x7f0] sm:$0xff] }
 0x24a   :  { %v8331_v16 = vpop.f32.mrb[67].mxu0 }
 0x24b   :  { %10705 = vmatpush3.bf16.msra.mxu1 %v10704_v19  ;;  %10867 = vmatpush3.bf16.msra.mxu0 %v10866_v1  ;;  %v761_v19 = vmul.f32 0.5, %v12935_v63  ;;  %v953_v1 = vadd.f32 1.0, %v11975_v9  ;;  %v1307_v63 = vld [vmem:[#allocation6 + $0x7b0] sm:$0xff]  ;;  %v1417_v9 = vld [vmem:[#allocation6 + $0xb20] sm:$0xff] }
 0x24c   :  { %10730 = vmatprep.subr.bf16.mxu1 %v12199_v0  ;;  %10868 = vmatprep.subr.bf16.mxu0 %v12199_v0 }
 0x24d   :  { %v1017_v16 = vmul.f32 %v953_v1, %v761_v19  ;;  %v1311_v1 = vld [vmem:[#allocation6 + $0x7d0] sm:$0xff] }
 0x24e   :  { %8575 = vmatmul.mubr.f32.vlgmr.msra.gmra.mrb[16].mxu1 %v1010_v37  ;;  %v820_v37 = vmul.f32 0.70710677, %v12961_v47 }
 0x24f   :  { %10732 = vmatpush3.bf16.msra.mxu1 %v10731_v60  ;;  %10870 = vmatpush3.bf16.msra.mxu0 %v10869_v6  ;;  %v1308_v60 = vld [vmem:[#allocation6 + $0x7b8] sm:$0xff]  ;;  %v1415_v6 = vld [vmem:[#allocation6 + $0xb10] sm:$0xff] }
 0x250   :  { %10733 = vmatprep.subr.bf16.mxu1 %v12199_v0  ;;  %10871 = vmatprep.subr.bf16.mxu0 %v12199_v0  ;;  %v10740_v58 = vpack.c.bf16 %v1308_v60, %v1307_v63  ;;  %v10902_v14 = vpack.c.bf16 %v1416_v27, %v1415_v6  ;;  %11976 = verf.f32 %v820_v37  ;;  %v10908_v63 = vpack.c.bf16 %v1420_v34, %v1419_v23  ;;  %v1421_v60 = vld [vmem:[#allocation6 + $0xb40] sm:$0xff]  ;;  %v1422_v6 = vld [vmem:[#allocation6 + $0xb48] sm:$0xff] }
 0x251   :  { %8644 = vmatprep.mubr.msk.f32.mxu1 %vm12200_vm1, %v13899_v7  ;;  %v10911_v42 = vpack.c.bf16 %v1422_v6, %v1421_v60  ;;  %v756_v23 = vmul.f32 0.5, %v12961_v47  ;;  %v1336_v47 = vld [vmem:[#allocation6 + $0x898] sm:$0xff] }
 0x253   :  { %10735 = vmatpush3.bf16.msra.mxu1 %v10734_v10  ;;  %10873 = vmatpush3.bf16.msra.mxu0 %v10872_v40  ;;  %v1418_v10 = vld [vmem:[#allocation6 + $0xb28] sm:$0xff]  ;;  %v12972_v40 = vadd.f32 %v12824_v5, %v12723_v29  ;;  %v1313_v29 = vld [vmem:[#allocation6 + $0x7e0] sm:$0xff] }
 0x254   :  { %10736 = vmatprep.subr.bf16.mxu1 %v12199_v0  ;;  %10898 = vmatprep.subr.bf16.mxu0 %v12199_v0  ;;  %v10905_v19 = vpack.c.bf16 %v1418_v10, %v1417_v9  ;;  %v1316_v9 = vld [vmem:[#allocation6 + $0x7f8] sm:$0xff]  ;;  %v1423_v10 = vld [vmem:[#allocation6 + $0xb50] sm:$0xff] }
 0x256   :  { %8820 = vmatmul.mubr.f32.vlgmr.msra.gmra.mrb[80].mxu0 %v1017_v16  ;;  %v1314_v16 = vld [vmem:[#allocation6 + $0x7e8] sm:$0xff] }
 0x257   :  { %10738 = vmatpush3.bf16.msra.mxu1 %v10737_v18  ;;  %10900 = vmatpush3.bf16.msra.mxu0 %v10899_v26  ;;  %v827_v18 = vmul.f32 0.70710677, %v12972_v40  ;;  %v10746_v26 = vpack.c.bf16 %v1312_v32, %v1311_v1  ;;  %v10752_v1 = vpack.c.bf16 %v1316_v9, %v1315_v36  ;;  %v1333_v32 = vld [vmem:[#allocation6 + $0x880] sm:$0xff] }
 0x258   :  { %10739 = vmatprep.subr.bf16.mxu1 %v12199_v0  ;;  %10901 = vmatprep.subr.bf16.mxu0 %v12199_v0 }
 0x259   :  { %8889 = vmatprep.mubr.msk.f32.mxu0 %vm12200_vm1, %v13899_v7  ;;  %11978 = verf.f32 %v827_v18  ;;  %v1334_v18 = vld [vmem:[#allocation6 + $0x888] sm:$0xff] }
 0x25a   :  { %v10779_v60 = vpack.c.bf16 %v1334_v18, %v1333_v32  ;;  %v1445_v32 = vld [vmem:[#allocation6 + $0xc00] sm:$0xff] }
 0x25b   :  { %10741 = vmatpush3.bf16.msra.mxu1 %v10740_v58  ;;  %10903 = vmatpush3.bf16.msra.mxu0 %v10902_v14  ;;  %v10749_v14 = vpack.c.bf16 %v1314_v16, %v1313_v29 }
 0x25c   :  { %10742 = vmatprep.subr.bf16.mxu1 %v12199_v0  ;;  %10904 = vmatprep.subr.bf16.mxu0 %v12199_v0 }
 0x25f   :  { %10744 = vmatpush3.bf16.msra.mxu1 %v10743_v20  ;;  %10906 = vmatpush3.bf16.msra.mxu0 %v10905_v19  ;;  %v1424_v20 = vld [vmem:[#allocation6 + $0xb58] sm:$0xff]  ;;  %v11977_v19 = vpop.eup %11976 }
 0x260   :  { %10745 = vmatprep.subr.bf16.mxu1 %v12199_v0  ;;  %10907 = vmatprep.subr.bf16.mxu0 %v12199_v0  ;;  %v948_v34 = vadd.f32 1.0, %v11977_v19  ;;  %v763_v19 = vmul.f32 0.5, %v12972_v40  ;;  %v1339_v40 = vld [vmem:[#allocation6 + $0x8b0] sm:$0xff] }
 0x261   :  { %v2291_v27 = vpop.f32.mrb[4].mxu1 }
 0x262   :  { %v12980_v37 = vadd.f32 %v12943_v43, %v2291_v27  ;;  %v8191_v58 = vpop.f32.mrb[5].mxu1  ;;  %v10914_v43 = vpack.c.bf16 %v1424_v20, %v1423_v10  ;;  %v1335_v27 = vld [vmem:[#allocation6 + $0x890] sm:$0xff]  ;;  %v1337_v20 = vld [vmem:[#allocation6 + $0x8a0] sm:$0xff] }
 0x263   :  { %10747 = vmatpush3.bf16.msra.mxu1 %v10746_v26  ;;  %10909 = vmatpush3.bf16.msra.mxu0 %v10908_v63  ;;  %v1425_v26 = vld [vmem:[#allocation6 + $0xb60] sm:$0xff]  ;;  %v1426_v63 = vld [vmem:[#allocation6 + $0xb68] sm:$0xff]  ;;  %v1012_v58 = vmul.f32 %v948_v34, %v756_v23  ;;  %v11979_v36 = vpop.eup %11978  ;;  %v10782_v9 = vpack.c.bf16 %v1336_v47, %v1335_v27  ;;  %v12998_v34 = vadd.f32 %v12824_v5, %v12651_v11 }
 0x264   :  { %10748 = vmatprep.subr.bf16.mxu1 %v12199_v0  ;;  %10910 = vmatprep.subr.bf16.mxu0 %v12199_v0  ;;  %v10917_v6 = vpack.c.bf16 %v1426_v63, %v1425_v26  ;;  %v1446_v23 = vld [vmem:[#allocation6 + $0xc08] sm:$0xff]  ;;  %v1341_v47 = vld [vmem:[#allocation6 + $0x8c0] sm:$0xff] }
 0x265   :  { %v10947_v26 = vpack.c.bf16 %v1446_v23, %v1445_v32  ;;  %v822_v27 = vmul.f32 0.70710677, %v12998_v34  ;;  %v1452_v32 = vld [vmem:[#allocation6 + $0xc38] sm:$0xff] }
 0x267   :  { %10750 = vmatpush3.bf16.msra.mxu1 %v10749_v14  ;;  %10912 = vmatpush3.bf16.msra.mxu0 %v10911_v42  ;;  %v1427_v14 = vld [vmem:[#allocation6 + $0xb70] sm:$0xff]  ;;  %v1428_v42 = vld [vmem:[#allocation6 + $0xb78] sm:$0xff]  ;;  %11980 = verf.f32 %v822_v27 }
 0x268   :  { %10751 = vmatprep.subr.bf16.mxu1 %v12199_v0  ;;  %10913 = vmatprep.subr.bf16.mxu0 %v12199_v0  ;;  %v10920_v10 = vpack.c.bf16 %v1428_v42, %v1427_v14  ;;  %v1342_v14 = vld [vmem:[#allocation6 + $0x8c8] sm:$0xff]  ;;  %v1449_v42 = vld [vmem:[#allocation6 + $0xc20] sm:$0xff] }
 0x269   :  { %v12987_v29 = vpop.f32.mrb[68].mxu0 }
 0x26a   :  { %v8401_v16 = vpop.f32.mrb[69].mxu0 }
 0x26b   :  { %10753 = vmatpush3.bf16.msra.mxu1 %v10752_v1  ;;  %10915 = vmatpush3.bf16.msra.mxu0 %v10914_v43  ;;  %v955_v1 = vadd.f32 1.0, %v11979_v36  ;;  %v1338_v43 = vld [vmem:[#allocation6 + $0x8a8] sm:$0xff]  ;;  %v1340_v16 = vld [vmem:[#allocation6 + $0x8b8] sm:$0xff] }
 0x26c   :  { %10778 = vmatprep.subr.bf16.mxu1 %v12199_v0  ;;  %10916 = vmatprep.subr.bf16.mxu0 %v12199_v0  ;;  %v10785_v18 = vpack.c.bf16 %v1338_v43, %v1337_v20  ;;  %v10788_v11 = vpack.c.bf16 %v1340_v16, %v1339_v40  ;;  %v1450_v36 = vld [vmem:[#allocation6 + $0xc28] sm:$0xff]  ;;  %v1451_v43 = vld [vmem:[#allocation6 + $0xc30] sm:$0xff]  ;;  %v1453_v40 = vld [vmem:[#allocation6 + $0xc40] sm:$0xff] }
 0x26d   :  { %v1019_v63 = vmul.f32 %v955_v1, %v763_v19  ;;  %v10953_v20 = vpack.c.bf16 %v1450_v36, %v1449_v42  ;;  %v1343_v19 = vld [vmem:[#allocation6 + $0x8d0] sm:$0xff]  ;;  %v1344_v1 = vld [vmem:[#allocation6 + $0x8d8] sm:$0xff] }
 0x26e   :  { %8645 = vmatmul.mubr.f32.vlgmr.msra.gmra.mrb[18].mxu1 %v1012_v58  ;;  %v1455_v42 = vld [vmem:[#allocation6 + $0xc50] sm:$0xff]  ;;  %v1456_v36 = vld [vmem:[#allocation6 + $0xc58] sm:$0xff] }
 0x26f   :  { %10780 = vmatpush3.bf16.msra.mxu1 %v10779_v60  ;;  %10918 = vmatpush3.bf16.msra.mxu0 %v10917_v6  ;;  %v1447_v60 = vld [vmem:[#allocation6 + $0xc10] sm:$0xff]  ;;  %v1448_v6 = vld [vmem:[#allocation6 + $0xc18] sm:$0xff] }
 0x270   :  { %10781 = vmatprep.subr.bf16.mxu1 %v12199_v0  ;;  %10919 = vmatprep.subr.bf16.mxu0 %v12199_v0  ;;  %v10950_v58 = vpack.c.bf16 %v1448_v6, %v1447_v60 }
 0x271   :  { %8714 = vmatprep.mubr.msk.f32.mxu1 %vm12200_vm1, %v13899_v7 }
 0x273   :  { %10783 = vmatpush3.bf16.msra.mxu1 %v10782_v9  ;;  %10921 = vmatpush3.bf16.msra.mxu0 %v10920_v10  ;;  %v13009_v9 = vadd.f32 %v12824_v5, %v12730_v50  ;;  %v10791_v10 = vpack.c.bf16 %v1342_v14, %v1341_v47  ;;  %v1345_v50 = vld [vmem:[#allocation6 + $0x8e0] sm:$0xff]  ;;  %v1346_v5 = vld [vmem:[#allocation6 + $0x8e8] sm:$0xff]  ;;  %v1348_v14 = vld [vmem:[#allocation6 + $0x8f8] sm:$0xff] }
 0x274   :  { %10784 = vmatprep.subr.bf16.mxu1 %v12199_v0  ;;  %10946 = vmatprep.subr.bf16.mxu0 %v12199_v0  ;;  %v10797_v27 = vpack.c.bf16 %v1346_v5, %v1345_v50 }
 0x275   :  { %v829_v23 = vmul.f32 0.70710677, %v13009_v9 }
 0x276   :  { %8890 = vmatmul.mubr.f32.vlgmr.msra.gmra.mrb[82].mxu0 %v1019_v63  ;;  %v1454_v63 = vld [vmem:[#allocation6 + $0xc48] sm:$0xff] }
 0x277   :  { %10786 = vmatpush3.bf16.msra.mxu1 %v10785_v18  ;;  %10948 = vmatpush3.bf16.msra.mxu0 %v10947_v26  ;;  %v10794_v18 = vpack.c.bf16 %v1344_v1, %v1343_v19  ;;  %v10956_v26 = vpack.c.bf16 %v1452_v32, %v1451_v43  ;;  %11982 = verf.f32 %v829_v23  ;;  %v1365_v19 = vld [vmem:[#allocation6 + $0x980] sm:$0xff]  ;;  %v758_v1 = vmul.f32 0.5, %v12998_v34  ;;  %v1458_v23 = vld [vmem:[#allocation6 + $0xc68] sm:$0xff]  ;;  %v1368_v34 = vld [vmem:[#allocation6 + $0x998] sm:$0xff] }
 0x278   :  { %10787 = vmatprep.subr.bf16.mxu1 %v12199_v0  ;;  %10949 = vmatprep.subr.bf16.mxu0 %v12199_v0  ;;  %v1457_v32 = vld [vmem:[#allocation6 + $0xc60] sm:$0xff] }
 0x279   :  { %8959 = vmatprep.mubr.msk.f32.mxu0 %vm12200_vm1, %v13899_v7  ;;  %v10965_v5 = vpack.c.bf16 %v1458_v23, %v1457_v32  ;;  %v1372_v32 = vld [vmem:[#allocation6 + $0x9b8] sm:$0xff]  ;;  %v1479_v23 = vld [vmem:[#allocation6 + $0xd10] sm:$0xff] }
 0x27b   :  { %10789 = vmatpush3.bf16.msra.mxu1 %v10788_v11  ;;  %10951 = vmatpush3.bf16.msra.mxu0 %v10950_v58  ;;  %v10959_v11 = vpack.c.bf16 %v1454_v63, %v1453_v40  ;;  %v1347_v58 = vld [vmem:[#allocation6 + $0x8f0] sm:$0xff] }
 0x27c   :  { %10790 = vmatprep.subr.bf16.mxu1 %v12199_v0  ;;  %10952 = vmatprep.subr.bf16.mxu0 %v12199_v0  ;;  %v1367_v40 = vld [vmem:[#allocation6 + $0x990] sm:$0xff] }
 0x27f   :  { %10792 = vmatpush3.bf16.msra.mxu1 %v10791_v10  ;;  %10954 = vmatpush3.bf16.msra.mxu0 %v10953_v20  ;;  %v11981_v10 = vpop.eup %11980  ;;  %v10962_v20 = vpack.c.bf16 %v1456_v36, %v1455_v42  ;;  %v1370_v36 = vld [vmem:[#allocation6 + $0x9a8] sm:$0xff] }
 0x280   :  { %10793 = vmatprep.subr.bf16.mxu1 %v12199_v0  ;;  %10955 = vmatprep.subr.bf16.mxu0 %v12199_v0  ;;  %v950_v43 = vadd.f32 1.0, %v11981_v10  ;;  %v1477_v10 = vld [vmem:[#allocation6 + $0xd00] sm:$0xff] }
 0x281   :  { %v2361_v16 = vpop.f32.mrb[6].mxu1 }
 0x282   :  { %v6567_v60 = vadd.f32 %v12980_v37, %v2361_v16  ;;  %v8226_v6 = vpop.f32.mrb[7].mxu1  ;;  %v10800_v37 = vpack.c.bf16 %v1348_v14, %v1347_v58  ;;  %v1014_v63 = vmul.f32 %v950_v43, %v758_v1  ;;  %v1459_v16 = vld [vmem:[#allocation6 + $0xc70] sm:$0xff]  ;;  %v1369_v58 = vld [vmem:[#allocation6 + $0x9a0] sm:$0xff]  ;;  %v765_v14 = vmul.f32 0.5, %v13009_v9 }
 0x283   :  { %10795 = vmatpush3.bf16.msra.mxu1 %v10794_v18  ;;  %10957 = vmatpush3.bf16.msra.mxu0 %v10956_v26  ;;  %v11983_v6 = vpop.eup %11982  ;;  %v10833_v9 = vpack.c.bf16 %v1370_v36, %v1369_v58  ;;  %v1371_v43 = vld [vmem:[#allocation6 + $0x9b0] sm:$0xff]  ;;  %v1376_v58 = vld [vmem:[#allocation6 + $0x9d8] sm:$0xff] }
 0x284   :  { %v13018_v47 = vadd.f32 %v6567_v60, %v12913_v62  ;;  %10796 = vmatprep.subr.bf16.mxu1 %v12199_v0  ;;  %10958 = vmatprep.subr.bf16.mxu0 %v12199_v0  ;;  %v1366_v62 = vld [vmem:[#allocation6 + $0x988] sm:$0xff]  ;;  %v1460_v60 = vld [vmem:[#allocation6 + $0xc78] sm:$0xff]  ;;  %v957_v42 = vadd.f32 1.0, %v11983_v6 }
 0x285   :  { %v10827_v50 = vpack.c.bf16 %v1366_v62, %v1365_v19 }
 0x286   :  { %v1021_v62 = vmul.f32 %v957_v42, %v765_v14  ;;  %v1483_v14 = vld [vmem:[#allocation6 + $0xd30] sm:$0xff]  ;;  %v1484_v42 = vld [vmem:[#allocation6 + $0xd38] sm:$0xff] }
 0x287   :  { %10798 = vmatpush3.bf16.msra.mxu1 %v10797_v27  ;;  %10960 = vmatpush3.bf16.msra.mxu0 %v10959_v11  ;;  %v10830_v27 = vpack.c.bf16 %v1368_v34, %v1367_v40  ;;  %v10968_v11 = vpack.c.bf16 %v1460_v60, %v1459_v16  ;;  %v1373_v40 = vld [vmem:[#allocation6 + $0x9c0] sm:$0xff]  ;;  %v1482_v16 = vld [vmem:[#allocation6 + $0xd28] sm:$0xff] }
 0x288   :  { %10799 = vmatprep.subr.bf16.mxu1 %v12199_v0  ;;  %10961 = vmatprep.subr.bf16.mxu0 %v12199_v0  ;;  %v1481_v34 = vld [vmem:[#allocation6 + $0xd20] sm:$0xff] }
 0x289   :  { %v13025_v18 = vpop.f32.mrb[70].mxu0 }
 0x28a   :  { %v8471_v26 = vpop.f32.mrb[71].mxu0 }
 0x28b   :  { %10801 = vmatpush3.bf16.msra.mxu1 %v10800_v37  ;;  %10963 = vmatpush3.bf16.msra.mxu0 %v10962_v20  ;;  %v1478_v37 = vld [vmem:[#allocation6 + $0xd08] sm:$0xff]  ;;  %v13034_v20 = vld [vmem:[#allocation4] ss:$0 sm:$0xff] }
 0x28c   :  { %10826 = vmatprep.subr.bf16.mxu1 %v12199_v0  ;;  %10964 = vmatprep.subr.bf16.mxu0 %v12199_v0  ;;  %v13038_v19 = vadd.f32 %v13034_v20, %v12683_v25  ;;  %v10995_v1 = vpack.c.bf16 %v1478_v37, %v1477_v10  ;;  %v1480_v26 = vld [vmem:[#allocation6 + $0xd18] sm:$0xff]  ;;  %v10836_v25 = vpack.c.bf16 %v1372_v32, %v1371_v43  ;;  %v1486_v43 = vld [vmem:[#allocation6 + $0xd48] sm:$0xff] }
 0x28d   :  { %v13049_v60 = vadd.f32 %v13034_v20, %v12736_v55  ;;  %v11004_v37 = vpack.c.bf16 %v1484_v42, %v1483_v14  ;;  %v1377_v55 = vld [vmem:[#allocation6 + $0x9e0] sm:$0xff]  ;;  %v1490_v42 = vld [vmem:[#allocation6 + $0xd68] sm:$0xff] }
 0x28e   :  { %8715 = vmatmul.mubr.f32.vlgmr.msra.gmra.mrb[20].mxu1 %v1014_v63  ;;  %v1374_v63 = vld [vmem:[#allocation6 + $0x9c8] sm:$0xff]  ;;  %v1489_v14 = vld [vmem:[#allocation6 + $0xd60] sm:$0xff] }
 0x28f   :  { %10828 = vmatpush3.bf16.msra.mxu1 %v10827_v50  ;;  %10966 = vmatpush3.bf16.msra.mxu0 %v10965_v5  ;;  %v824_v50 = vmul.f32 0.70710677, %v13038_v19  ;;  %v10998_v5 = vpack.c.bf16 %v1480_v26, %v1479_v23  ;;  %v10839_v6 = vpack.c.bf16 %v1374_v63, %v1373_v40  ;;  %v831_v36 = vmul.f32 0.70710677, %v13049_v60  ;;  %v1380_v40 = vld [vmem:[#allocation6 + $0x9f8] sm:$0xff]  ;;  %v1487_v63 = vld [vmem:[#allocation6 + $0xd50] sm:$0xff] }
 0x290   :  { %10829 = vmatprep.subr.bf16.mxu1 %v12199_v0  ;;  %10967 = vmatprep.subr.bf16.mxu0 %v12199_v0 }
 0x291   :  { %8784 = vmatprep.mubr.msk.f32.mxu1 %vm12200_vm1, %v13899_v7  ;;  %11984 = verf.f32 %v824_v50 }
 0x292   :  { %11986 = verf.f32 %v831_v36 }
 0x293   :  { %10831 = vmatpush3.bf16.msra.mxu1 %v10830_v27  ;;  %10969 = vmatpush3.bf16.msra.mxu0 %v10968_v11  ;;  %v11001_v27 = vpack.c.bf16 %v1482_v16, %v1481_v34  ;;  %v1375_v11 = vld [vmem:[#allocation6 + $0x9d0] sm:$0xff]  ;;  %v1488_v34 = vld [vmem:[#allocation6 + $0xd58] sm:$0xff] }
 0x294   :  { %10832 = vmatprep.subr.bf16.mxu1 %v12199_v0  ;;  %10994 = vmatprep.subr.bf16.mxu0 %v12199_v0  ;;  %v10842_v10 = vpack.c.bf16 %v1376_v58, %v1375_v11  ;;  %v760_v11 = vmul.f32 0.5, %v13038_v19  ;;  %v1400_v19 = vld [vmem:[#allocation6 + $0xa98] sm:$0xff] }
 0x296   :  { %8960 = vmatmul.mubr.f32.vlgmr.msra.gmra.mrb[84].mxu0 %v1021_v62 }
 0x297   :  { %10834 = vmatpush3.bf16.msra.mxu1 %v10833_v9  ;;  %10996 = vmatpush3.bf16.msra.mxu0 %v10995_v1  ;;  %v1378_v9 = vld [vmem:[#allocation6 + $0x9e8] sm:$0xff]  ;;  %v1485_v1 = vld [vmem:[#allocation6 + $0xd40] sm:$0xff] }
 0x298   :  { %10835 = vmatprep.subr.bf16.mxu1 %v12199_v0  ;;  %10997 = vmatprep.subr.bf16.mxu0 %v12199_v0  ;;  %v10845_v26 = vpack.c.bf16 %v1378_v9, %v1377_v55  ;;  %v11007_v50 = vpack.c.bf16 %v1486_v43, %v1485_v1  ;;  %v11013_v55 = vpack.c.bf16 %v1490_v42, %v1489_v14  ;;  %v1399_v9 = vld [vmem:[#allocation6 + $0xa90] sm:$0xff]  ;;  %v1512_v14 = vld [vmem:[#allocation6 + $0xe18] sm:$0xff] }
 0x299   :  { %9029 = vmatprep.mubr.msk.f32.mxu0 %vm12200_vm1, %v13899_v7  ;;  %v1491_v43 = vld [vmem:[#allocation6 + $0xd70] sm:$0xff] }
 0x29b   :  { %10837 = vmatpush3.bf16.msra.mxu1 %v10836_v25  ;;  %10999 = vmatpush3.bf16.msra.mxu0 %v10998_v5  ;;  %v1379_v25 = vld [vmem:[#allocation6 + $0x9f0] sm:$0xff]  ;;  %v11985_v16 = vpop.eup %11984 }
 0x29c   :  { %10838 = vmatprep.subr.bf16.mxu1 %v12199_v0  ;;  %11000 = vmatprep.subr.bf16.mxu0 %v12199_v0  ;;  %v952_v58 = vadd.f32 1.0, %v11985_v16  ;;  %v1510_v16 = vld [vmem:[#allocation6 + $0xe08] sm:$0xff] }
 0x29e   :  { %v1016_v1 = vmul.f32 %v952_v58, %v760_v11  ;;  %v1404_v58 = vld [vmem:[#allocation6 + $0xab8] sm:$0xff] }
 0x29f   :  { %10840 = vmatpush3.bf16.msra.mxu1 %v10839_v6  ;;  %11002 = vmatpush3.bf16.msra.mxu0 %v11001_v27  ;;  %v11010_v6 = vpack.c.bf16 %v1488_v34, %v1487_v63  ;;  %v1397_v27 = vld [vmem:[#allocation6 + $0xa80] sm:$0xff]  ;;  %v1402_v63 = vld [vmem:[#allocation6 + $0xaa8] sm:$0xff] }
 0x2a0   :  { %10841 = vmatprep.subr.bf16.mxu1 %v12199_v0  ;;  %11003 = vmatprep.subr.bf16.mxu0 %v12199_v0  ;;  %v1509_v34 = vld [vmem:[#allocation6 + $0xe00] sm:$0xff] }
 0x2a1   :  { %v2501_v62 = vpop.f32.mrb[8].mxu1 }
 0x2a2   :  { %v6569_v32 = vadd.f32 %v13018_v47, %v2501_v62  ;;  %v8296_v23 = vpop.f32.mrb[9].mxu1  ;;  %v10848_v47 = vpack.c.bf16 %v1380_v40, %v1379_v25  ;;  %v1492_v62 = vld [vmem:[#allocation6 + $0xd78] sm:$0xff]  ;;  %v767_v25 = vmul.f32 0.5, %v13049_v60  ;;  %v1403_v60 = vld [vmem:[#allocation6 + $0xab0] sm:$0xff] }
 0x2a3   :  { %10843 = vmatpush3.bf16.msra.mxu1 %v10842_v10  ;;  %11005 = vmatpush3.bf16.msra.mxu0 %v11004_v37  ;;  %v10878_v23 = vpack.c.bf16 %v1400_v19, %v1399_v9  ;;  %v1513_v9 = vld [vmem:[#allocation6 + $0xe20] sm:$0xff]  ;;  %v13087_v19 = vadd.f32 %v13034_v20, %v12743_v8 }
 0x2a4   :  { %v13058_v5 = vadd.f32 %v6569_v32, %v12950_v54  ;;  %10844 = vmatprep.subr.bf16.mxu1 %v12199_v0  ;;  %11006 = vmatprep.subr.bf16.mxu0 %v12199_v0  ;;  %v1398_v54 = vld [vmem:[#allocation6 + $0xa88] sm:$0xff]  ;;  %v11987_v32 = vpop.eup %11986  ;;  %v1409_v8 = vld [vmem:[#allocation6 + $0xae0] sm:$0xff] }
 0x2a5   :  { %v10875_v37 = vpack.c.bf16 %v1398_v54, %v1397_v27  ;;  %v959_v40 = vadd.f32 1.0, %v11987_v32  ;;  %v11043_v27 = vpack.c.bf16 %v1510_v16, %v1509_v34  ;;  %v1511_v54 = vld [vmem:[#allocation6 + $0xe10] sm:$0xff]  ;;  %v1410_v34 = vld [vmem:[#allocation6 + $0xae8] sm:$0xff]  ;;  %v1517_v16 = vld [vmem:[#allocation6 + $0xe40] sm:$0xff] }
 0x2a6   :  { %v1407_v32 = vld [vmem:[#allocation6 + $0xad0] sm:$0xff] }
 0x2a7   :  { %10846 = vmatpush3.bf16.msra.mxu1 %v10845_v26  ;;  %11008 = vmatpush3.bf16.msra.mxu0 %v11007_v50  ;;  %v11016_v26 = vpack.c.bf16 %v1492_v62, %v1491_v43  ;;  %v1401_v50 = vld [vmem:[#allocation6 + $0xaa0] sm:$0xff]  ;;  %v1023_v11 = vmul.f32 %v959_v40, %v767_v25  ;;  %v833_v25 = vmul.f32 0.70710677, %v13087_v19 }
 0x2a8   :  { %10847 = vmatprep.subr.bf16.mxu1 %v12199_v0  ;;  %11009 = vmatprep.subr.bf16.mxu0 %v12199_v0 }
 0x2a9   :  { %v13065_v36 = vpop.f32.mrb[72].mxu0 }
 0x2aa   :  { %v8541_v10 = vpop.f32.mrb[73].mxu0 }
 0x2ab   :  { %10849 = vmatpush3.bf16.msra.mxu1 %v10848_v47  ;;  %11011 = vmatpush3.bf16.msra.mxu0 %v11010_v6  ;;  %v13076_v47 = vadd.f32 %v13034_v20, %v12707_v22  ;;  %v10881_v6 = vpack.c.bf16 %v1402_v63, %v1401_v50  ;;  %v10884_v22 = vpack.c.bf16 %v1404_v58, %v1403_v60  ;;  %v1516_v50 = vld [vmem:[#allocation6 + $0xe38] sm:$0xff] }
 0x2ac   :  { %10874 = vmatprep.subr.bf16.mxu1 %v12199_v0  ;;  %11012 = vmatprep.subr.bf16.mxu0 %v12199_v0  ;;  %v11046_v10 = vpack.c.bf16 %v1512_v14, %v1511_v54  ;;  %v10893_v58 = vpack.c.bf16 %v1410_v34, %v1409_v8  ;;  %v1411_v14 = vld [vmem:[#allocation6 + $0xaf0] sm:$0xff] }
 0x2ad   :  { %v826_v42 = vmul.f32 0.70710677, %v13076_v47  ;;  %v1523_v34 = vld [vmem:[#allocation6 + $0xe70] sm:$0xff] }
 0x2ae   :  { %8785 = vmatmul.mubr.f32.vlgmr.msra.gmra.mrb[22].mxu1 %v1016_v1  ;;  %v1514_v1 = vld [vmem:[#allocation6 + $0xe28] sm:$0xff] }
 0x2af   :  { %10876 = vmatpush3.bf16.msra.mxu1 %v10875_v37  ;;  %11014 = vmatpush3.bf16.msra.mxu0 %v11013_v55  ;;  %v1405_v37 = vld [vmem:[#allocation6 + $0xac0] sm:$0xff]  ;;  %v1406_v55 = vld [vmem:[#allocation6 + $0xac8] sm:$0xff]  ;;  %11988 = verf.f32 %v826_v42  ;;  %v11049_v62 = vpack.c.bf16 %v1514_v1, %v1513_v9 }
 0x2b0   :  { %10877 = vmatprep.subr.bf16.mxu1 %v12199_v0  ;;  %11015 = vmatprep.subr.bf16.mxu0 %v12199_v0  ;;  %v10887_v43 = vpack.c.bf16 %v1406_v55, %v1405_v37  ;;  %11990 = verf.f32 %v833_v25  ;;  %v1520_v37 = vld [vmem:[#allocation6 + $0xe58] sm:$0xff]  ;;  %v1429_v1 = vld [vmem:[#allocation6 + $0xb80] sm:$0xff] }
 0x2b1   :  { %8854 = vmatprep.mubr.msk.f32.mxu1 %vm12200_vm1, %v13899_v7 }
 0x2b3   :  { %10879 = vmatpush3.bf16.msra.mxu1 %v10878_v23  ;;  %11017 = vmatpush3.bf16.msra.mxu0 %v11016_v26  ;;  %v1408_v23 = vld [vmem:[#allocation6 + $0xad8] sm:$0xff]  ;;  %v1515_v26 = vld [vmem:[#allocation6 + $0xe30] sm:$0xff] }
 0x2b4   :  { %10880 = vmatprep.subr.bf16.mxu1 %v12199_v0  ;;  %11042 = vmatprep.subr.bf16.mxu0 %v12199_v0  ;;  %v10890_v40 = vpack.c.bf16 %v1408_v23, %v1407_v32  ;;  %v11052_v63 = vpack.c.bf16 %v1516_v50, %v1515_v26  ;;  %v1521_v32 = vld [vmem:[#allocation6 + $0xe60] sm:$0xff]  ;;  %v1522_v23 = vld [vmem:[#allocation6 + $0xe68] sm:$0xff] }
 0x2b6   :  { %9030 = vmatmul.mubr.f32.vlgmr.msra.gmra.mrb[86].mxu0 %v1023_v11 }
 0x2b7   :  { %10882 = vmatpush3.bf16.msra.mxu1 %v10881_v6  ;;  %11044 = vmatpush3.bf16.msra.mxu0 %v11043_v27  ;;  %v1518_v6 = vld [vmem:[#allocation6 + $0xe48] sm:$0xff] }
 0x2b8   :  { %10883 = vmatprep.subr.bf16.mxu1 %v12199_v0  ;;  %11045 = vmatprep.subr.bf16.mxu0 %v12199_v0  ;;  %v11055_v54 = vpack.c.bf16 %v1518_v6, %v1517_v16  ;;  %v1524_v16 = vld [vmem:[#allocation6 + $0xe78] sm:$0xff] }
 0x2b9   :  { %9099 = vmatprep.mubr.msk.f32.mxu0 %vm12200_vm1, %v13899_v7  ;;  %v11989_v55 = vpop.eup %11988 }
 0x2ba   :  { %v11991_v6 = vpop.eup %11990 }
 0x2bb   :  { %10885 = vmatpush3.bf16.msra.mxu1 %v10884_v22  ;;  %11047 = vmatpush3.bf16.msra.mxu0 %v11046_v10  ;;  %v1412_v22 = vld [vmem:[#allocation6 + $0xaf8] sm:$0xff]  ;;  %v1519_v10 = vld [vmem:[#allocation6 + $0xe50] sm:$0xff] }
 0x2bc   :  { %10886 = vmatprep.subr.bf16.mxu1 %v12199_v0  ;;  %11048 = vmatprep.subr.bf16.mxu0 %v12199_v0  ;;  %v11058_v9 = vpack.c.bf16 %v1520_v37, %v1519_v10  ;;  %v1542_v10 = vld [vmem:[#allocation6 + $0xf08] sm:$0xff]  ;;  %v13114_v37 = vadd.f32 %v13034_v20, %v12719_v35 }
 0x2bf   :  { %10888 = vmatpush3.bf16.msra.mxu1 %v10887_v43  ;;  %11050 = vmatpush3.bf16.msra.mxu0 %v11049_v62  ;;  %v762_v43 = vmul.f32 0.5, %v13076_v47  ;;  %v954_v62 = vadd.f32 1.0, %v11989_v55  ;;  %v1432_v47 = vld [vmem:[#allocation6 + $0xb98] sm:$0xff] }
 0x2c0   :  { %10889 = vmatprep.subr.bf16.mxu1 %v12199_v0  ;;  %11051 = vmatprep.subr.bf16.mxu0 %v12199_v0 }
 0x2c1   :  { %v2641_v27 = vpop.f32.mrb[10].mxu1  ;;  %v1018_v8 = vmul.f32 %v954_v62, %v762_v43  ;;  %v1543_v43 = vld [vmem:[#allocation6 + $0xf10] sm:$0xff]  ;;  %v1544_v62 = vld [vmem:[#allocation6 + $0xf18] sm:$0xff] }
 0x2c2   :  { %v6571_v60 = vadd.f32 %v13058_v5, %v2641_v27  ;;  %v8366_v11 = vpop.f32.mrb[11].mxu1  ;;  %v10896_v5 = vpack.c.bf16 %v1412_v22, %v1411_v14  ;;  %v1434_v14 = vld [vmem:[#allocation6 + $0xba8] sm:$0xff]  ;;  %v1541_v22 = vld [vmem:[#allocation6 + $0xf00] sm:$0xff] }
 0x2c3   :  { %10891 = vmatpush3.bf16.msra.mxu1 %v10890_v40  ;;  %11053 = vmatpush3.bf16.msra.mxu0 %v11052_v63  ;;  %v11061_v40 = vpack.c.bf16 %v1522_v23, %v1521_v32  ;;  %v1431_v63 = vld [vmem:[#allocation6 + $0xb90] sm:$0xff]  ;;  %v1433_v11 = vld [vmem:[#allocation6 + $0xba0] sm:$0xff]  ;;  %v11094_v32 = vpack.c.bf16 %v1544_v62, %v1543_v43  ;;  %v1444_v62 = vld [vmem:[#allocation6 + $0xbf8] sm:$0xff] }
 0x2c4   :  { %v13096_v42 = vadd.f32 %v6571_v60, %v12987_v29  ;;  %10892 = vmatprep.subr.bf16.mxu1 %v12199_v0  ;;  %11054 = vmatprep.subr.bf16.mxu0 %v12199_v0  ;;  %v1430_v29 = vld [vmem:[#allocation6 + $0xb88] sm:$0xff]  ;;  %v10926_v27 = vpack.c.bf16 %v1432_v47, %v1431_v63  ;;  %v11064_v60 = vpack.c.bf16 %v1524_v16, %v1523_v34  ;;  %v1437_v23 = vld [vmem:[#allocation6 + $0xbc0] sm:$0xff]  ;;  %v1439_v34 = vld [vmem:[#allocation6 + $0xbd0] sm:$0xff] }
 0x2c5   :  { %v10923_v25 = vpack.c.bf16 %v1430_v29, %v1429_v1  ;;  %v10929_v55 = vpack.c.bf16 %v1434_v14, %v1433_v11  ;;  %v1436_v1 = vld [vmem:[#allocation6 + $0xbb8] sm:$0xff]  ;;  %v828_v29 = vmul.f32 0.70710677, %v13114_v37  ;;  %v13125_v63 = vadd.f32 %v13034_v20, %v12750_v24  ;;  %v1441_v24 = vld [vmem:[#allocation6 + $0xbe0] sm:$0xff] }
 0x2c6   :  { %v1440_v16 = vld [vmem:[#allocation6 + $0xbd8] sm:$0xff]  ;;  %v1549_v14 = vld [vmem:[#allocation6 + $0xf40] sm:$0xff] }
 0x2c7   :  { %10894 = vmatpush3.bf16.msra.mxu1 %v10893_v58  ;;  %11056 = vmatpush3.bf16.msra.mxu0 %v11055_v54  ;;  %v769_v58 = vmul.f32 0.5, %v13087_v19  ;;  %v961_v54 = vadd.f32 1.0, %v11991_v6  ;;  %v1435_v19 = vld [vmem:[#allocation6 + $0xbb0] sm:$0xff]  ;;  %11992 = verf.f32 %v828_v29  ;;  %v10938_v11 = vpack.c.bf16 %v1440_v16, %v1439_v34 }
 0x2c8   :  { %10895 = vmatprep.subr.bf16.mxu1 %v12199_v0  ;;  %11057 = vmatprep.subr.bf16.mxu0 %v12199_v0  ;;  %v10932_v35 = vpack.c.bf16 %v1436_v1, %v1435_v19  ;;  %v1547_v6 = vld [vmem:[#allocation6 + $0xf30] sm:$0xff] }
 0x2c9   :  { %v13103_v26 = vpop.f32.mrb[74].mxu0  ;;  %v1443_v1 = vld [vmem:[#allocation6 + $0xbf0] sm:$0xff] }
 0x2ca   :  { %v8611_v50 = vpop.f32.mrb[75].mxu0  ;;  %v1551_v29 = vld [vmem:[#allocation6 + $0xf50] sm:$0xff] }
 0x2cb   :  { %10897 = vmatpush3.bf16.msra.mxu1 %v10896_v5  ;;  %11059 = vmatpush3.bf16.msra.mxu0 %v11058_v9  ;;  %v11091_v5 = vpack.c.bf16 %v1542_v10, %v1541_v22  ;;  %v1025_v9 = vmul.f32 %v961_v54, %v769_v58  ;;  %v1438_v50 = vld [vmem:[#allocation6 + $0xbc8] sm:$0xff] }
 0x2cc   :  { %10922 = vmatprep.subr.bf16.mxu1 %v12199_v0  ;;  %11060 = vmatprep.subr.bf16.mxu0 %v12199_v0  ;;  %v1442_v54 = vld [vmem:[#allocation6 + $0xbe8] sm:$0xff] }
 0x2cd   :  { %v1550_v22 = vld [vmem:[#allocation6 + $0xf48] sm:$0xff]  ;;  %v10941_v19 = vpack.c.bf16 %v1442_v54, %v1441_v24  ;;  %v1556_v24 = vld [vmem:[#allocation6 + $0xf78] sm:$0xff] }
 0x2ce   :  { %8855 = vmatmul.mubr.f32.vlgmr.msra.gmra.mrb[24].mxu1 %v1018_v8  ;;  %v10935_v8 = vpack.c.bf16 %v1438_v50, %v1437_v23  ;;  %v1461_v50 = vld [vmem:[#allocation6 + $0xc80] sm:$0xff] }
 0x2cf   :  { %10924 = vmatpush3.bf16.msra.mxu1 %v10923_v25  ;;  %11062 = vmatpush3.bf16.msra.mxu0 %v11061_v40  ;;  %v1545_v25 = vld [vmem:[#allocation6 + $0xf20] sm:$0xff]  ;;  %v1546_v40 = vld [vmem:[#allocation6 + $0xf28] sm:$0xff] }
 0x2d0   :  { %10925 = vmatprep.subr.bf16.mxu1 %v12199_v0  ;;  %11063 = vmatprep.subr.bf16.mxu0 %v12199_v0  ;;  %v11097_v47 = vpack.c.bf16 %v1546_v40, %v1545_v25  ;;  %v764_v25 = vmul.f32 0.5, %v13114_v37  ;;  %v1464_v37 = vld [vmem:[#allocation6 + $0xc98] sm:$0xff] }
 0x2d1   :  { %8924 = vmatprep.mubr.msk.f32.mxu1 %vm12200_vm1, %v13899_v7 }
 0x2d3   :  { %10927 = vmatpush3.bf16.msra.mxu1 %v10926_v27  ;;  %11065 = vmatpush3.bf16.msra.mxu0 %v11064_v60  ;;  %v1548_v27 = vld [vmem:[#allocation6 + $0xf38] sm:$0xff]  ;;  %v835_v60 = vmul.f32 0.70710677, %v13125_v63 }
 0x2d4   :  { %10928 = vmatprep.subr.bf16.mxu1 %v12199_v0  ;;  %11090 = vmatprep.subr.bf16.mxu0 %v12199_v0  ;;  %v11100_v58 = vpack.c.bf16 %v1548_v27, %v1547_v6 }
 0x2d5   :  { %11994 = verf.f32 %v835_v60  ;;  %v1463_v60 = vld [vmem:[#allocation6 + $0xc90] sm:$0xff] }
 0x2d6   :  { %9100 = vmatmul.mubr.f32.vlgmr.msra.gmra.mrb[88].mxu0 %v1025_v9  ;;  %v11103_v9 = vpack.c.bf16 %v1550_v22, %v1549_v14  ;;  %v10974_v14 = vpack.c.bf16 %v1464_v37, %v1463_v60  ;;  %v1472_v37 = vld [vmem:[#allocation6 + $0xcd8] sm:$0xff] }
 0x2d7   :  { %10930 = vmatpush3.bf16.msra.mxu1 %v10929_v55  ;;  %11092 = vmatpush3.bf16.msra.mxu0 %v11091_v5 }
 0x2d8   :  { %10931 = vmatprep.subr.bf16.mxu1 %v12199_v0  ;;  %11093 = vmatprep.subr.bf16.mxu0 %v12199_v0 }
 0x2d9   :  { %9169 = vmatprep.mubr.msk.f32.mxu0 %vm12200_vm1, %v13899_v7 }
 0x2db   :  { %10933 = vmatpush3.bf16.msra.mxu1 %v10932_v35  ;;  %11095 = vmatpush3.bf16.msra.mxu0 %v11094_v32  ;;  %v1552_v35 = vld [vmem:[#allocation6 + $0xf58] sm:$0xff]  ;;  %v11993_v32 = vpop.eup %11992 }
 0x2dc   :  { %10934 = vmatprep.subr.bf16.mxu1 %v12199_v0  ;;  %11096 = vmatprep.subr.bf16.mxu0 %v12199_v0  ;;  %v11106_v23 = vpack.c.bf16 %v1552_v35, %v1551_v29  ;;  %v956_v40 = vadd.f32 1.0, %v11993_v32 }
 0x2df   :  { %10936 = vmatpush3.bf16.msra.mxu1 %v10935_v8  ;;  %11098 = vmatpush3.bf16.msra.mxu0 %v11097_v47  ;;  %v1553_v8 = vld [vmem:[#allocation6 + $0xf60] sm:$0xff]  ;;  %v1554_v47 = vld [vmem:[#allocation6 + $0xf68] sm:$0xff]  ;;  %v11995_v54 = vpop.eup %11994 }
 0x2e0   :  { %10937 = vmatprep.subr.bf16.mxu1 %v12199_v0  ;;  %11099 = vmatprep.subr.bf16.mxu0 %v12199_v0  ;;  %v11109_v27 = vpack.c.bf16 %v1554_v47, %v1553_v8  ;;  %v1470_v8 = vld [vmem:[#allocation6 + $0xcc8] sm:$0xff]  ;;  %v1577_v47 = vld [vmem:[#allocation6 + $0x1020] sm:$0xff] }
 0x2e1   :  { %v2781_v10 = vpop.f32.mrb[12].mxu1 }
 0x2e2   :  { %v6573_v55 = vadd.f32 %v13096_v42, %v2781_v10  ;;  %v8436_v5 = vpop.f32.mrb[13].mxu1  ;;  %v10944_v42 = vpack.c.bf16 %v1444_v62, %v1443_v1  ;;  %v1465_v10 = vld [vmem:[#allocation6 + $0xca0] sm:$0xff]  ;;  %v1574_v1 = vld [vmem:[#allocation6 + $0x1008] sm:$0xff]  ;;  %v13152_v62 = vadd.f32 %v13034_v20, %v12728_v46 }
 0x2e3   :  { %10939 = vmatpush3.bf16.msra.mxu1 %v10938_v11  ;;  %11101 = vmatpush3.bf16.msra.mxu0 %v11100_v58  ;;  %v1020_v11 = vmul.f32 %v956_v40, %v764_v25  ;;  %v1555_v58 = vld [vmem:[#allocation6 + $0xf70] sm:$0xff]  ;;  %v963_v5 = vadd.f32 1.0, %v11995_v54 }
 0x2e4   :  { %v13134_v43 = vadd.f32 %v6573_v55, %v13025_v18  ;;  %10940 = vmatprep.subr.bf16.mxu1 %v12199_v0  ;;  %11102 = vmatprep.subr.bf16.mxu0 %v12199_v0  ;;  %v1462_v18 = vld [vmem:[#allocation6 + $0xc88] sm:$0xff]  ;;  %v11112_v22 = vpack.c.bf16 %v1556_v24, %v1555_v58  ;;  %v771_v55 = vmul.f32 0.5, %v13125_v63  ;;  %v1467_v63 = vld [vmem:[#allocation6 + $0xcb0] sm:$0xff]  ;;  %v830_v25 = vmul.f32 0.70710677, %v13152_v62  ;;  %v1580_v24 = vld [vmem:[#allocation6 + $0x1038] sm:$0xff] }
 0x2e5   :  { %v10971_v6 = vpack.c.bf16 %v1462_v18, %v1461_v50  ;;  %v1576_v50 = vld [vmem:[#allocation6 + $0x1018] sm:$0xff]  ;;  %v1469_v18 = vld [vmem:[#allocation6 + $0xcc0] sm:$0xff]  ;;  %v1579_v58 = vld [vmem:[#allocation6 + $0x1030] sm:$0xff] }
 0x2e6   :  { %v1027_v32 = vmul.f32 %v963_v5, %v771_v55  ;;  %11996 = verf.f32 %v830_v25  ;;  %v1581_v55 = vld [vmem:[#allocation6 + $0x1040] sm:$0xff]  ;;  %v1582_v5 = vld [vmem:[#allocation6 + $0x1048] sm:$0xff] }
 0x2e7   :  { %10942 = vmatpush3.bf16.msra.mxu1 %v10941_v19  ;;  %11104 = vmatpush3.bf16.msra.mxu0 %v11103_v9  ;;  %v1466_v19 = vld [vmem:[#allocation6 + $0xca8] sm:$0xff]  ;;  %v1573_v9 = vld [vmem:[#allocation6 + $0x1000] sm:$0xff] }
 0x2e8   :  { %10943 = vmatprep.subr.bf16.mxu1 %v12199_v0  ;;  %11105 = vmatprep.subr.bf16.mxu0 %v12199_v0  ;;  %v10977_v29 = vpack.c.bf16 %v1466_v19, %v1465_v10  ;;  %v11139_v35 = vpack.c.bf16 %v1574_v1, %v1573_v9  ;;  %v1474_v10 = vld [vmem:[#allocation6 + $0xce8] sm:$0xff] }
 0x2e9   :  { %v13141_v34 = vpop.f32.mrb[76].mxu0 }
 0x2ea   :  { %v8681_v16 = vpop.f32.mrb[77].mxu0 }
 0x2eb   :  { %10945 = vmatpush3.bf16.msra.mxu1 %v10944_v42  ;;  %11107 = vmatpush3.bf16.msra.mxu0 %v11106_v23  ;;  %v1468_v42 = vld [vmem:[#allocation6 + $0xcb8] sm:$0xff]  ;;  %v1575_v23 = vld [vmem:[#allocation6 + $0x1010] sm:$0xff]  ;;  %v1578_v16 = vld [vmem:[#allocation6 + $0x1028] sm:$0xff] }
 0x2ec   :  { %10970 = vmatprep.subr.bf16.mxu1 %v12199_v0  ;;  %11108 = vmatprep.subr.bf16.mxu0 %v12199_v0  ;;  %v10980_v46 = vpack.c.bf16 %v1468_v42, %v1467_v63  ;;  %v11142_v40 = vpack.c.bf16 %v1576_v50, %v1575_v23  ;;  %v11145_v60 = vpack.c.bf16 %v1578_v16, %v1577_v47  ;;  %v1475_v63 = vld [vmem:[#allocation6 + $0xcf0] sm:$0xff]  ;;  %v1476_v42 = vld [vmem:[#allocation6 + $0xcf8] sm:$0xff]  ;;  %v1585_v47 = vld [vmem:[#allocation6 + $0x1060] sm:$0xff] }
 0x2ed   :  { %v1583_v23 = vld [vmem:[#allocation6 + $0x1050] sm:$0xff]  ;;  %v1584_v50 = vld [vmem:[#allocation6 + $0x1058] sm:$0xff]  ;;  %v1586_v16 = vld [vmem:[#allocation6 + $0x1068] sm:$0xff] }
 0x2ee   :  { %8925 = vmatmul.mubr.f32.vlgmr.msra.gmra.mrb[26].mxu1 %v1020_v11  ;;  %v1471_v11 = vld [vmem:[#allocation6 + $0xcd0] sm:$0xff] }
 0x2ef   :  { %10972 = vmatpush3.bf16.msra.mxu1 %v10971_v6  ;;  %11110 = vmatpush3.bf16.msra.mxu0 %v11109_v27  ;;  %v13163_v6 = vadd.f32 %v13034_v20, %v12756_v39  ;;  %v10983_v27 = vpack.c.bf16 %v1470_v8, %v1469_v18  ;;  %v1473_v39 = vld [vmem:[#allocation6 + $0xce0] sm:$0xff]  ;;  %v766_v18 = vmul.f32 0.5, %v13152_v62  ;;  %v1496_v62 = vld [vmem:[#allocation6 + $0xd98] sm:$0xff] }
 0x2f0   :  { %10973 = vmatprep.subr.bf16.mxu1 %v12199_v0  ;;  %11111 = vmatprep.subr.bf16.mxu0 %v12199_v0  ;;  %v11997_v25 = vpop.eup %11996 }
 0x2f1   :  { %8994 = vmatprep.mubr.msk.f32.mxu1 %vm12200_vm1, %v13899_v7  ;;  %v837_v54 = vmul.f32 0.70710677, %v13163_v6  ;;  %v958_v8 = vadd.f32 1.0, %v11997_v25  ;;  %v1607_v25 = vld [vmem:[#allocation6 + $0x1110] sm:$0xff] }
 0x2f3   :  { %10975 = vmatpush3.bf16.msra.mxu1 %v10974_v14  ;;  %11113 = vmatpush3.bf16.msra.mxu0 %v11112_v22  ;;  %v10986_v14 = vpack.c.bf16 %v1472_v37, %v1471_v11  ;;  %v11148_v22 = vpack.c.bf16 %v1580_v24, %v1579_v58  ;;  %11998 = verf.f32 %v837_v54  ;;  %v11157_v37 = vpack.c.bf16 %v1586_v16, %v1585_v47  ;;  %v1495_v58 = vld [vmem:[#allocation6 + $0xd90] sm:$0xff]  ;;  %v1610_v47 = vld [vmem:[#allocation6 + $0x1128] sm:$0xff] }
 0x2f4   :  { %10976 = vmatprep.subr.bf16.mxu1 %v12199_v0  ;;  %11138 = vmatprep.subr.bf16.mxu0 %v12199_v0  ;;  %v1022_v24 = vmul.f32 %v958_v8, %v766_v18  ;;  %v1587_v54 = vld [vmem:[#allocation6 + $0x1070] sm:$0xff]  ;;  %v1501_v18 = vld [vmem:[#allocation6 + $0xdc0] sm:$0xff]  ;;  %v1502_v8 = vld [vmem:[#allocation6 + $0xdc8] sm:$0xff]  ;;  %v13201_v16 = vadd.f32 %v13034_v20, %v12768_v51 }
 0x2f5   :  { %v1505_v51 = vld [vmem:[#allocation6 + $0xde0] sm:$0xff] }
 0x2f6   :  { %9170 = vmatmul.mubr.f32.vlgmr.msra.gmra.mrb[90].mxu0 %v1027_v32 }
 0x2f7   :  { %10978 = vmatpush3.bf16.msra.mxu1 %v10977_v29  ;;  %11140 = vmatpush3.bf16.msra.mxu0 %v11139_v35  ;;  %v10989_v29 = vpack.c.bf16 %v1474_v10, %v1473_v39  ;;  %v11151_v35 = vpack.c.bf16 %v1582_v5, %v1581_v55  ;;  %v11022_v39 = vpack.c.bf16 %v1496_v62, %v1495_v58  ;;  %v1497_v55 = vld [vmem:[#allocation6 + $0xda0] sm:$0xff]  ;;  %v773_v5 = vmul.f32 0.5, %v13163_v6  ;;  %v1499_v6 = vld [vmem:[#allocation6 + $0xdb0] sm:$0xff]  ;;  %v1504_v58 = vld [vmem:[#allocation6 + $0xdd8] sm:$0xff] }
 0x2f8   :  { %10979 = vmatprep.subr.bf16.mxu1 %v12199_v0  ;;  %11141 = vmatprep.subr.bf16.mxu0 %v12199_v0  ;;  %v1612_v62 = vld [vmem:[#allocation6 + $0x1138] sm:$0xff] }
 0x2f9   :  { %9239 = vmatprep.mubr.msk.f32.mxu0 %vm12200_vm1, %v13899_v7 }
 0x2fb   :  { %10981 = vmatpush3.bf16.msra.mxu1 %v10980_v46  ;;  %11143 = vmatpush3.bf16.msra.mxu0 %v11142_v40  ;;  %v11154_v46 = vpack.c.bf16 %v1584_v50, %v1583_v23  ;;  %v1493_v40 = vld [vmem:[#allocation6 + $0xd80] sm:$0xff]  ;;  %v1500_v50 = vld [vmem:[#allocation6 + $0xdb8] sm:$0xff] }
 0x2fc   :  { %10982 = vmatprep.subr.bf16.mxu1 %v12199_v0  ;;  %11144 = vmatprep.subr.bf16.mxu0 %v12199_v0 }
 0x2ff   :  { %10984 = vmatpush3.bf16.msra.mxu1 %v10983_v27  ;;  %11146 = vmatpush3.bf16.msra.mxu0 %v11145_v60 }
 0x300   :  { %10985 = vmatprep.subr.bf16.mxu1 %v12199_v0  ;;  %11147 = vmatprep.subr.bf16.mxu0 %v12199_v0 }
 0x301   :  { %v2921_v19 = vpop.f32.mrb[14].mxu1 }
 0x302   :  { %v6575_v9 = vadd.f32 %v13134_v43, %v2921_v19  ;;  %v8506_v1 = vpop.f32.mrb[15].mxu1  ;;  %v10992_v43 = vpack.c.bf16 %v1476_v42, %v1475_v63 }
 0x303   :  { %10987 = vmatpush3.bf16.msra.mxu1 %v10986_v14  ;;  %11149 = vmatpush3.bf16.msra.mxu0 %v11148_v22  ;;  %v1588_v14 = vld [vmem:[#allocation6 + $0x1078] sm:$0xff]  ;;  %v11999_v22 = vpop.eup %11998  ;;  %v1605_v1 = vld [vmem:[#allocation6 + $0x1100] sm:$0xff] }
 0x304   :  { %v13172_v32 = vadd.f32 %v6575_v9, %v13065_v36  ;;  %10988 = vmatprep.subr.bf16.mxu1 %v12199_v0  ;;  %11150 = vmatprep.subr.bf16.mxu0 %v12199_v0  ;;  %v1494_v36 = vld [vmem:[#allocation6 + $0xd88] sm:$0xff]  ;;  %v11160_v10 = vpack.c.bf16 %v1588_v14, %v1587_v54  ;;  %v965_v19 = vadd.f32 1.0, %v11999_v22  ;;  %v839_v54 = vmul.f32 0.70710677, %v13201_v16 }
 0x305   :  { %v11019_v11 = vpack.c.bf16 %v1494_v36, %v1493_v40  ;;  %v1498_v9 = vld [vmem:[#allocation6 + $0xda8] sm:$0xff]  ;;  %v1609_v36 = vld [vmem:[#allocation6 + $0x1120] sm:$0xff] }
 0x306   :  { %v11025_v63 = vpack.c.bf16 %v1498_v9, %v1497_v55  ;;  %v1029_v23 = vmul.f32 %v965_v19, %v773_v5 }
 0x307   :  { %10990 = vmatpush3.bf16.msra.mxu1 %v10989_v29  ;;  %11152 = vmatpush3.bf16.msra.mxu0 %v11151_v35  ;;  %v1606_v29 = vld [vmem:[#allocation6 + $0x1108] sm:$0xff]  ;;  %v13190_v35 = vadd.f32 %v13034_v20, %v12734_v53  ;;  %v11028_v53 = vpack.c.bf16 %v1500_v50, %v1499_v6  ;;  %v1616_v6 = vld [vmem:[#allocation6 + $0x1158] sm:$0xff] }
 0x308   :  { %10991 = vmatprep.subr.bf16.mxu1 %v12199_v0  ;;  %11153 = vmatprep.subr.bf16.mxu0 %v12199_v0  ;;  %v11187_v42 = vpack.c.bf16 %v1606_v29, %v1605_v1  ;;  %v1506_v20 = vld [vmem:[#allocation6 + $0xde8] sm:$0xff]  ;;  %v1507_v29 = vld [vmem:[#allocation6 + $0xdf0] sm:$0xff] }
 0x309   :  { %v13179_v27 = vpop.f32.mrb[78].mxu0  ;;  %v11037_v9 = vpack.c.bf16 %v1506_v20, %v1505_v51  ;;  %v775_v51 = vmul.f32 0.5, %v13201_v16 }
 0x30a   :  { %v8751_v60 = vpop.f32.mrb[79].mxu0 }
 0x30b   :  { %10993 = vmatpush3.bf16.msra.mxu1 %v10992_v43  ;;  %11155 = vmatpush3.bf16.msra.mxu0 %v11154_v46  ;;  %v1608_v43 = vld [vmem:[#allocation6 + $0x1118] sm:$0xff]  ;;  %v832_v46 = vmul.f32 0.70710677, %v13190_v35  ;;  %v11031_v60 = vpack.c.bf16 %v1502_v8, %v1501_v18  ;;  %v1617_v18 = vld [vmem:[#allocation6 + $0x1160] sm:$0xff]  ;;  %v1618_v8 = vld [vmem:[#allocation6 + $0x1168] sm:$0xff] }
 0x30c   :  { %11018 = vmatprep.subr.bf16.mxu1 %v12199_v0  ;;  %11156 = vmatprep.subr.bf16.mxu0 %v12199_v0  ;;  %v11190_v40 = vpack.c.bf16 %v1608_v43, %v1607_v25  ;;  %v1525_v43 = vld [vmem:[#allocation6 + $0xe80] sm:$0xff] }
 0x30d   :  { %12000 = verf.f32 %v832_v46  ;;  %v768_v46 = vmul.f32 0.5, %v13190_v35  ;;  %v1528_v35 = vld [vmem:[#allocation6 + $0xe98] sm:$0xff] }
 0x30e   :  { %8995 = vmatmul.mubr.f32.vlgmr.msra.gmra.mrb[28].mxu1 %v1022_v24  ;;  %v1611_v24 = vld [vmem:[#allocation6 + $0x1130] sm:$0xff]  ;;  %12002 = verf.f32 %v839_v54 }
 0x30f   :  { %11020 = vmatpush3.bf16.msra.mxu1 %v11019_v11  ;;  %11158 = vmatpush3.bf16.msra.mxu0 %v11157_v37  ;;  %v11193_v11 = vpack.c.bf16 %v1610_v47, %v1609_v36  ;;  %v1503_v37 = vld [vmem:[#allocation6 + $0xdd0] sm:$0xff]  ;;  %v11196_v22 = vpack.c.bf16 %v1612_v62, %v1611_v24  ;;  %v1620_v24 = vld [vmem:[#allocation6 + $0x1178] sm:$0xff] }
 0x310   :  { %11021 = vmatprep.subr.bf16.mxu1 %v12199_v0  ;;  %11159 = vmatprep.subr.bf16.mxu0 %v12199_v0  ;;  %v11034_v14 = vpack.c.bf16 %v1504_v58, %v1503_v37  ;;  %v1619_v58 = vld [vmem:[#allocation6 + $0x1170] sm:$0xff] }
 0x311   :  { %9064 = vmatprep.mubr.msk.f32.mxu1 %vm12200_vm1, %v13899_v7 }
 0x313   :  { %11023 = vmatpush3.bf16.msra.mxu1 %v11022_v39  ;;  %11161 = vmatpush3.bf16.msra.mxu0 %v11160_v10  ;;  %v1613_v39 = vld [vmem:[#allocation6 + $0x1140] sm:$0xff]  ;;  %v1614_v10 = vld [vmem:[#allocation6 + $0x1148] sm:$0xff] }
 0x314   :  { %11024 = vmatprep.subr.bf16.mxu1 %v12199_v0  ;;  %11186 = vmatprep.subr.bf16.mxu0 %v12199_v0  ;;  %v11199_v1 = vpack.c.bf16 %v1614_v10, %v1613_v39  ;;  %v1530_v39 = vld [vmem:[#allocation6 + $0xea8] sm:$0xff]  ;;  %v1637_v10 = vld [vmem:[#allocation6 + $0x1200] sm:$0xff] }
 0x316   :  { %9240 = vmatmul.mubr.f32.vlgmr.msra.gmra.mrb[92].mxu0 %v1029_v23 }
 0x317   :  { %11026 = vmatpush3.bf16.msra.mxu1 %v11025_v63  ;;  %11188 = vmatpush3.bf16.msra.mxu0 %v11187_v42  ;;  %v1508_v63 = vld [vmem:[#allocation6 + $0xdf8] sm:$0xff]  ;;  %v1615_v42 = vld [vmem:[#allocation6 + $0x1150] sm:$0xff]  ;;  %v12001_v50 = vpop.eup %12000 }
 0x318   :  { %11027 = vmatprep.subr.bf16.mxu1 %v12199_v0  ;;  %11189 = vmatprep.subr.bf16.mxu0 %v12199_v0  ;;  %v11202_v25 = vpack.c.bf16 %v1616_v6, %v1615_v42  ;;  %v12003_v62 = vpop.eup %12002  ;;  %v1639_v42 = vld [vmem:[#allocation6 + $0x1210] sm:$0xff]  ;;  %v1640_v6 = vld [vmem:[#allocation6 + $0x1218] sm:$0xff] }
 0x319   :  { %9309 = vmatprep.mubr.msk.f32.mxu0 %vm12200_vm1, %v13899_v7  ;;  %v967_v20 = vadd.f32 1.0, %v12003_v62  ;;  %v1645_v62 = vld [vmem:[#allocation6 + $0x1240] sm:$0xff] }
 0x31b   :  { %11029 = vmatpush3.bf16.msra.mxu1 %v11028_v53  ;;  %11191 = vmatpush3.bf16.msra.mxu0 %v11190_v40  ;;  %v960_v53 = vadd.f32 1.0, %v12001_v50  ;;  %v1526_v40 = vld [vmem:[#allocation6 + $0xe88] sm:$0xff] }
 0x31c   :  { %11030 = vmatprep.subr.bf16.mxu1 %v12199_v0  ;;  %11192 = vmatprep.subr.bf16.mxu0 %v12199_v0  ;;  %v11067_v47 = vpack.c.bf16 %v1526_v40, %v1525_v43  ;;  %v1534_v43 = vld [vmem:[#allocation6 + $0xec8] sm:$0xff] }
 0x31d   :  { %v1024_v37 = vmul.f32 %v960_v53, %v768_v46  ;;  %v1641_v46 = vld [vmem:[#allocation6 + $0x1220] sm:$0xff]  ;;  %v1642_v53 = vld [vmem:[#allocation6 + $0x1228] sm:$0xff] }
 0x31f   :  { %11032 = vmatpush3.bf16.msra.mxu1 %v11031_v60  ;;  %11194 = vmatpush3.bf16.msra.mxu0 %v11193_v11  ;;  %v11205_v60 = vpack.c.bf16 %v1618_v8, %v1617_v18  ;;  %v1527_v11 = vld [vmem:[#allocation6 + $0xe90] sm:$0xff]  ;;  %v11241_v8 = vpack.c.bf16 %v1642_v53, %v1641_v46 }
 0x320   :  { %11033 = vmatprep.subr.bf16.mxu1 %v12199_v0  ;;  %11195 = vmatprep.subr.bf16.mxu0 %v12199_v0  ;;  %v11070_v54 = vpack.c.bf16 %v1528_v35, %v1527_v11  ;;  %v1644_v11 = vld [vmem:[#allocation6 + $0x1238] sm:$0xff] }
 0x321   :  { %v3061_v55 = vpop.f32.mrb[16].mxu1 }
 0x322   :  { %v6577_v5 = vadd.f32 %v13172_v32, %v3061_v55  ;;  %v8576_v19 = vpop.f32.mrb[17].mxu1  ;;  %v11040_v32 = vpack.c.bf16 %v1508_v63, %v1507_v29  ;;  %v1638_v55 = vld [vmem:[#allocation6 + $0x1208] sm:$0xff]  ;;  %v1031_v29 = vmul.f32 %v967_v20, %v775_v51  ;;  %v1532_v63 = vld [vmem:[#allocation6 + $0xeb8] sm:$0xff] }
 0x323   :  { %11035 = vmatpush3.bf16.msra.mxu1 %v11034_v14  ;;  %11197 = vmatpush3.bf16.msra.mxu0 %v11196_v22  ;;  %v11208_v14 = vpack.c.bf16 %v1620_v24, %v1619_v58  ;;  %v1529_v22 = vld [vmem:[#allocation6 + $0xea0] sm:$0xff]  ;;  %v1538_v24 = vld [vmem:[#allocation6 + $0xee8] sm:$0xff] }
 0x324   :  { %11036 = vmatprep.subr.bf16.mxu1 %v12199_v0  ;;  %11198 = vmatprep.subr.bf16.mxu0 %v12199_v0  ;;  %v13212_v23 = vadd.f32 %v6577_v5, %v13103_v26  ;;  %v13226_v5 = vld [vmem:[#allocation4] ss:$0 sm:$0xff]  ;;  %v11073_v16 = vpack.c.bf16 %v1530_v39, %v1529_v22 }
 0x325   :  { %v13230_v19 = vadd.f32 %v13226_v5, %v12738_v61  ;;  %v13241_v40 = vadd.f32 %v13226_v5, %v12775_v4  ;;  %v1537_v4 = vld [vmem:[#allocation6 + $0xee0] sm:$0xff] }
 0x326   :  { %v11085_v20 = vpack.c.bf16 %v1538_v24, %v1537_v4  ;;  %v1562_v24 = vld [vmem:[#allocation6 + $0xfa8] sm:$0xff] }
 0x327   :  { %11038 = vmatpush3.bf16.msra.mxu1 %v11037_v9  ;;  %11200 = vmatpush3.bf16.msra.mxu0 %v11199_v1  ;;  %v11235_v9 = vpack.c.bf16 %v1638_v55, %v1637_v10  ;;  %v1531_v1 = vld [vmem:[#allocation6 + $0xeb0] sm:$0xff]  ;;  %v834_v50 = vmul.f32 0.70710677, %v13230_v19  ;;  %v1540_v55 = vld [vmem:[#allocation6 + $0xef8] sm:$0xff] }
 0x328   :  { %11039 = vmatprep.subr.bf16.mxu1 %v12199_v0  ;;  %11201 = vmatprep.subr.bf16.mxu0 %v12199_v0  ;;  %v11076_v61 = vpack.c.bf16 %v1532_v63, %v1531_v1  ;;  %v1539_v10 = vld [vmem:[#allocation6 + $0xef0] sm:$0xff] }
 0x329   :  { %v13217_v36 = vpop.f32.mrb[80].mxu0  ;;  %12004 = verf.f32 %v834_v50 }
 0x32a   :  { %v8821_v26 = vpop.f32.mrb[81].mxu0 }
 0x32b   :  { %11041 = vmatpush3.bf16.msra.mxu1 %v11040_v32  ;;  %11203 = vmatpush3.bf16.msra.mxu0 %v11202_v25  ;;  %v11238_v32 = vpack.c.bf16 %v1640_v6, %v1639_v42  ;;  %v1533_v25 = vld [vmem:[#allocation6 + $0xec0] sm:$0xff]  ;;  %v1535_v26 = vld [vmem:[#allocation6 + $0xed0] sm:$0xff]  ;;  %v770_v6 = vmul.f32 0.5, %v13230_v19  ;;  %v1560_v19 = vld [vmem:[#allocation6 + $0xf98] sm:$0xff] }
 0x32c   :  { %11066 = vmatprep.subr.bf16.mxu1 %v12199_v0  ;;  %11204 = vmatprep.subr.bf16.mxu0 %v12199_v0  ;;  %v11079_v18 = vpack.c.bf16 %v1534_v43, %v1533_v25  ;;  %v1557_v42 = vld [vmem:[#allocation6 + $0xf80] sm:$0xff]  ;;  %v1650_v25 = vld [vmem:[#allocation6 + $0x1268] sm:$0xff] }
 0x32e   :  { %9065 = vmatmul.mubr.f32.vlgmr.msra.gmra.mrb[30].mxu1 %v1024_v37  ;;  %v841_v37 = vmul.f32 0.70710677, %v13241_v40 }
 0x32f   :  { %11068 = vmatpush3.bf16.msra.mxu1 %v11067_v47  ;;  %11206 = vmatpush3.bf16.msra.mxu0 %v11205_v60  ;;  %v1536_v47 = vld [vmem:[#allocation6 + $0xed8] sm:$0xff]  ;;  %v1643_v60 = vld [vmem:[#allocation6 + $0x1230] sm:$0xff] }
 0x330   :  { %11069 = vmatprep.subr.bf16.mxu1 %v12199_v0  ;;  %11207 = vmatprep.subr.bf16.mxu0 %v12199_v0  ;;  %v11082_v35 = vpack.c.bf16 %v1536_v47, %v1535_v26  ;;  %v11244_v58 = vpack.c.bf16 %v1644_v11, %v1643_v60  ;;  %12006 = verf.f32 %v841_v37  ;;  %v1651_v26 = vld [vmem:[#allocation6 + $0x1270] sm:$0xff]  ;;  %v1652_v47 = vld [vmem:[#allocation6 + $0x1278] sm:$0xff] }
 0x331   :  { %9134 = vmatprep.mubr.msk.f32.mxu1 %vm12200_vm1, %v13899_v7  ;;  %v11256_v37 = vpack.c.bf16 %v1652_v47, %v1651_v26  ;;  %v1677_v26 = vld [vmem:[#allocation6 + $0x1340] sm:$0xff]  ;;  %v1678_v47 = vld [vmem:[#allocation6 + $0x1348] sm:$0xff] }
 0x333   :  { %11071 = vmatpush3.bf16.msra.mxu1 %v11070_v54  ;;  %11209 = vmatpush3.bf16.msra.mxu0 %v11208_v14  ;;  %v1646_v54 = vld [vmem:[#allocation6 + $0x1248] sm:$0xff] }
 0x334   :  { %11072 = vmatprep.subr.bf16.mxu1 %v12199_v0  ;;  %11234 = vmatprep.subr.bf16.mxu0 %v12199_v0  ;;  %v11247_v39 = vpack.c.bf16 %v1646_v54, %v1645_v62  ;;  %v1669_v62 = vld [vmem:[#allocation6 + $0x1300] sm:$0xff]  ;;  %v1670_v54 = vld [vmem:[#allocation6 + $0x1308] sm:$0xff] }
 0x336   :  { %9310 = vmatmul.mubr.f32.vlgmr.msra.gmra.mrb[94].mxu0 %v1031_v29  ;;  %v12005_v29 = vpop.eup %12004 }
 0x337   :  { %11074 = vmatpush3.bf16.msra.mxu1 %v11073_v16  ;;  %11236 = vmatpush3.bf16.msra.mxu0 %v11235_v9  ;;  %v1647_v16 = vld [vmem:[#allocation6 + $0x1250] sm:$0xff]  ;;  %v1648_v9 = vld [vmem:[#allocation6 + $0x1258] sm:$0xff]  ;;  %v962_v50 = vadd.f32 1.0, %v12005_v29  ;;  %v1565_v29 = vld [vmem:[#allocation6 + $0xfc0] sm:$0xff] }
 0x338   :  { %11075 = vmatprep.subr.bf16.mxu1 %v12199_v0  ;;  %11237 = vmatprep.subr.bf16.mxu0 %v12199_v0  ;;  %v11250_v63 = vpack.c.bf16 %v1648_v9, %v1647_v16 }
 0x339   :  { %9379 = vmatprep.mubr.msk.f32.mxu0 %vm12200_vm1, %v13899_v7 }
 0x33a   :  { %v12007_v60 = vpop.eup %12006 }
 0x33b   :  { %11077 = vmatpush3.bf16.msra.mxu1 %v11076_v61  ;;  %11239 = vmatpush3.bf16.msra.mxu0 %v11238_v32  ;;  %v1558_v61 = vld [vmem:[#allocation6 + $0xf88] sm:$0xff]  ;;  %v1649_v32 = vld [vmem:[#allocation6 + $0x1260] sm:$0xff]  ;;  %v969_v4 = vadd.f32 1.0, %v12007_v60 }
 0x33c   :  { %11078 = vmatprep.subr.bf16.mxu1 %v12199_v0  ;;  %11240 = vmatprep.subr.bf16.mxu0 %v12199_v0  ;;  %v11115_v46 = vpack.c.bf16 %v1558_v61, %v1557_v42  ;;  %v11253_v53 = vpack.c.bf16 %v1650_v25, %v1649_v32  ;;  %v1674_v42 = vld [vmem:[#allocation6 + $0x1328] sm:$0xff]  ;;  %v1567_v32 = vld [vmem:[#allocation6 + $0xfd0] sm:$0xff]  ;;  %v1568_v25 = vld [vmem:[#allocation6 + $0xfd8] sm:$0xff] }
 0x33f   :  { %11080 = vmatpush3.bf16.msra.mxu1 %v11079_v18  ;;  %11242 = vmatpush3.bf16.msra.mxu0 %v11241_v8  ;;  %v1559_v18 = vld [vmem:[#allocation6 + $0xf90] sm:$0xff]  ;;  %v1026_v8 = vmul.f32 %v962_v50, %v770_v6  ;;  %v13279_v6 = vadd.f32 %v13226_v5, %v12787_v57  ;;  %v1569_v57 = vld [vmem:[#allocation6 + $0xfe0] sm:$0xff] }
 0x340   :  { %11081 = vmatprep.subr.bf16.mxu1 %v12199_v0  ;;  %11243 = vmatprep.subr.bf16.mxu0 %v12199_v0  ;;  %v11118_v11 = vpack.c.bf16 %v1560_v19, %v1559_v18  ;;  %v11130_v18 = vpack.c.bf16 %v1568_v25, %v1567_v32  ;;  %v1570_v19 = vld [vmem:[#allocation6 + $0xfe8] sm:$0xff] }
 0x341   :  { %v3201_v14 = vpop.f32.mrb[18].mxu1 }
 0x342   :  { %v6579_v22 = vadd.f32 %v13212_v23, %v3201_v14  ;;  %v8646_v51 = vpop.f32.mrb[19].mxu1  ;;  %v11088_v23 = vpack.c.bf16 %v1540_v55, %v1539_v10  ;;  %v13268_v14 = vadd.f32 %v13226_v5, %v12745_v17  ;;  %v1671_v10 = vld [vmem:[#allocation6 + $0x1310] sm:$0xff]  ;;  %v1672_v55 = vld [vmem:[#allocation6 + $0x1318] sm:$0xff] }
 0x343   :  { %11083 = vmatpush3.bf16.msra.mxu1 %v11082_v35  ;;  %11245 = vmatpush3.bf16.msra.mxu0 %v11244_v58  ;;  %v1561_v35 = vld [vmem:[#allocation6 + $0xfa0] sm:$0xff]  ;;  %v777_v58 = vmul.f32 0.5, %v13241_v40  ;;  %v11283_v51 = vpack.c.bf16 %v1670_v54, %v1669_v62  ;;  %v1563_v40 = vld [vmem:[#allocation6 + $0xfb0] sm:$0xff]  ;;  %v11286_v9 = vpack.c.bf16 %v1672_v55, %v1671_v10  ;;  %v1680_v54 = vld [vmem:[#allocation6 + $0x1358] sm:$0xff] }
 0x344   :  { %11084 = vmatprep.subr.bf16.mxu1 %v12199_v0  ;;  %11246 = vmatprep.subr.bf16.mxu0 %v12199_v0  ;;  %v13252_v1 = vadd.f32 %v6579_v22, %v13141_v34  ;;  %v11121_v22 = vpack.c.bf16 %v1562_v24, %v1561_v35  ;;  %v836_v16 = vmul.f32 0.70710677, %v13268_v14  ;;  %v11133_v35 = vpack.c.bf16 %v1570_v19, %v1569_v57  ;;  %v1572_v24 = vld [vmem:[#allocation6 + $0xff8] sm:$0xff]  ;;  %v1679_v62 = vld [vmem:[#allocation6 + $0x1350] sm:$0xff]  ;;  %v1590_v55 = vld [vmem:[#allocation6 + $0x1088] sm:$0xff] }
 0x345   :  { %v1701_v57 = vld [vmem:[#allocation6 + $0x1400] sm:$0xff]  ;;  %v1702_v19 = vld [vmem:[#allocation6 + $0x1408] sm:$0xff] }
 0x346   :  { %12008 = verf.f32 %v836_v16  ;;  %v1681_v16 = vld [vmem:[#allocation6 + $0x1360] sm:$0xff] }
 0x347   :  { %11086 = vmatpush3.bf16.msra.mxu1 %v11085_v20  ;;  %11248 = vmatpush3.bf16.msra.mxu0 %v11247_v39  ;;  %v1033_v20 = vmul.f32 %v969_v4, %v777_v58  ;;  %v1564_v39 = vld [vmem:[#allocation6 + $0xfb8] sm:$0xff]  ;;  %v11295_v58 = vpack.c.bf16 %v1678_v47, %v1677_v26  ;;  %v1571_v4 = vld [vmem:[#allocation6 + $0xff0] sm:$0xff]  ;;  %v13306_v26 = vadd.f32 %v13226_v5, %v12752_v30 }
 0x348   :  { %11087 = vmatprep.subr.bf16.mxu1 %v12199_v0  ;;  %11249 = vmatprep.subr.bf16.mxu0 %v12199_v0  ;;  %v11124_v17 = vpack.c.bf16 %v1564_v39, %v1563_v40  ;;  %v11298_v40 = vpack.c.bf16 %v1680_v54, %v1679_v62  ;;  %v772_v39 = vmul.f32 0.5, %v13268_v14  ;;  %v1592_v14 = vld [vmem:[#allocation6 + $0x1098] sm:$0xff]  ;;  %v1597_v62 = vld [vmem:[#allocation6 + $0x10c0] sm:$0xff]  ;;  %v1598_v54 = vld [vmem:[#allocation6 + $0x10c8] sm:$0xff] }
 0x349   :  { %v13257_v43 = vpop.f32.mrb[82].mxu0 }
 0x34a   :  { %v8891_v34 = vpop.f32.mrb[83].mxu0 }
 0x34b   :  { %11089 = vmatpush3.bf16.msra.mxu1 %v11088_v23  ;;  %11251 = vmatpush3.bf16.msra.mxu0 %v11250_v63  ;;  %v1566_v23 = vld [vmem:[#allocation6 + $0xfc8] sm:$0xff]  ;;  %v1673_v63 = vld [vmem:[#allocation6 + $0x1320] sm:$0xff]  ;;  %v1675_v34 = vld [vmem:[#allocation6 + $0x1330] sm:$0xff] }
 0x34c   :  { %11114 = vmatprep.subr.bf16.mxu1 %v12199_v0  ;;  %11252 = vmatprep.subr.bf16.mxu0 %v12199_v0  ;;  %v11127_v50 = vpack.c.bf16 %v1566_v23, %v1565_v29  ;;  %v11289_v61 = vpack.c.bf16 %v1674_v42, %v1673_v63  ;;  %v1591_v63 = vld [vmem:[#allocation6 + $0x1090] sm:$0xff] }
 0x34d   :  { %v11166_v25 = vpack.c.bf16 %v1592_v14, %v1591_v63  ;;  %v1602_v63 = vld [vmem:[#allocation6 + $0x10e8] sm:$0xff] }
 0x34e   :  { %9135 = vmatmul.mubr.f32.vlgmr.msra.gmra.mrb[32].mxu1 %v1026_v8  ;;  %v1710_v14 = vld [vmem:[#allocation6 + $0x1448] sm:$0xff] }
 0x34f   :  { %11116 = vmatpush3.bf16.msra.mxu1 %v11115_v46  ;;  %11254 = vmatpush3.bf16.msra.mxu0 %v11253_v53  ;;  %v1676_v46 = vld [vmem:[#allocation6 + $0x1338] sm:$0xff]  ;;  %v843_v53 = vmul.f32 0.70710677, %v13279_v6 }
 0x350   :  { %11117 = vmatprep.subr.bf16.mxu1 %v12199_v0  ;;  %11255 = vmatprep.subr.bf16.mxu0 %v12199_v0  ;;  %v11292_v8 = vpack.c.bf16 %v1676_v46, %v1675_v34  ;;  %v1593_v46 = vld [vmem:[#allocation6 + $0x10a0] sm:$0xff] }
 0x351   :  { %9204 = vmatprep.mubr.msk.f32.mxu1 %vm12200_vm1, %v13899_v7  ;;  %12010 = verf.f32 %v843_v53  ;;  %v779_v53 = vmul.f32 0.5, %v13279_v6  ;;  %v1595_v6 = vld [vmem:[#allocation6 + $0x10b0] sm:$0xff] }
 0x353   :  { %11119 = vmatpush3.bf16.msra.mxu1 %v11118_v11  ;;  %11257 = vmatpush3.bf16.msra.mxu0 %v11256_v37 }
 0x354   :  { %11120 = vmatprep.subr.bf16.mxu1 %v12199_v0  ;;  %11282 = vmatprep.subr.bf16.mxu0 %v12199_v0 }
 0x356   :  { %9380 = vmatmul.mubr.f32.vlgmr.msra.gmra.mrb[96].mxu0 %v1033_v20  ;;  %v1589_v20 = vld [vmem:[#allocation6 + $0x1080] sm:$0xff] }
 0x357   :  { %11122 = vmatpush3.bf16.msra.mxu1 %v11121_v22  ;;  %11284 = vmatpush3.bf16.msra.mxu0 %v11283_v51  ;;  %v12009_v51 = vpop.eup %12008  ;;  %v11163_v29 = vpack.c.bf16 %v1590_v55, %v1589_v20  ;;  %v11175_v20 = vpack.c.bf16 %v1598_v54, %v1597_v62  ;;  %v1600_v55 = vld [vmem:[#allocation6 + $0x10d8] sm:$0xff]  ;;  %v1623_v62 = vld [vmem:[#allocation6 + $0x1190] sm:$0xff] }
 0x358   :  { %11123 = vmatprep.subr.bf16.mxu1 %v12199_v0  ;;  %11285 = vmatprep.subr.bf16.mxu0 %v12199_v0  ;;  %v964_v10 = vadd.f32 1.0, %v12009_v51  ;;  %v1705_v51 = vld [vmem:[#allocation6 + $0x1420] sm:$0xff] }
 0x359   :  { %9449 = vmatprep.mubr.msk.f32.mxu0 %vm12200_vm1, %v13899_v7 }
 0x35a   :  { %v1028_v42 = vmul.f32 %v964_v10, %v772_v39  ;;  %v1599_v10 = vld [vmem:[#allocation6 + $0x10d0] sm:$0xff] }
 0x35b   :  { %11125 = vmatpush3.bf16.msra.mxu1 %v11124_v17  ;;  %11287 = vmatpush3.bf16.msra.mxu0 %v11286_v9  ;;  %v1682_v17 = vld [vmem:[#allocation6 + $0x1368] sm:$0xff]  ;;  %v12011_v32 = vpop.eup %12010 }
 0x35c   :  { %11126 = vmatprep.subr.bf16.mxu1 %v12199_v0  ;;  %11288 = vmatprep.subr.bf16.mxu0 %v12199_v0  ;;  %v11301_v23 = vpack.c.bf16 %v1682_v17, %v1681_v16  ;;  %v1707_v16 = vld [vmem:[#allocation6 + $0x1430] sm:$0xff]  ;;  %v1708_v17 = vld [vmem:[#allocation6 + $0x1438] sm:$0xff] }
 0x35f   :  { %11128 = vmatpush3.bf16.msra.mxu1 %v11127_v50  ;;  %11290 = vmatpush3.bf16.msra.mxu0 %v11289_v61  ;;  %v1683_v50 = vld [vmem:[#allocation6 + $0x1370] sm:$0xff]  ;;  %v1684_v61 = vld [vmem:[#allocation6 + $0x1378] sm:$0xff] }
 0x360   :  { %11129 = vmatprep.subr.bf16.mxu1 %v12199_v0  ;;  %11291 = vmatprep.subr.bf16.mxu0 %v12199_v0  ;;  %v11304_v34 = vpack.c.bf16 %v1684_v61, %v1683_v50 }
 0x361   :  { %v3341_v60 = vpop.f32.mrb[20].mxu1 }
 0x362   :  { %v6581_v11 = vadd.f32 %v13252_v1, %v3341_v60  ;;  %v8716_v37 = vpop.f32.mrb[21].mxu1  ;;  %v11136_v1 = vpack.c.bf16 %v1572_v24, %v1571_v4  ;;  %v11331_v60 = vpack.c.bf16 %v1702_v19, %v1701_v57  ;;  %v838_v4 = vmul.f32 0.70710677, %v13306_v26 }
 0x363   :  { %11131 = vmatpush3.bf16.msra.mxu1 %v11130_v18  ;;  %11293 = vmatpush3.bf16.msra.mxu0 %v11292_v8  ;;  %v971_v18 = vadd.f32 1.0, %v12011_v32  ;;  %v1594_v8 = vld [vmem:[#allocation6 + $0x10a8] sm:$0xff]  ;;  %v1596_v37 = vld [vmem:[#allocation6 + $0x10b8] sm:$0xff] }
 0x364   :  { %11132 = vmatprep.subr.bf16.mxu1 %v12199_v0  ;;  %11294 = vmatprep.subr.bf16.mxu0 %v12199_v0  ;;  %v13290_v22 = vadd.f32 %v6581_v11, %v13179_v27  ;;  %v11169_v47 = vpack.c.bf16 %v1594_v8, %v1593_v46  ;;  %v11172_v30 = vpack.c.bf16 %v1596_v37, %v1595_v6  ;;  %12012 = verf.f32 %v838_v4  ;;  %v1603_v46 = vld [vmem:[#allocation6 + $0x10f0] sm:$0xff]  ;;  %v1712_v8 = vld [vmem:[#allocation6 + $0x1458] sm:$0xff]  ;;  %v1622_v37 = vld [vmem:[#allocation6 + $0x1188] sm:$0xff] }
 0x365   :  { %v1035_v11 = vmul.f32 %v971_v18, %v779_v53  ;;  %v1604_v53 = vld [vmem:[#allocation6 + $0x10f8] sm:$0xff]  ;;  %v1711_v18 = vld [vmem:[#allocation6 + $0x1450] sm:$0xff]  ;;  %v774_v6 = vmul.f32 0.5, %v13306_v26 }
 0x366   :  { %v1624_v26 = vld [vmem:[#allocation6 + $0x1198] sm:$0xff] }
 0x367   :  { %11134 = vmatpush3.bf16.msra.mxu1 %v11133_v35  ;;  %11296 = vmatpush3.bf16.msra.mxu0 %v11295_v58  ;;  %v1703_v35 = vld [vmem:[#allocation6 + $0x1410] sm:$0xff]  ;;  %v1704_v58 = vld [vmem:[#allocation6 + $0x1418] sm:$0xff] }
 0x368   :  { %11135 = vmatprep.subr.bf16.mxu1 %v12199_v0  ;;  %11297 = vmatprep.subr.bf16.mxu0 %v12199_v0  ;;  %v11334_v24 = vpack.c.bf16 %v1704_v58, %v1703_v35  ;;  %v1713_v35 = vld [vmem:[#allocation6 + $0x1460] sm:$0xff]  ;;  %v1714_v58 = vld [vmem:[#allocation6 + $0x1468] sm:$0xff] }
 0x369   :  { %v13295_v9 = vpop.f32.mrb[84].mxu0 }
 0x36a   :  { %v8961_v27 = vpop.f32.mrb[85].mxu0 }
 0x36b   :  { %11137 = vmatpush3.bf16.msra.mxu1 %v11136_v1  ;;  %11299 = vmatpush3.bf16.msra.mxu0 %v11298_v40  ;;  %v1706_v1 = vld [vmem:[#allocation6 + $0x1428] sm:$0xff]  ;;  %v13317_v40 = vadd.f32 %v13226_v5, %v12794_v38  ;;  %v1601_v38 = vld [vmem:[#allocation6 + $0x10e0] sm:$0xff] }
 0x36c   :  { %11162 = vmatprep.subr.bf16.mxu1 %v12199_v0  ;;  %11300 = vmatprep.subr.bf16.mxu0 %v12199_v0  ;;  %v11337_v39 = vpack.c.bf16 %v1706_v1, %v1705_v51  ;;  %v1715_v51 = vld [vmem:[#allocation6 + $0x1470] sm:$0xff]  ;;  %v1716_v1 = vld [vmem:[#allocation6 + $0x1478] sm:$0xff] }
 0x36d   :  { %v845_v27 = vmul.f32 0.70710677, %v13317_v40 }
 0x36e   :  { %9205 = vmatmul.mubr.f32.vlgmr.msra.gmra.mrb[34].mxu1 %v1028_v42  ;;  %v1709_v42 = vld [vmem:[#allocation6 + $0x1440] sm:$0xff]  ;;  %v12013_v19 = vpop.eup %12012 }
 0x36f   :  { %11164 = vmatpush3.bf16.msra.mxu1 %v11163_v29  ;;  %11302 = vmatpush3.bf16.msra.mxu0 %v11301_v23  ;;  %v11178_v29 = vpack.c.bf16 %v1600_v55, %v1599_v10  ;;  %v11340_v23 = vpack.c.bf16 %v1708_v17, %v1707_v16  ;;  %12014 = verf.f32 %v845_v27  ;;  %v11352_v10 = vpack.c.bf16 %v1716_v1, %v1715_v51  ;;  %v1625_v55 = vld [vmem:[#allocation6 + $0x11a0] sm:$0xff]  ;;  %v1626_v27 = vld [vmem:[#allocation6 + $0x11a8] sm:$0xff] }
 0x370   :  { %11165 = vmatprep.subr.bf16.mxu1 %v12199_v0  ;;  %11303 = vmatprep.subr.bf16.mxu0 %v12199_v0  ;;  %v781_v16 = vmul.f32 0.5, %v13317_v40  ;;  %v1627_v40 = vld [vmem:[#allocation6 + $0x11b0] sm:$0xff] }
 0x371   :  { %9274 = vmatprep.mubr.msk.f32.mxu1 %vm12200_vm1, %v13899_v7 }
 0x373   :  { %11167 = vmatpush3.bf16.msra.mxu1 %v11166_v25  ;;  %11305 = vmatpush3.bf16.msra.mxu0 %v11304_v34  ;;  %v11181_v25 = vpack.c.bf16 %v1602_v63, %v1601_v38  ;;  %v11343_v34 = vpack.c.bf16 %v1710_v14, %v1709_v42  ;;  %v13344_v38 = vadd.f32 %v13226_v5, %v12764_v45 }
 0x374   :  { %11168 = vmatprep.subr.bf16.mxu1 %v12199_v0  ;;  %11330 = vmatprep.subr.bf16.mxu0 %v12199_v0  ;;  %v11217_v63 = vpack.c.bf16 %v1626_v27, %v1625_v55  ;;  %v1743_v55 = vld [vmem:[#allocation6 + $0x1550] sm:$0xff] }
 0x376   :  { %9450 = vmatmul.mubr.f32.vlgmr.msra.gmra.mrb[98].mxu0 %v1035_v11  ;;  %v966_v11 = vadd.f32 1.0, %v12013_v19  ;;  %v13355_v19 = vadd.f32 %v13226_v5, %v12800_v48  ;;  %v1633_v48 = vld [vmem:[#allocation6 + $0x11e0] sm:$0xff] }
 0x377   :  { %11170 = vmatpush3.bf16.msra.mxu1 %v11169_v47  ;;  %11332 = vmatpush3.bf16.msra.mxu0 %v11331_v60  ;;  %v11346_v47 = vpack.c.bf16 %v1712_v8, %v1711_v18  ;;  %v1621_v60 = vld [vmem:[#allocation6 + $0x1180] sm:$0xff]  ;;  %v1738_v8 = vld [vmem:[#allocation6 + $0x1528] sm:$0xff] }
 0x378   :  { %11171 = vmatprep.subr.bf16.mxu1 %v12199_v0  ;;  %11333 = vmatprep.subr.bf16.mxu0 %v12199_v0  ;;  %v1030_v54 = vmul.f32 %v966_v11, %v774_v6  ;;  %v1737_v18 = vld [vmem:[#allocation6 + $0x1520] sm:$0xff]  ;;  %v1632_v6 = vld [vmem:[#allocation6 + $0x11d8] sm:$0xff]  ;;  %v1739_v11 = vld [vmem:[#allocation6 + $0x1530] sm:$0xff] }
 0x379   :  { %9519 = vmatprep.mubr.msk.f32.mxu0 %vm12200_vm1, %v13899_v7 }
 0x37b   :  { %11173 = vmatpush3.bf16.msra.mxu1 %v11172_v30  ;;  %11335 = vmatpush3.bf16.msra.mxu0 %v11334_v24  ;;  %v11211_v30 = vpack.c.bf16 %v1622_v37, %v1621_v60  ;;  %v11349_v24 = vpack.c.bf16 %v1714_v58, %v1713_v35  ;;  %v1631_v60 = vld [vmem:[#allocation6 + $0x11d0] sm:$0xff]  ;;  %v1740_v37 = vld [vmem:[#allocation6 + $0x1538] sm:$0xff]  ;;  %v847_v35 = vmul.f32 0.70710677, %v13355_v19 }
 0x37c   :  { %11174 = vmatprep.subr.bf16.mxu1 %v12199_v0  ;;  %11336 = vmatprep.subr.bf16.mxu0 %v12199_v0  ;;  %v11226_v58 = vpack.c.bf16 %v1632_v6, %v1631_v60  ;;  %v783_v60 = vmul.f32 0.5, %v13355_v19  ;;  %v1659_v19 = vld [vmem:[#allocation6 + $0x12b0] sm:$0xff] }
 0x37f   :  { %11176 = vmatpush3.bf16.msra.mxu1 %v11175_v20  ;;  %11338 = vmatpush3.bf16.msra.mxu0 %v11337_v39  ;;  %v12015_v20 = vpop.eup %12014  ;;  %v11214_v39 = vpack.c.bf16 %v1624_v26, %v1623_v62  ;;  %v1742_v62 = vld [vmem:[#allocation6 + $0x1548] sm:$0xff] }
 0x380   :  { %11177 = vmatprep.subr.bf16.mxu1 %v12199_v0  ;;  %11339 = vmatprep.subr.bf16.mxu0 %v12199_v0  ;;  %v973_v17 = vadd.f32 1.0, %v12015_v20 }
 0x381   :  { %v3481_v50 = vpop.f32.mrb[22].mxu1 }
 0x382   :  { %v6583_v61 = vadd.f32 %v13290_v22, %v3481_v50  ;;  %v8786_v32 = vpop.f32.mrb[23].mxu1  ;;  %v11184_v22 = vpack.c.bf16 %v1604_v53, %v1603_v46  ;;  %v1037_v14 = vmul.f32 %v973_v17, %v781_v16  ;;  %v1628_v50 = vld [vmem:[#allocation6 + $0x11b8] sm:$0xff]  ;;  %v1629_v46 = vld [vmem:[#allocation6 + $0x11c0] sm:$0xff]  ;;  %v1630_v53 = vld [vmem:[#allocation6 + $0x11c8] sm:$0xff] }
 0x383   :  { %11179 = vmatpush3.bf16.msra.mxu1 %v11178_v29  ;;  %11341 = vmatpush3.bf16.msra.mxu0 %v11340_v23  ;;  %v1733_v29 = vld [vmem:[#allocation6 + $0x1500] sm:$0xff]  ;;  %v1734_v23 = vld [vmem:[#allocation6 + $0x1508] sm:$0xff]  ;;  %v1736_v32 = vld [vmem:[#allocation6 + $0x1518] sm:$0xff]  ;;  %v11220_v45 = vpack.c.bf16 %v1628_v50, %v1627_v40 }
 0x384   :  { %11180 = vmatprep.subr.bf16.mxu1 %v12199_v0  ;;  %11342 = vmatprep.subr.bf16.mxu0 %v12199_v0  ;;  %v13328_v57 = vadd.f32 %v6583_v61, %v13217_v36  ;;  %v11379_v42 = vpack.c.bf16 %v1734_v23, %v1733_v29  ;;  %v1735_v61 = vld [vmem:[#allocation6 + $0x1510] sm:$0xff]  ;;  %v1744_v16 = vld [vmem:[#allocation6 + $0x1558] sm:$0xff]  ;;  %v1653_v23 = vld [vmem:[#allocation6 + $0x1280] sm:$0xff] }
 0x385   :  { %v11394_v29 = vpack.c.bf16 %v1744_v16, %v1743_v55  ;;  %v1654_v40 = vld [vmem:[#allocation6 + $0x1288] sm:$0xff]  ;;  %v13393_v55 = vadd.f32 %v13226_v5, %v12807_v13  ;;  %v1665_v13 = vld [vmem:[#allocation6 + $0x12e0] sm:$0xff] }
 0x386   :  { %v1746_v50 = vld [vmem:[#allocation6 + $0x1568] sm:$0xff] }
 0x387   :  { %11182 = vmatpush3.bf16.msra.mxu1 %v11181_v25  ;;  %11344 = vmatpush3.bf16.msra.mxu0 %v11343_v34  ;;  %v840_v25 = vmul.f32 0.70710677, %v13344_v38  ;;  %v11382_v34 = vpack.c.bf16 %v1736_v32, %v1735_v61  ;;  %v11259_v32 = vpack.c.bf16 %v1654_v40, %v1653_v23  ;;  %v1771_v23 = vld [vmem:[#allocation6 + $0x1630] sm:$0xff] }
 0x388   :  { %11183 = vmatprep.subr.bf16.mxu1 %v12199_v0  ;;  %11345 = vmatprep.subr.bf16.mxu0 %v12199_v0 }
 0x389   :  { %v13333_v4 = vpop.f32.mrb[86].mxu0  ;;  %12016 = verf.f32 %v840_v25 }
 0x38a   :  { %v9031_v36 = vpop.f32.mrb[87].mxu0  ;;  %12018 = verf.f32 %v847_v35  ;;  %v1766_v35 = vld [vmem:[#allocation6 + $0x1608] sm:$0xff] }
 0x38b   :  { %11185 = vmatpush3.bf16.msra.mxu1 %v11184_v22  ;;  %11347 = vmatpush3.bf16.msra.mxu0 %v11346_v47  ;;  %v11223_v22 = vpack.c.bf16 %v1630_v53, %v1629_v46  ;;  %v11385_v47 = vpack.c.bf16 %v1738_v8, %v1737_v18  ;;  %v11388_v36 = vpack.c.bf16 %v1740_v37, %v1739_v11  ;;  %v1747_v46 = vld [vmem:[#allocation6 + $0x1570] sm:$0xff]  ;;  %v1748_v53 = vld [vmem:[#allocation6 + $0x1578] sm:$0xff]  ;;  %v1658_v11 = vld [vmem:[#allocation6 + $0x12a8] sm:$0xff] }
 0x38c   :  { %11210 = vmatprep.subr.bf16.mxu1 %v12199_v0  ;;  %11348 = vmatprep.subr.bf16.mxu0 %v12199_v0  ;;  %v1765_v37 = vld [vmem:[#allocation6 + $0x1600] sm:$0xff] }
 0x38e   :  { %9275 = vmatmul.mubr.f32.vlgmr.msra.gmra.mrb[36].mxu1 %v1030_v54 }
 0x38f   :  { %11212 = vmatpush3.bf16.msra.mxu1 %v11211_v30  ;;  %11350 = vmatpush3.bf16.msra.mxu0 %v11349_v24  ;;  %v1634_v30 = vld [vmem:[#allocation6 + $0x11e8] sm:$0xff]  ;;  %v1741_v24 = vld [vmem:[#allocation6 + $0x1540] sm:$0xff] }
 0x390   :  { %11213 = vmatprep.subr.bf16.mxu1 %v12199_v0  ;;  %11351 = vmatprep.subr.bf16.mxu0 %v12199_v0  ;;  %v11229_v1 = vpack.c.bf16 %v1634_v30, %v1633_v48  ;;  %v11391_v20 = vpack.c.bf16 %v1742_v62, %v1741_v24  ;;  %v11427_v48 = vpack.c.bf16 %v1766_v35, %v1765_v37  ;;  %v1660_v24 = vld [vmem:[#allocation6 + $0x12b8] sm:$0xff]  ;;  %v1767_v62 = vld [vmem:[#allocation6 + $0x1610] sm:$0xff]  ;;  %v1686_v35 = vld [vmem:[#allocation6 + $0x1388] sm:$0xff] }
 0x391   :  { %9344 = vmatprep.mubr.msk.f32.mxu1 %vm12200_vm1, %v13899_v7 }
 0x393   :  { %11215 = vmatpush3.bf16.msra.mxu1 %v11214_v39  ;;  %11353 = vmatpush3.bf16.msra.mxu0 %v11352_v10  ;;  %v1635_v39 = vld [vmem:[#allocation6 + $0x11f0] sm:$0xff]  ;;  %v1636_v10 = vld [vmem:[#allocation6 + $0x11f8] sm:$0xff]  ;;  %v12017_v27 = vpop.eup %12016 }
 0x394   :  { %11216 = vmatprep.subr.bf16.mxu1 %v12199_v0  ;;  %11378 = vmatprep.subr.bf16.mxu0 %v12199_v0  ;;  %v12019_v18 = vpop.eup %12018 }
 0x395   :  { %v975_v6 = vadd.f32 1.0, %v12019_v18  ;;  %v1775_v18 = vld [vmem:[#allocation6 + $0x1650] sm:$0xff] }
 0x396   :  { %9520 = vmatmul.mubr.f32.vlgmr.msra.gmra.mrb[100].mxu0 %v1037_v14  ;;  %v1745_v14 = vld [vmem:[#allocation6 + $0x1560] sm:$0xff] }
 0x397   :  { %11218 = vmatpush3.bf16.msra.mxu1 %v11217_v63  ;;  %11380 = vmatpush3.bf16.msra.mxu0 %v11379_v42  ;;  %v776_v63 = vmul.f32 0.5, %v13344_v38  ;;  %v968_v42 = vadd.f32 1.0, %v12017_v27  ;;  %v11397_v25 = vpack.c.bf16 %v1746_v50, %v1745_v14  ;;  %v1656_v38 = vld [vmem:[#allocation6 + $0x1298] sm:$0xff]  ;;  %v1039_v30 = vmul.f32 %v975_v6, %v783_v60  ;;  %v1773_v50 = vld [vmem:[#allocation6 + $0x1640] sm:$0xff] }
 0x398   :  { %11219 = vmatprep.subr.bf16.mxu1 %v12199_v0  ;;  %11381 = vmatprep.subr.bf16.mxu0 %v12199_v0  ;;  %v1685_v6 = vld [vmem:[#allocation6 + $0x1380] sm:$0xff] }
 0x399   :  { %9589 = vmatprep.mubr.msk.f32.mxu0 %vm12200_vm1, %v13899_v7 }
 0x39b   :  { %11221 = vmatpush3.bf16.msra.mxu1 %v11220_v45  ;;  %11383 = vmatpush3.bf16.msra.mxu0 %v11382_v34  ;;  %v1655_v45 = vld [vmem:[#allocation6 + $0x1290] sm:$0xff]  ;;  %v1032_v34 = vmul.f32 %v968_v42, %v776_v63  ;;  %v1772_v63 = vld [vmem:[#allocation6 + $0x1638] sm:$0xff]  ;;  %v849_v42 = vmul.f32 0.70710677, %v13393_v55 }
 0x39c   :  { %11222 = vmatprep.subr.bf16.mxu1 %v12199_v0  ;;  %11384 = vmatprep.subr.bf16.mxu0 %v12199_v0  ;;  %v11262_v8 = vpack.c.bf16 %v1656_v38, %v1655_v45  ;;  %v11436_v14 = vpack.c.bf16 %v1772_v63, %v1771_v23  ;;  %v13418_v23 = vld [vmem:[#allocation4] ss:$0 sm:$0xff] }
 0x39d   :  { %v13422_v63 = vadd.f32 %v13418_v23, %v12783_v12 }
 0x39f   :  { %11224 = vmatpush3.bf16.msra.mxu1 %v11223_v22  ;;  %11386 = vmatpush3.bf16.msra.mxu0 %v11385_v47  ;;  %v11400_v22 = vpack.c.bf16 %v1748_v53, %v1747_v46  ;;  %v1657_v47 = vld [vmem:[#allocation6 + $0x12a0] sm:$0xff]  ;;  %v1667_v46 = vld [vmem:[#allocation6 + $0x12f0] sm:$0xff]  ;;  %v1668_v53 = vld [vmem:[#allocation6 + $0x12f8] sm:$0xff] }
 0x3a0   :  { %11225 = vmatprep.subr.bf16.mxu1 %v12199_v0  ;;  %11387 = vmatprep.subr.bf16.mxu0 %v12199_v0 }
 0x3a1   :  { %v3621_v54 = vpop.f32.mrb[24].mxu1 }
 0x3a2   :  { %v6585_v26 = vadd.f32 %v13328_v57, %v3621_v54  ;;  %v8856_v51 = vpop.f32.mrb[25].mxu1  ;;  %v11232_v57 = vpack.c.bf16 %v1636_v10, %v1635_v39  ;;  %v1768_v54 = vld [vmem:[#allocation6 + $0x1618] sm:$0xff]  ;;  %v1769_v39 = vld [vmem:[#allocation6 + $0x1620] sm:$0xff]  ;;  %v1770_v10 = vld [vmem:[#allocation6 + $0x1628] sm:$0xff] }
 0x3a3   :  { %11227 = vmatpush3.bf16.msra.mxu1 %v11226_v58  ;;  %11389 = vmatpush3.bf16.msra.mxu0 %v11388_v36  ;;  %v13382_v58 = vadd.f32 %v13226_v5, %v12771_v56  ;;  %v11265_v36 = vpack.c.bf16 %v1658_v11, %v1657_v47  ;;  %v11268_v56 = vpack.c.bf16 %v1660_v24, %v1659_v19  ;;  %v1666_v5 = vld [vmem:[#allocation6 + $0x12e8] sm:$0xff] }
 0x3a4   :  { %11228 = vmatprep.subr.bf16.mxu1 %v12199_v0  ;;  %11390 = vmatprep.subr.bf16.mxu0 %v12199_v0  ;;  %v13366_v17 = vadd.f32 %v6585_v26, %v13257_v43  ;;  %v11430_v51 = vpack.c.bf16 %v1768_v54, %v1767_v62  ;;  %v11433_v27 = vpack.c.bf16 %v1770_v10, %v1769_v39  ;;  %v1687_v62 = vld [vmem:[#allocation6 + $0x1390] sm:$0xff]  ;;  %v1689_v39 = vld [vmem:[#allocation6 + $0x13a0] sm:$0xff]  ;;  %v785_v10 = vmul.f32 0.5, %v13393_v55 }
 0x3a5   :  { %v842_v26 = vmul.f32 0.70710677, %v13382_v58  ;;  %v778_v11 = vmul.f32 0.5, %v13382_v58  ;;  %v1688_v58 = vld [vmem:[#allocation6 + $0x1398] sm:$0xff] }
 0x3a7   :  { %11230 = vmatpush3.bf16.msra.mxu1 %v11229_v1  ;;  %11392 = vmatpush3.bf16.msra.mxu0 %v11391_v20  ;;  %v1661_v1 = vld [vmem:[#allocation6 + $0x12c0] sm:$0xff]  ;;  %v1662_v20 = vld [vmem:[#allocation6 + $0x12c8] sm:$0xff]  ;;  %12020 = verf.f32 %v842_v26  ;;  %v1779_v26 = vld [vmem:[#allocation6 + $0x1670] sm:$0xff] }
 0x3a8   :  { %11231 = vmatprep.subr.bf16.mxu1 %v12199_v0  ;;  %11393 = vmatprep.subr.bf16.mxu0 %v12199_v0  ;;  %v11271_v16 = vpack.c.bf16 %v1662_v20, %v1661_v1  ;;  %12022 = verf.f32 %v849_v42  ;;  %v11310_v1 = vpack.c.bf16 %v1688_v58, %v1687_v62  ;;  %v1699_v58 = vld [vmem:[#allocation6 + $0x13f0] sm:$0xff] }
 0x3a9   :  { %v13371_v61 = vpop.f32.mrb[88].mxu0 }
 0x3aa   :  { %v9101_v43 = vpop.f32.mrb[89].mxu0 }
 0x3ab   :  { %11233 = vmatpush3.bf16.msra.mxu1 %v11232_v57  ;;  %11395 = vmatpush3.bf16.msra.mxu0 %v11394_v29  ;;  %v1663_v57 = vld [vmem:[#allocation6 + $0x12d0] sm:$0xff]  ;;  %v1664_v29 = vld [vmem:[#allocation6 + $0x12d8] sm:$0xff]  ;;  %v1774_v43 = vld [vmem:[#allocation6 + $0x1648] sm:$0xff] }
 0x3ac   :  { %11258 = vmatprep.subr.bf16.mxu1 %v12199_v0  ;;  %11396 = vmatprep.subr.bf16.mxu0 %v12199_v0  ;;  %v11274_v40 = vpack.c.bf16 %v1664_v29, %v1663_v57  ;;  %v11439_v38 = vpack.c.bf16 %v1774_v43, %v1773_v50  ;;  %v1797_v57 = vld [vmem:[#allocation6 + $0x1700] sm:$0xff]  ;;  %v1798_v29 = vld [vmem:[#allocation6 + $0x1708] sm:$0xff]  ;;  %v1800_v50 = vld [vmem:[#allocation6 + $0x1718] sm:$0xff]  ;;  %v844_v43 = vmul.f32 0.70710677, %v13422_v63 }
 0x3ad   :  { %v11475_v42 = vpack.c.bf16 %v1798_v29, %v1797_v57  ;;  %v1718_v57 = vld [vmem:[#allocation6 + $0x1488] sm:$0xff]  ;;  %v1809_v29 = vld [vmem:[#allocation6 + $0x1760] sm:$0xff] }
 0x3ae   :  { %9345 = vmatmul.mubr.f32.vlgmr.msra.gmra.mrb[38].mxu1 %v1032_v34  ;;  %v11277_v34 = vpack.c.bf16 %v1666_v5, %v1665_v13  ;;  %v1692_v13 = vld [vmem:[#allocation6 + $0x13b8] sm:$0xff]  ;;  %v1799_v5 = vld [vmem:[#allocation6 + $0x1710] sm:$0xff]  ;;  %12024 = verf.f32 %v844_v43 }
 0x3af   :  { %11260 = vmatpush3.bf16.msra.mxu1 %v11259_v32  ;;  %11398 = vmatpush3.bf16.msra.mxu0 %v11397_v25  ;;  %v1812_v43 = vld [vmem:[#allocation6 + $0x1778] sm:$0xff] }
 0x3b0   :  { %11261 = vmatprep.subr.bf16.mxu1 %v12199_v0  ;;  %11399 = vmatprep.subr.bf16.mxu0 %v12199_v0 }
 0x3b1   :  { %9414 = vmatprep.mubr.msk.f32.mxu1 %vm12200_vm1, %v13899_v7  ;;  %v12021_v47 = vpop.eup %12020 }
 0x3b2   :  { %v970_v37 = vadd.f32 1.0, %v12021_v47  ;;  %v1696_v47 = vld [vmem:[#allocation6 + $0x13d8] sm:$0xff] }
 0x3b3   :  { %11263 = vmatpush3.bf16.msra.mxu1 %v11262_v8  ;;  %11401 = vmatpush3.bf16.msra.mxu0 %v11400_v22  ;;  %v1776_v8 = vld [vmem:[#allocation6 + $0x1658] sm:$0xff] }
 0x3b4   :  { %11264 = vmatprep.subr.bf16.mxu1 %v12199_v0  ;;  %11426 = vmatprep.subr.bf16.mxu0 %v12199_v0  ;;  %v11442_v60 = vpack.c.bf16 %v1776_v8, %v1775_v18  ;;  %v1034_v54 = vmul.f32 %v970_v37, %v778_v11  ;;  %v1695_v8 = vld [vmem:[#allocation6 + $0x13d0] sm:$0xff] }
 0x3b5   :  { %v11322_v11 = vpack.c.bf16 %v1696_v47, %v1695_v8  ;;  %v1830_v8 = vld [vmem:[#allocation6 + $0x1808] sm:$0xff]  ;;  %v13460_v47 = vadd.f32 %v13418_v23, %v12792_v33 }
 0x3b6   :  { %9590 = vmatmul.mubr.f32.vlgmr.msra.gmra.mrb[102].mxu0 %v1039_v30  ;;  %v11307_v30 = vpack.c.bf16 %v1686_v35, %v1685_v6  ;;  %v1698_v35 = vld [vmem:[#allocation6 + $0x13e8] sm:$0xff] }
 0x3b7   :  { %11266 = vmatpush3.bf16.msra.mxu1 %v11265_v36  ;;  %11428 = vmatpush3.bf16.msra.mxu0 %v11427_v48  ;;  %v1777_v36 = vld [vmem:[#allocation6 + $0x1660] sm:$0xff]  ;;  %v1778_v48 = vld [vmem:[#allocation6 + $0x1668] sm:$0xff] }
 0x3b8   :  { %11267 = vmatprep.subr.bf16.mxu1 %v12199_v0  ;;  %11429 = vmatprep.subr.bf16.mxu0 %v12199_v0  ;;  %v11445_v24 = vpack.c.bf16 %v1778_v48, %v1777_v36  ;;  %v1805_v36 = vld [vmem:[#allocation6 + $0x1740] sm:$0xff]  ;;  %v1806_v48 = vld [vmem:[#allocation6 + $0x1748] sm:$0xff] }
 0x3b9   :  { %9659 = vmatprep.mubr.msk.f32.mxu0 %vm12200_vm1, %v13899_v7 }
 0x3bb   :  { %11269 = vmatpush3.bf16.msra.mxu1 %v11268_v56  ;;  %11431 = vmatpush3.bf16.msra.mxu0 %v11430_v51  ;;  %v1780_v56 = vld [vmem:[#allocation6 + $0x1678] sm:$0xff]  ;;  %v12023_v51 = vpop.eup %12022 }
 0x3bc   :  { %11270 = vmatprep.subr.bf16.mxu1 %v12199_v0  ;;  %11432 = vmatprep.subr.bf16.mxu0 %v12199_v0  ;;  %v11448_v20 = vpack.c.bf16 %v1780_v56, %v1779_v26  ;;  %v1700_v26 = vld [vmem:[#allocation6 + $0x13f8] sm:$0xff]  ;;  %v1807_v56 = vld [vmem:[#allocation6 + $0x1750] sm:$0xff] }
 0x3bf   :  { %11272 = vmatpush3.bf16.msra.mxu1 %v11271_v16  ;;  %11434 = vmatpush3.bf16.msra.mxu0 %v11433_v27  ;;  %v977_v16 = vadd.f32 1.0, %v12023_v51  ;;  %v1690_v27 = vld [vmem:[#allocation6 + $0x13a8] sm:$0xff]  ;;  %v1808_v51 = vld [vmem:[#allocation6 + $0x1758] sm:$0xff] }
 0x3c0   :  { %11273 = vmatprep.subr.bf16.mxu1 %v12199_v0  ;;  %11435 = vmatprep.subr.bf16.mxu0 %v12199_v0  ;;  %v11313_v55 = vpack.c.bf16 %v1690_v27, %v1689_v39  ;;  %v11490_v39 = vpack.c.bf16 %v1808_v51, %v1807_v56  ;;  %v1728_v56 = vld [vmem:[#allocation6 + $0x14d8] sm:$0xff]  ;;  %v1835_v51 = vld [vmem:[#allocation6 + $0x1830] sm:$0xff] }
 0x3c1   :  { %v3761_v32 = vpop.f32.mrb[26].mxu1 }
 0x3c2   :  { %v6587_v25 = vadd.f32 %v13366_v17, %v3761_v32  ;;  %v8926_v45 = vpop.f32.mrb[27].mxu1  ;;  %v11280_v17 = vpack.c.bf16 %v1668_v53, %v1667_v46  ;;  %v11478_v32 = vpack.c.bf16 %v1800_v50, %v1799_v5  ;;  %v13433_v46 = vadd.f32 %v13418_v23, %v12814_v31  ;;  %v1697_v31 = vld [vmem:[#allocation6 + $0x13e0] sm:$0xff]  ;;  %v1811_v50 = vld [vmem:[#allocation6 + $0x1770] sm:$0xff] }
 0x3c3   :  { %11275 = vmatpush3.bf16.msra.mxu1 %v11274_v40  ;;  %11437 = vmatpush3.bf16.msra.mxu0 %v11436_v14  ;;  %v1691_v40 = vld [vmem:[#allocation6 + $0x13b0] sm:$0xff]  ;;  %v1041_v14 = vmul.f32 %v977_v16, %v785_v10  ;;  %v1694_v45 = vld [vmem:[#allocation6 + $0x13c8] sm:$0xff]  ;;  %v11325_v62 = vpack.c.bf16 %v1698_v35, %v1697_v31  ;;  %v1717_v10 = vld [vmem:[#allocation6 + $0x1480] sm:$0xff]  ;;  %v780_v16 = vmul.f32 0.5, %v13422_v63  ;;  %v846_v35 = vmul.f32 0.70710677, %v13460_v47 }
 0x3c4   :  { %11276 = vmatprep.subr.bf16.mxu1 %v12199_v0  ;;  %11438 = vmatprep.subr.bf16.mxu0 %v12199_v0  ;;  %v13404_v22 = vadd.f32 %v6587_v25, %v13295_v9  ;;  %v11316_v12 = vpack.c.bf16 %v1692_v13, %v1691_v40  ;;  %v1693_v25 = vld [vmem:[#allocation6 + $0x13c0] sm:$0xff]  ;;  %v851_v6 = vmul.f32 0.70710677, %v13433_v46  ;;  %v11355_v40 = vpack.c.bf16 %v1718_v57, %v1717_v10  ;;  %v1719_v13 = vld [vmem:[#allocation6 + $0x1490] sm:$0xff]  ;;  %v1720_v63 = vld [vmem:[#allocation6 + $0x1498] sm:$0xff] }
 0x3c5   :  { %v11319_v53 = vpack.c.bf16 %v1694_v45, %v1693_v25  ;;  %v11496_v25 = vpack.c.bf16 %v1812_v43, %v1811_v50  ;;  %v1721_v45 = vld [vmem:[#allocation6 + $0x14a0] sm:$0xff]  ;;  %v1832_v31 = vld [vmem:[#allocation6 + $0x1818] sm:$0xff]  ;;  %v1838_v57 = vld [vmem:[#allocation6 + $0x1848] sm:$0xff] }
 0x3c6   :  { %12026 = verf.f32 %v851_v6  ;;  %v1840_v50 = vld [vmem:[#allocation6 + $0x1858] sm:$0xff] }
 0x3c7   :  { %11278 = vmatpush3.bf16.msra.mxu1 %v11277_v34  ;;  %11440 = vmatpush3.bf16.msra.mxu0 %v11439_v38  ;;  %v1801_v34 = vld [vmem:[#allocation6 + $0x1720] sm:$0xff]  ;;  %v1802_v38 = vld [vmem:[#allocation6 + $0x1728] sm:$0xff]  ;;  %12028 = verf.f32 %v846_v35 }
 0x3c8   :  { %11279 = vmatprep.subr.bf16.mxu1 %v12199_v0  ;;  %11441 = vmatprep.subr.bf16.mxu0 %v12199_v0  ;;  %v11481_v18 = vpack.c.bf16 %v1802_v38, %v1801_v34  ;;  %v787_v34 = vmul.f32 0.5, %v13433_v46  ;;  %v1723_v46 = vld [vmem:[#allocation6 + $0x14b0] sm:$0xff] }
 0x3c9   :  { %v13409_v19 = vpop.f32.mrb[90].mxu0 }
 0x3ca   :  { %v9171_v9 = vpop.f32.mrb[91].mxu0 }
 0x3cb   :  { %11281 = vmatpush3.bf16.msra.mxu1 %v11280_v17  ;;  %11443 = vmatpush3.bf16.msra.mxu0 %v11442_v60  ;;  %v1803_v17 = vld [vmem:[#allocation6 + $0x1730] sm:$0xff]  ;;  %v1804_v60 = vld [vmem:[#allocation6 + $0x1738] sm:$0xff] }
 0x3cc   :  { %11306 = vmatprep.subr.bf16.mxu1 %v12199_v0  ;;  %11444 = vmatprep.subr.bf16.mxu0 %v12199_v0  ;;  %v11484_v37 = vpack.c.bf16 %v1804_v60, %v1803_v17 }
 0x3ce   :  { %9415 = vmatmul.mubr.f32.vlgmr.msra.gmra.mrb[40].mxu1 %v1034_v54  ;;  %v11487_v54 = vpack.c.bf16 %v1806_v48, %v1805_v36  ;;  %v1725_v48 = vld [vmem:[#allocation6 + $0x14c0] sm:$0xff] }
 0x3cf   :  { %11308 = vmatpush3.bf16.msra.mxu1 %v11307_v30  ;;  %11446 = vmatpush3.bf16.msra.mxu0 %v11445_v24 }
 0x3d0   :  { %11309 = vmatprep.subr.bf16.mxu1 %v12199_v0  ;;  %11447 = vmatprep.subr.bf16.mxu0 %v12199_v0 }
 0x3d1   :  { %9484 = vmatprep.mubr.msk.f32.mxu1 %vm12200_vm1, %v13899_v7 }
 0x3d3   :  { %11311 = vmatpush3.bf16.msra.mxu1 %v11310_v1  ;;  %11449 = vmatpush3.bf16.msra.mxu0 %v11448_v20  ;;  %v12025_v20 = vpop.eup %12024 }
 0x3d4   :  { %11312 = vmatprep.subr.bf16.mxu1 %v12199_v0  ;;  %11474 = vmatprep.subr.bf16.mxu0 %v12199_v0  ;;  %v972_v27 = vadd.f32 1.0, %v12025_v20  ;;  %v1836_v20 = vld [vmem:[#allocation6 + $0x1838] sm:$0xff] }
 0x3d5   :  { %v11532_v10 = vpack.c.bf16 %v1836_v20, %v1835_v51  ;;  %v1756_v20 = vld [vmem:[#allocation6 + $0x15b8] sm:$0xff] }
 0x3d6   :  { %9660 = vmatmul.mubr.f32.vlgmr.msra.gmra.mrb[104].mxu0 %v1041_v14  ;;  %v1036_v5 = vmul.f32 %v972_v27, %v780_v16  ;;  %v1730_v16 = vld [vmem:[#allocation6 + $0x14e8] sm:$0xff]  ;;  %v1837_v27 = vld [vmem:[#allocation6 + $0x1840] sm:$0xff] }
 0x3d7   :  { %11314 = vmatpush3.bf16.msra.mxu1 %v11313_v55  ;;  %11476 = vmatpush3.bf16.msra.mxu0 %v11475_v42  ;;  %v1810_v55 = vld [vmem:[#allocation6 + $0x1768] sm:$0xff] }
 0x3d8   :  { %11315 = vmatprep.subr.bf16.mxu1 %v12199_v0  ;;  %11477 = vmatprep.subr.bf16.mxu0 %v12199_v0  ;;  %v11493_v14 = vpack.c.bf16 %v1810_v55, %v1809_v29 }
 0x3d9   :  { %9729 = vmatprep.mubr.msk.f32.mxu0 %vm12200_vm1, %v13899_v7 }
 0x3db   :  { %11317 = vmatpush3.bf16.msra.mxu1 %v11316_v12  ;;  %11479 = vmatpush3.bf16.msra.mxu0 %v11478_v32  ;;  %v12027_v12 = vpop.eup %12026  ;;  %v11358_v32 = vpack.c.bf16 %v1720_v63, %v1719_v13  ;;  %v1731_v13 = vld [vmem:[#allocation6 + $0x14f0] sm:$0xff] }
 0x3dc   :  { %11318 = vmatprep.subr.bf16.mxu1 %v12199_v0  ;;  %11480 = vmatprep.subr.bf16.mxu0 %v12199_v0  ;;  %v979_v38 = vadd.f32 1.0, %v12027_v12  ;;  %v1839_v63 = vld [vmem:[#allocation6 + $0x1850] sm:$0xff]  ;;  %v12029_v12 = vpop.eup %12028 }
 0x3de   :  { %v1043_v6 = vmul.f32 %v979_v38, %v787_v34  ;;  %v974_v34 = vadd.f32 1.0, %v12029_v12  ;;  %v1750_v38 = vld [vmem:[#allocation6 + $0x1588] sm:$0xff] }
 0x3df   :  { %11320 = vmatpush3.bf16.msra.mxu1 %v11319_v53  ;;  %11482 = vmatpush3.bf16.msra.mxu0 %v11481_v18  ;;  %v1722_v53 = vld [vmem:[#allocation6 + $0x14a8] sm:$0xff]  ;;  %v1829_v18 = vld [vmem:[#allocation6 + $0x1800] sm:$0xff] }
 0x3e0   :  { %11321 = vmatprep.subr.bf16.mxu1 %v12199_v0  ;;  %11483 = vmatprep.subr.bf16.mxu0 %v12199_v0  ;;  %v11361_v17 = vpack.c.bf16 %v1722_v53, %v1721_v45  ;;  %v11523_v60 = vpack.c.bf16 %v1830_v8, %v1829_v18  ;;  %v782_v45 = vmul.f32 0.5, %v13460_v47  ;;  %v1841_v53 = vld [vmem:[#allocation6 + $0x1860] sm:$0xff]  ;;  %v1842_v18 = vld [vmem:[#allocation6 + $0x1868] sm:$0xff]  ;;  %v1752_v47 = vld [vmem:[#allocation6 + $0x1598] sm:$0xff] }
 0x3e1   :  { %v3901_v9 = vpop.f32.mrb[28].mxu1 }
 0x3e2   :  { %v6589_v30 = vadd.f32 %v13404_v22, %v3901_v9  ;;  %v8996_v24 = vpop.f32.mrb[29].mxu1  ;;  %v11328_v22 = vpack.c.bf16 %v1700_v26, %v1699_v58  ;;  %v1726_v9 = vld [vmem:[#allocation6 + $0x14c8] sm:$0xff]  ;;  %v1727_v26 = vld [vmem:[#allocation6 + $0x14d0] sm:$0xff] }
 0x3e3   :  { %11323 = vmatpush3.bf16.msra.mxu1 %v11322_v11  ;;  %11485 = vmatpush3.bf16.msra.mxu0 %v11484_v37  ;;  %v1724_v11 = vld [vmem:[#allocation6 + $0x14b8] sm:$0xff]  ;;  %v1831_v37 = vld [vmem:[#allocation6 + $0x1810] sm:$0xff]  ;;  %v1834_v24 = vld [vmem:[#allocation6 + $0x1828] sm:$0xff] }
 0x3e4   :  { %11324 = vmatprep.subr.bf16.mxu1 %v12199_v0  ;;  %11486 = vmatprep.subr.bf16.mxu0 %v12199_v0  ;;  %v13444_v1 = vadd.f32 %v6589_v30, %v13333_v4  ;;  %v11364_v33 = vpack.c.bf16 %v1724_v11, %v1723_v46  ;;  %v11526_v36 = vpack.c.bf16 %v1832_v31, %v1831_v37  ;;  %v1833_v30 = vld [vmem:[#allocation6 + $0x1820] sm:$0xff]  ;;  %v1751_v46 = vld [vmem:[#allocation6 + $0x1590] sm:$0xff]  ;;  %v1844_v37 = vld [vmem:[#allocation6 + $0x1878] sm:$0xff] }
 0x3e5   :  { %v11529_v58 = vpack.c.bf16 %v1834_v24, %v1833_v30  ;;  %v1843_v11 = vld [vmem:[#allocation6 + $0x1870] sm:$0xff]  ;;  %v11406_v35 = vpack.c.bf16 %v1752_v47, %v1751_v46  ;;  %v1754_v30 = vld [vmem:[#allocation6 + $0x15a8] sm:$0xff]  ;;  %v1861_v24 = vld [vmem:[#allocation6 + $0x1900] sm:$0xff] }
 0x3e6   :  { %v1871_v46 = vld [vmem:[#allocation6 + $0x1950] sm:$0xff] }
 0x3e7   :  { %11326 = vmatpush3.bf16.msra.mxu1 %v11325_v62  ;;  %11488 = vmatpush3.bf16.msra.mxu0 %v11487_v54  ;;  %v13471_v62 = vadd.f32 %v13418_v23, %v12820_v49  ;;  %v11367_v54 = vpack.c.bf16 %v1726_v9, %v1725_v48  ;;  %v1729_v49 = vld [vmem:[#allocation6 + $0x14e0] sm:$0xff] }
 0x3e8   :  { %11327 = vmatprep.subr.bf16.mxu1 %v12199_v0  ;;  %11489 = vmatprep.subr.bf16.mxu0 %v12199_v0 }
 0x3e9   :  { %v13449_v42 = vpop.f32.mrb[92].mxu0  ;;  %v789_v48 = vmul.f32 0.5, %v13471_v62 }
 0x3ea   :  { %v9241_v4 = vpop.f32.mrb[93].mxu0 }
 0x3eb   :  { %11329 = vmatpush3.bf16.msra.mxu1 %v11328_v22  ;;  %11491 = vmatpush3.bf16.msra.mxu0 %v11490_v39  ;;  %v853_v22 = vmul.f32 0.70710677, %v13471_v62  ;;  %v11370_v39 = vpack.c.bf16 %v1728_v56, %v1727_v26  ;;  %v1755_v62 = vld [vmem:[#allocation6 + $0x15b0] sm:$0xff] }
 0x3ec   :  { %11354 = vmatprep.subr.bf16.mxu1 %v12199_v0  ;;  %11492 = vmatprep.subr.bf16.mxu0 %v12199_v0 }
 0x3ed   :  { %12030 = verf.f32 %v853_v22  ;;  %v1863_v22 = vld [vmem:[#allocation6 + $0x1910] sm:$0xff] }
 0x3ee   :  { %9485 = vmatmul.mubr.f32.vlgmr.msra.gmra.mrb[42].mxu1 %v1036_v5  ;;  %v1732_v5 = vld [vmem:[#allocation6 + $0x14f8] sm:$0xff] }
 0x3ef   :  { %11356 = vmatpush3.bf16.msra.mxu1 %v11355_v40  ;;  %11494 = vmatpush3.bf16.msra.mxu0 %v11493_v14  ;;  %v11373_v40 = vpack.c.bf16 %v1730_v16, %v1729_v49  ;;  %v11535_v14 = vpack.c.bf16 %v1838_v57, %v1837_v27  ;;  %v1757_v16 = vld [vmem:[#allocation6 + $0x15c0] sm:$0xff]  ;;  %v1758_v27 = vld [vmem:[#allocation6 + $0x15c8] sm:$0xff] }
 0x3f0   :  { %11357 = vmatprep.subr.bf16.mxu1 %v12199_v0  ;;  %11495 = vmatprep.subr.bf16.mxu0 %v12199_v0  ;;  %v1865_v57 = vld [vmem:[#allocation6 + $0x1920] sm:$0xff] }
 0x3f1   :  { %9554 = vmatprep.mubr.msk.f32.mxu1 %vm12200_vm1, %v13899_v7 }
 0x3f3   :  { %11359 = vmatpush3.bf16.msra.mxu1 %v11358_v32  ;;  %11497 = vmatpush3.bf16.msra.mxu0 %v11496_v25  ;;  %v11538_v32 = vpack.c.bf16 %v1840_v50, %v1839_v63  ;;  %v1749_v25 = vld [vmem:[#allocation6 + $0x1580] sm:$0xff]  ;;  %v1868_v63 = vld [vmem:[#allocation6 + $0x1938] sm:$0xff] }
 0x3f4   :  { %11360 = vmatprep.subr.bf16.mxu1 %v12199_v0  ;;  %11522 = vmatprep.subr.bf16.mxu0 %v12199_v0 }
 0x3f6   :  { %9730 = vmatmul.mubr.f32.vlgmr.msra.gmra.mrb[106].mxu0 %v1043_v6  ;;  %v1038_v6 = vmul.f32 %v974_v34, %v782_v45  ;;  %v1870_v45 = vld [vmem:[#allocation6 + $0x1948] sm:$0xff] }
 0x3f7   :  { %11362 = vmatpush3.bf16.msra.mxu1 %v11361_v17  ;;  %11524 = vmatpush3.bf16.msra.mxu0 %v11523_v60  ;;  %v11403_v17 = vpack.c.bf16 %v1750_v38, %v1749_v25  ;;  %v11541_v60 = vpack.c.bf16 %v1842_v18, %v1841_v53  ;;  %v12031_v31 = vpop.eup %12030  ;;  %v1869_v25 = vld [vmem:[#allocation6 + $0x1940] sm:$0xff] }
 0x3f8   :  { %11363 = vmatprep.subr.bf16.mxu1 %v12199_v0  ;;  %11525 = vmatprep.subr.bf16.mxu0 %v12199_v0  ;;  %v981_v9 = vadd.f32 1.0, %v12031_v31  ;;  %v1781_v31 = vld [vmem:[#allocation6 + $0x1680] sm:$0xff] }
 0x3f9   :  { %9799 = vmatprep.mubr.msk.f32.mxu0 %vm12200_vm1, %v13899_v7 }
 0x3fa   :  { %v1045_v51 = vmul.f32 %v981_v9, %v789_v48  ;;  %v1873_v48 = vld [vmem:[#allocation6 + $0x1960] sm:$0xff]  ;;  %v1874_v9 = vld [vmem:[#allocation6 + $0x1968] sm:$0xff] }
 0x3fb   :  { %11365 = vmatpush3.bf16.msra.mxu1 %v11364_v33  ;;  %11527 = vmatpush3.bf16.msra.mxu0 %v11526_v36  ;;  %v11544_v33 = vpack.c.bf16 %v1844_v37, %v1843_v11  ;;  %v1753_v36 = vld [vmem:[#allocation6 + $0x15a0] sm:$0xff] }
 0x3fc   :  { %11366 = vmatprep.subr.bf16.mxu1 %v12199_v0  ;;  %11528 = vmatprep.subr.bf16.mxu0 %v12199_v0  ;;  %v11409_v26 = vpack.c.bf16 %v1754_v30, %v1753_v36  ;;  %v1782_v36 = vld [vmem:[#allocation6 + $0x1688] sm:$0xff] }
 0x3ff   :  { %11368 = vmatpush3.bf16.msra.mxu1 %v11367_v54  ;;  %11530 = vmatpush3.bf16.msra.mxu0 %v11529_v58  ;;  %v1862_v54 = vld [vmem:[#allocation6 + $0x1908] sm:$0xff]  ;;  %v13498_v58 = vadd.f32 %v13418_v23, %v12798_v44  ;;  %v11412_v44 = vpack.c.bf16 %v1756_v20, %v1755_v62  ;;  %v1875_v62 = vld [vmem:[#allocation6 + $0x1970] sm:$0xff] }
 0x400   :  { %11369 = vmatprep.subr.bf16.mxu1 %v12199_v0  ;;  %11531 = vmatprep.subr.bf16.mxu0 %v12199_v0  ;;  %v11571_v56 = vpack.c.bf16 %v1862_v54, %v1861_v24  ;;  %v11451_v24 = vpack.c.bf16 %v1782_v36, %v1781_v31  ;;  %v11589_v54 = vpack.c.bf16 %v1874_v9, %v1873_v48  ;;  %v1795_v9 = vld [vmem:[#allocation6 + $0x16f0] sm:$0xff] }
 0x401   :  { %v4041_v29 = vpop.f32.mrb[30].mxu1 }
 0x402   :  { %v6591_v55 = vadd.f32 %v13444_v1, %v4041_v29  ;;  %v9066_v4 = vpop.f32.mrb[31].mxu1  ;;  %v11376_v1 = vpack.c.bf16 %v1732_v5, %v1731_v13  ;;  %v1866_v29 = vld [vmem:[#allocation6 + $0x1928] sm:$0xff]  ;;  %v1760_v13 = vld [vmem:[#allocation6 + $0x15d8] sm:$0xff]  ;;  %v1867_v5 = vld [vmem:[#allocation6 + $0x1930] sm:$0xff] }
 0x403   :  { %11371 = vmatpush3.bf16.msra.mxu1 %v11370_v39  ;;  %11533 = vmatpush3.bf16.msra.mxu0 %v11532_v10  ;;  %v1864_v39 = vld [vmem:[#allocation6 + $0x1918] sm:$0xff]  ;;  %v848_v10 = vmul.f32 0.70710677, %v13498_v58  ;;  %v11415_v4 = vpack.c.bf16 %v1758_v27, %v1757_v16  ;;  %v1786_v16 = vld [vmem:[#allocation6 + $0x16a8] sm:$0xff]  ;;  %v1893_v27 = vld [vmem:[#allocation6 + $0x1a00] sm:$0xff] }
 0x404   :  { %11372 = vmatprep.subr.bf16.mxu1 %v12199_v0  ;;  %11534 = vmatprep.subr.bf16.mxu0 %v12199_v0  ;;  %v13482_v43 = vadd.f32 %v6591_v55, %v13371_v61  ;;  %v11574_v49 = vpack.c.bf16 %v1864_v39, %v1863_v22  ;;  %v13509_v55 = vadd.f32 %v13418_v23, %v12834_v15  ;;  %v1761_v15 = vld [vmem:[#allocation6 + $0x15e0] sm:$0xff] }
 0x405   :  { %12032 = verf.f32 %v848_v10  ;;  %v1785_v10 = vld [vmem:[#allocation6 + $0x16a0] sm:$0xff] }
 0x406   :  { %v855_v50 = vmul.f32 0.70710677, %v13509_v55 }
 0x407   :  { %11374 = vmatpush3.bf16.msra.mxu1 %v11373_v40  ;;  %11536 = vmatpush3.bf16.msra.mxu0 %v11535_v14  ;;  %v11577_v40 = vpack.c.bf16 %v1866_v29, %v1865_v57  ;;  %v1759_v14 = vld [vmem:[#allocation6 + $0x15d0] sm:$0xff]  ;;  %v1894_v57 = vld [vmem:[#allocation6 + $0x1a08] sm:$0xff]  ;;  %v13536_v29 = vadd.f32 %v13418_v23, %v12802_v52 }
 0x408   :  { %11375 = vmatprep.subr.bf16.mxu1 %v12199_v0  ;;  %11537 = vmatprep.subr.bf16.mxu0 %v12199_v0  ;;  %v11418_v12 = vpack.c.bf16 %v1760_v13, %v1759_v14  ;;  %12034 = verf.f32 %v855_v50  ;;  %v1788_v13 = vld [vmem:[#allocation6 + $0x16b8] sm:$0xff] }
 0x409   :  { %v13487_v8 = vpop.f32.mrb[94].mxu0  ;;  %v850_v50 = vmul.f32 0.70710677, %v13536_v29 }
 0x40a   :  { %v9311_v61 = vpop.f32.mrb[95].mxu0 }
 0x40b   :  { %11377 = vmatpush3.bf16.msra.mxu1 %v11376_v1  ;;  %11539 = vmatpush3.bf16.msra.mxu0 %v11538_v32  ;;  %v11580_v1 = vpack.c.bf16 %v1868_v63, %v1867_v5  ;;  %v1762_v32 = vld [vmem:[#allocation6 + $0x15e8] sm:$0xff]  ;;  %v11583_v61 = vpack.c.bf16 %v1870_v45, %v1869_v25  ;;  %v1895_v5 = vld [vmem:[#allocation6 + $0x1a10] sm:$0xff]  ;;  %v1896_v63 = vld [vmem:[#allocation6 + $0x1a18] sm:$0xff]  ;;  %12036 = verf.f32 %v850_v50  ;;  %v13547_v45 = vadd.f32 %v13418_v23, %v12839_v21 }
 0x40c   :  { %11402 = vmatprep.subr.bf16.mxu1 %v12199_v0  ;;  %11540 = vmatprep.subr.bf16.mxu0 %v12199_v0  ;;  %v11421_v18 = vpack.c.bf16 %v1762_v32, %v1761_v15  ;;  %v1790_v15 = vld [vmem:[#allocation6 + $0x16c8] sm:$0xff]  ;;  %v1897_v32 = vld [vmem:[#allocation6 + $0x1a20] sm:$0xff] }
 0x40d   :  { %v1898_v25 = vld [vmem:[#allocation6 + $0x1a28] sm:$0xff]  ;;  %v1793_v21 = vld [vmem:[#allocation6 + $0x16e0] sm:$0xff] }
 0x40e   :  { %9555 = vmatmul.mubr.f32.vlgmr.msra.gmra.mrb[44].mxu1 %v1038_v6  ;;  %v1872_v6 = vld [vmem:[#allocation6 + $0x1958] sm:$0xff] }
 0x40f   :  { %11404 = vmatpush3.bf16.msra.mxu1 %v11403_v17  ;;  %11542 = vmatpush3.bf16.msra.mxu0 %v11541_v60  ;;  %v1763_v17 = vld [vmem:[#allocation6 + $0x15f0] sm:$0xff]  ;;  %v1764_v60 = vld [vmem:[#allocation6 + $0x15f8] sm:$0xff]  ;;  %v12033_v11 = vpop.eup %12032  ;;  %v11586_v37 = vpack.c.bf16 %v1872_v6, %v1871_v46 }
 0x410   :  { %11405 = vmatprep.subr.bf16.mxu1 %v12199_v0  ;;  %11543 = vmatprep.subr.bf16.mxu0 %v12199_v0 }
 0x411   :  { %9624 = vmatprep.mubr.msk.f32.mxu1 %vm12200_vm1, %v13899_v7 }
 0x412   :  { %v12035_v20 = vpop.eup %12034 }
 0x413   :  { %11407 = vmatpush3.bf16.msra.mxu1 %v11406_v35  ;;  %11545 = vmatpush3.bf16.msra.mxu0 %v11544_v33  ;;  %v784_v35 = vmul.f32 0.5, %v13498_v58  ;;  %v976_v33 = vadd.f32 1.0, %v12033_v11  ;;  %v1784_v58 = vld [vmem:[#allocation6 + $0x1698] sm:$0xff]  ;;  %v1794_v11 = vld [vmem:[#allocation6 + $0x16e8] sm:$0xff] }
 0x414   :  { %11408 = vmatprep.subr.bf16.mxu1 %v12199_v0  ;;  %11570 = vmatprep.subr.bf16.mxu0 %v12199_v0  ;;  %v11469_v36 = vpack.c.bf16 %v1794_v11, %v1793_v21  ;;  %v1930_v21 = vld [vmem:[#allocation6 + $0x1b28] sm:$0xff]  ;;  %v13585_v11 = vadd.f32 %v13418_v23, %v12851_v41  ;;  %v1825_v41 = vld [vmem:[#allocation6 + $0x17e0] sm:$0xff] }
 0x416   :  { %9800 = vmatmul.mubr.f32.vlgmr.msra.gmra.mrb[108].mxu0 %v1045_v51  ;;  %v1876_v51 = vld [vmem:[#allocation6 + $0x1978] sm:$0xff] }
 0x417   :  { %11410 = vmatpush3.bf16.msra.mxu1 %v11409_v26  ;;  %11572 = vmatpush3.bf16.msra.mxu0 %v11571_v56  ;;  %v1783_v26 = vld [vmem:[#allocation6 + $0x1690] sm:$0xff]  ;;  %v1040_v56 = vmul.f32 %v976_v33, %v784_v35  ;;  %v11592_v39 = vpack.c.bf16 %v1876_v51, %v1875_v62  ;;  %v1813_v62 = vld [vmem:[#allocation6 + $0x1780] sm:$0xff]  ;;  %v786_v51 = vmul.f32 0.5, %v13536_v29  ;;  %v1816_v29 = vld [vmem:[#allocation6 + $0x1798] sm:$0xff] }
 0x418   :  { %11411 = vmatprep.subr.bf16.mxu1 %v12199_v0  ;;  %11573 = vmatprep.subr.bf16.mxu0 %v12199_v0  ;;  %v11454_v22 = vpack.c.bf16 %v1784_v58, %v1783_v26 }
 0x419   :  { %9869 = vmatprep.mubr.msk.f32.mxu0 %vm12200_vm1, %v13899_v7 }
 0x41b   :  { %11413 = vmatpush3.bf16.msra.mxu1 %v11412_v44  ;;  %11575 = vmatpush3.bf16.msra.mxu0 %v11574_v49  ;;  %v791_v44 = vmul.f32 0.5, %v13509_v55  ;;  %v983_v49 = vadd.f32 1.0, %v12035_v20  ;;  %v1787_v55 = vld [vmem:[#allocation6 + $0x16b0] sm:$0xff] }
 0x41c   :  { %11414 = vmatprep.subr.bf16.mxu1 %v12199_v0  ;;  %11576 = vmatprep.subr.bf16.mxu0 %v12199_v0  ;;  %v11460_v52 = vpack.c.bf16 %v1788_v13, %v1787_v55 }
 0x41d   :  { %v1047_v14 = vmul.f32 %v983_v49, %v791_v44 }
 0x41f   :  { %11416 = vmatpush3.bf16.msra.mxu1 %v11415_v4  ;;  %11578 = vmatpush3.bf16.msra.mxu0 %v11577_v40  ;;  %v11457_v4 = vpack.c.bf16 %v1786_v16, %v1785_v10  ;;  %v11619_v40 = vpack.c.bf16 %v1894_v57, %v1893_v27  ;;  %v1906_v10 = vld [vmem:[#allocation6 + $0x1a68] sm:$0xff]  ;;  %v1815_v27 = vld [vmem:[#allocation6 + $0x1790] sm:$0xff] }
 0x420   :  { %11417 = vmatprep.subr.bf16.mxu1 %v12199_v0  ;;  %11579 = vmatprep.subr.bf16.mxu0 %v12199_v0 }
 0x421   :  { %v4181_v34 = vpop.f32.mrb[32].mxu1 }
 0x422   :  { %v6593_v38 = vadd.f32 %v13482_v43, %v4181_v34  ;;  %v9136_v53 = vpop.f32.mrb[33].mxu1  ;;  %v11424_v43 = vpack.c.bf16 %v1764_v60, %v1763_v17  ;;  %v1900_v17 = vld [vmem:[#allocation6 + $0x1a38] sm:$0xff]  ;;  %v857_v60 = vmul.f32 0.70710677, %v13547_v45 }
 0x423   :  { %11419 = vmatpush3.bf16.msra.mxu1 %v11418_v12  ;;  %11581 = vmatpush3.bf16.msra.mxu0 %v11580_v1  ;;  %v11622_v12 = vpack.c.bf16 %v1896_v63, %v1895_v5  ;;  %v1789_v1 = vld [vmem:[#allocation6 + $0x16c0] sm:$0xff]  ;;  %v1791_v53 = vld [vmem:[#allocation6 + $0x16d0] sm:$0xff]  ;;  %v793_v63 = vmul.f32 0.5, %v13547_v45 }
 0x424   :  { %11420 = vmatprep.subr.bf16.mxu1 %v12199_v0  ;;  %11582 = vmatprep.subr.bf16.mxu0 %v12199_v0  ;;  %v13520_v47 = vadd.f32 %v6593_v38, %v13409_v19  ;;  %v11463_v34 = vpack.c.bf16 %v1790_v15, %v1789_v1  ;;  %v11625_v38 = vpack.c.bf16 %v1898_v25, %v1897_v32  ;;  %12038 = verf.f32 %v857_v60  ;;  %v1817_v5 = vld [vmem:[#allocation6 + $0x17a0] sm:$0xff]  ;;  %v1926_v1 = vld [vmem:[#allocation6 + $0x1b08] sm:$0xff]  ;;  %v1819_v45 = vld [vmem:[#allocation6 + $0x17b0] sm:$0xff] }
 0x425   :  { %v13574_v15 = vadd.f32 %v13418_v23, %v12809_v2  ;;  %v1821_v60 = vld [vmem:[#allocation6 + $0x17c0] sm:$0xff]  ;;  %v1826_v23 = vld [vmem:[#allocation6 + $0x17e8] sm:$0xff] }
 0x427   :  { %11422 = vmatpush3.bf16.msra.mxu1 %v11421_v18  ;;  %11584 = vmatpush3.bf16.msra.mxu0 %v11583_v61  ;;  %v1792_v18 = vld [vmem:[#allocation6 + $0x16d8] sm:$0xff]  ;;  %v1899_v61 = vld [vmem:[#allocation6 + $0x1a30] sm:$0xff] }
 0x428   :  { %11423 = vmatprep.subr.bf16.mxu1 %v12199_v0  ;;  %11585 = vmatprep.subr.bf16.mxu0 %v12199_v0  ;;  %v11466_v46 = vpack.c.bf16 %v1792_v18, %v1791_v53  ;;  %v11628_v6 = vpack.c.bf16 %v1900_v17, %v1899_v61  ;;  %v1927_v53 = vld [vmem:[#allocation6 + $0x1b10] sm:$0xff]  ;;  %v1928_v18 = vld [vmem:[#allocation6 + $0x1b18] sm:$0xff]  ;;  %v852_v61 = vmul.f32 0.70710677, %v13574_v15 }
 0x429   :  { %v13525_v30 = vpop.f32.mrb[96].mxu0  ;;  %v11670_v17 = vpack.c.bf16 %v1928_v18, %v1927_v53  ;;  %v1850_v53 = vld [vmem:[#allocation6 + $0x18a8] sm:$0xff]  ;;  %v1957_v18 = vld [vmem:[#allocation6 + $0x1c00] sm:$0xff] }
 0x42a   :  { %v9381_v19 = vpop.f32.mrb[97].mxu0  ;;  %12040 = verf.f32 %v852_v61  ;;  %v1958_v61 = vld [vmem:[#allocation6 + $0x1c08] sm:$0xff] }
 0x42b   :  { %11425 = vmatpush3.bf16.msra.mxu1 %v11424_v43  ;;  %11587 = vmatpush3.bf16.msra.mxu0 %v11586_v37  ;;  %v1901_v43 = vld [vmem:[#allocation6 + $0x1a40] sm:$0xff]  ;;  %v1902_v37 = vld [vmem:[#allocation6 + $0x1a48] sm:$0xff]  ;;  %v1796_v19 = vld [vmem:[#allocation6 + $0x16f8] sm:$0xff] }
 0x42c   :  { %11450 = vmatprep.subr.bf16.mxu1 %v12199_v0  ;;  %11588 = vmatprep.subr.bf16.mxu0 %v12199_v0  ;;  %v11631_v48 = vpack.c.bf16 %v1902_v37, %v1901_v43 }
 0x42e   :  { %9625 = vmatmul.mubr.f32.vlgmr.msra.gmra.mrb[46].mxu1 %v1040_v56  ;;  %v12037_v56 = vpop.eup %12036 }
 0x42f   :  { %11452 = vmatpush3.bf16.msra.mxu1 %v11451_v24  ;;  %11590 = vmatpush3.bf16.msra.mxu0 %v11589_v54  ;;  %v1903_v24 = vld [vmem:[#allocation6 + $0x1a50] sm:$0xff]  ;;  %v1904_v54 = vld [vmem:[#allocation6 + $0x1a58] sm:$0xff]  ;;  %v978_v20 = vadd.f32 1.0, %v12037_v56  ;;  %v12039_v55 = vpop.eup %12038 }
 0x430   :  { %11453 = vmatprep.subr.bf16.mxu1 %v12199_v0  ;;  %11591 = vmatprep.subr.bf16.mxu0 %v12199_v0  ;;  %v11634_v58 = vpack.c.bf16 %v1904_v54, %v1903_v24  ;;  %v985_v50 = vadd.f32 1.0, %v12039_v55  ;;  %v1933_v24 = vld [vmem:[#allocation6 + $0x1b40] sm:$0xff]  ;;  %v1934_v54 = vld [vmem:[#allocation6 + $0x1b48] sm:$0xff] }
 0x431   :  { %9694 = vmatprep.mubr.msk.f32.mxu1 %vm12200_vm1, %v13899_v7  ;;  %v1042_v57 = vmul.f32 %v978_v20, %v786_v51  ;;  %v11679_v51 = vpack.c.bf16 %v1934_v54, %v1933_v24  ;;  %v1827_v20 = vld [vmem:[#allocation6 + $0x17f0] sm:$0xff]  ;;  %v1938_v55 = vld [vmem:[#allocation6 + $0x1b68] sm:$0xff]  ;;  %v1856_v54 = vld [vmem:[#allocation6 + $0x18d8] sm:$0xff] }
 0x432   :  { %v1855_v24 = vld [vmem:[#allocation6 + $0x18d0] sm:$0xff] }
 0x433   :  { %11455 = vmatpush3.bf16.msra.mxu1 %v11454_v22  ;;  %11593 = vmatpush3.bf16.msra.mxu0 %v11592_v39  ;;  %v1814_v22 = vld [vmem:[#allocation6 + $0x1788] sm:$0xff]  ;;  %v1905_v39 = vld [vmem:[#allocation6 + $0x1a60] sm:$0xff] }
 0x434   :  { %11456 = vmatprep.subr.bf16.mxu1 %v12199_v0  ;;  %11618 = vmatprep.subr.bf16.mxu0 %v12199_v0  ;;  %v11499_v49 = vpack.c.bf16 %v1814_v22, %v1813_v62  ;;  %v11637_v16 = vpack.c.bf16 %v1906_v10, %v1905_v39  ;;  %v11517_v62 = vpack.c.bf16 %v1826_v23, %v1825_v41  ;;  %v1828_v22 = vld [vmem:[#allocation6 + $0x17f8] sm:$0xff]  ;;  %v1935_v39 = vld [vmem:[#allocation6 + $0x1b50] sm:$0xff] }
 0x435   :  { %v1936_v10 = vld [vmem:[#allocation6 + $0x1b58] sm:$0xff] }
 0x436   :  { %9870 = vmatmul.mubr.f32.vlgmr.msra.gmra.mrb[110].mxu0 %v1047_v14  ;;  %v11502_v14 = vpack.c.bf16 %v1816_v29, %v1815_v27  ;;  %v1845_v27 = vld [vmem:[#allocation6 + $0x1880] sm:$0xff] }
 0x437   :  { %11458 = vmatpush3.bf16.msra.mxu1 %v11457_v4  ;;  %11620 = vmatpush3.bf16.msra.mxu0 %v11619_v40  ;;  %v1907_v4 = vld [vmem:[#allocation6 + $0x1a70] sm:$0xff]  ;;  %v1908_v40 = vld [vmem:[#allocation6 + $0x1a78] sm:$0xff] }
 0x438   :  { %11459 = vmatprep.subr.bf16.mxu1 %v12199_v0  ;;  %11621 = vmatprep.subr.bf16.mxu0 %v12199_v0  ;;  %v11640_v13 = vpack.c.bf16 %v1908_v40, %v1907_v4  ;;  %v1846_v4 = vld [vmem:[#allocation6 + $0x1888] sm:$0xff]  ;;  %v1937_v40 = vld [vmem:[#allocation6 + $0x1b60] sm:$0xff] }
 0x439   :  { %9939 = vmatprep.mubr.msk.f32.mxu0 %vm12200_vm1, %v13899_v7 }
 0x43b   :  { %11461 = vmatpush3.bf16.msra.mxu1 %v11460_v52  ;;  %11623 = vmatpush3.bf16.msra.mxu0 %v11622_v12  ;;  %v1818_v52 = vld [vmem:[#allocation6 + $0x17a8] sm:$0xff]  ;;  %v1925_v12 = vld [vmem:[#allocation6 + $0x1b00] sm:$0xff] }
 0x43c   :  { %11462 = vmatprep.subr.bf16.mxu1 %v12199_v0  ;;  %11624 = vmatprep.subr.bf16.mxu0 %v12199_v0  ;;  %v11505_v32 = vpack.c.bf16 %v1818_v52, %v1817_v5  ;;  %v11667_v25 = vpack.c.bf16 %v1926_v1, %v1925_v12  ;;  %v11685_v5 = vpack.c.bf16 %v1938_v55, %v1937_v40  ;;  %v1848_v52 = vld [vmem:[#allocation6 + $0x1898] sm:$0xff]  ;;  %v1939_v12 = vld [vmem:[#allocation6 + $0x1b70] sm:$0xff] }
 0x43d   :  { %v1940_v1 = vld [vmem:[#allocation6 + $0x1b78] sm:$0xff] }
 0x43e   :  { %v1968_v40 = vld [vmem:[#allocation6 + $0x1c58] sm:$0xff] }
 0x43f   :  { %11464 = vmatpush3.bf16.msra.mxu1 %v11463_v34  ;;  %11626 = vmatpush3.bf16.msra.mxu0 %v11625_v38  ;;  %v1049_v34 = vmul.f32 %v985_v50, %v793_v63  ;;  %v1820_v38 = vld [vmem:[#allocation6 + $0x17b8] sm:$0xff]  ;;  %v1847_v63 = vld [vmem:[#allocation6 + $0x1890] sm:$0xff] }
 0x440   :  { %11465 = vmatprep.subr.bf16.mxu1 %v12199_v0  ;;  %11627 = vmatprep.subr.bf16.mxu0 %v12199_v0  ;;  %v11508_v2 = vpack.c.bf16 %v1820_v38, %v1819_v45  ;;  %v1849_v45 = vld [vmem:[#allocation6 + $0x18a0] sm:$0xff] }
 0x441   :  { %v4321_v31 = vpop.f32.mrb[34].mxu1 }
 0x442   :  { %v6595_v35 = vadd.f32 %v13520_v47, %v4321_v31  ;;  %v9206_v33 = vpop.f32.mrb[35].mxu1  ;;  %v11472_v47 = vpack.c.bf16 %v1796_v19, %v1795_v9  ;;  %v1823_v31 = vld [vmem:[#allocation6 + $0x17d0] sm:$0xff] }
 0x443   :  { %11467 = vmatpush3.bf16.msra.mxu1 %v11466_v46  ;;  %11629 = vmatpush3.bf16.msra.mxu0 %v11628_v6  ;;  %v1822_v46 = vld [vmem:[#allocation6 + $0x17c8] sm:$0xff]  ;;  %v1929_v6 = vld [vmem:[#allocation6 + $0x1b20] sm:$0xff]  ;;  %v1931_v33 = vld [vmem:[#allocation6 + $0x1b30] sm:$0xff] }
 0x444   :  { %11468 = vmatprep.subr.bf16.mxu1 %v12199_v0  ;;  %11630 = vmatprep.subr.bf16.mxu0 %v12199_v0  ;;  %v13558_v26 = vadd.f32 %v6595_v35, %v13449_v42  ;;  %v11511_v43 = vpack.c.bf16 %v1822_v46, %v1821_v60  ;;  %v11673_v37 = vpack.c.bf16 %v1930_v21, %v1929_v6  ;;  %v1824_v35 = vld [vmem:[#allocation6 + $0x17d8] sm:$0xff]  ;;  %v1851_v6 = vld [vmem:[#allocation6 + $0x18b0] sm:$0xff] }
 0x445   :  { %v11514_v9 = vpack.c.bf16 %v1824_v35, %v1823_v31  ;;  %v11553_v60 = vpack.c.bf16 %v1850_v53, %v1849_v45  ;;  %v11715_v46 = vpack.c.bf16 %v1958_v61, %v1957_v18  ;;  %v1879_v45 = vld [vmem:[#allocation6 + $0x1990] sm:$0xff]  ;;  %v1972_v18 = vld [vmem:[#allocation6 + $0x1c78] sm:$0xff] }
 0x446   :  { %v1971_v53 = vld [vmem:[#allocation6 + $0x1c70] sm:$0xff] }
 0x447   :  { %11470 = vmatpush3.bf16.msra.mxu1 %v11469_v36  ;;  %11632 = vmatpush3.bf16.msra.mxu0 %v11631_v48  ;;  %v1932_v36 = vld [vmem:[#allocation6 + $0x1b38] sm:$0xff]  ;;  %v859_v48 = vmul.f32 0.70710677, %v13585_v11 }
 0x448   :  { %11471 = vmatprep.subr.bf16.mxu1 %v12199_v0  ;;  %11633 = vmatprep.subr.bf16.mxu0 %v12199_v0  ;;  %v11676_v19 = vpack.c.bf16 %v1932_v36, %v1931_v33  ;;  %v1853_v33 = vld [vmem:[#allocation6 + $0x18c0] sm:$0xff]  ;;  %v1854_v36 = vld [vmem:[#allocation6 + $0x18c8] sm:$0xff] }
 0x449   :  { %v13563_v44 = vpop.f32.mrb[98].mxu0  ;;  %12042 = verf.f32 %v859_v48  ;;  %v1961_v48 = vld [vmem:[#allocation6 + $0x1c20] sm:$0xff]  ;;  %v11559_v41 = vpack.c.bf16 %v1854_v36, %v1853_v33  ;;  %v1883_v33 = vld [vmem:[#allocation6 + $0x19b0] sm:$0xff] }
 0x44a   :  { %v9451_v42 = vpop.f32.mrb[99].mxu0 }
 0x44b   :  { %11473 = vmatpush3.bf16.msra.mxu1 %v11472_v47  ;;  %11635 = vmatpush3.bf16.msra.mxu0 %v11634_v58 }
 0x44c   :  { %11498 = vmatprep.subr.bf16.mxu1 %v12199_v0  ;;  %11636 = vmatprep.subr.bf16.mxu0 %v12199_v0 }
 0x44e   :  { %9695 = vmatmul.mubr.f32.vlgmr.msra.gmra.mrb[48].mxu1 %v1042_v57  ;;  %v788_v57 = vmul.f32 0.5, %v13574_v15 }
 0x44f   :  { %11500 = vmatpush3.bf16.msra.mxu1 %v11499_v49  ;;  %11638 = vmatpush3.bf16.msra.mxu0 %v11637_v16  ;;  %v12041_v49 = vpop.eup %12040  ;;  %v11682_v16 = vpack.c.bf16 %v1936_v10, %v1935_v39  ;;  %v1966_v39 = vld [vmem:[#allocation6 + $0x1c48] sm:$0xff] }
 0x450   :  { %11501 = vmatprep.subr.bf16.mxu1 %v12199_v0  ;;  %11639 = vmatprep.subr.bf16.mxu0 %v12199_v0  ;;  %v980_v29 = vadd.f32 1.0, %v12041_v49 }
 0x451   :  { %9764 = vmatprep.mubr.msk.f32.mxu1 %vm12200_vm1, %v13899_v7 }
 0x452   :  { %v1044_v50 = vmul.f32 %v980_v29, %v788_v57  ;;  %v1859_v57 = vld [vmem:[#allocation6 + $0x18f0] sm:$0xff]  ;;  %v1860_v29 = vld [vmem:[#allocation6 + $0x18f8] sm:$0xff] }
 0x453   :  { %11503 = vmatpush3.bf16.msra.mxu1 %v11502_v14  ;;  %11641 = vmatpush3.bf16.msra.mxu0 %v11640_v13  ;;  %v11547_v13 = vpack.c.bf16 %v1846_v4, %v1845_v27  ;;  %v12043_v15 = vpop.eup %12042  ;;  %v1967_v4 = vld [vmem:[#allocation6 + $0x1c50] sm:$0xff] }
 0x454   :  { %11504 = vmatprep.subr.bf16.mxu1 %v12199_v0  ;;  %11666 = vmatprep.subr.bf16.mxu0 %v12199_v0  ;;  %v987_v38 = vadd.f32 1.0, %v12043_v15 }
 0x456   :  { %9940 = vmatmul.mubr.f32.vlgmr.msra.gmra.mrb[112].mxu0 %v1049_v34  ;;  %v795_v34 = vmul.f32 0.5, %v13585_v11  ;;  %v1852_v11 = vld [vmem:[#allocation6 + $0x18b8] sm:$0xff] }
 0x457   :  { %11506 = vmatpush3.bf16.msra.mxu1 %v11505_v32  ;;  %11668 = vmatpush3.bf16.msra.mxu0 %v11667_v25  ;;  %v11550_v32 = vpack.c.bf16 %v1848_v52, %v1847_v63  ;;  %v11688_v25 = vpack.c.bf16 %v1940_v1, %v1939_v12  ;;  %v1878_v52 = vld [vmem:[#allocation6 + $0x1988] sm:$0xff]  ;;  %v1969_v12 = vld [vmem:[#allocation6 + $0x1c60] sm:$0xff] }
 0x458   :  { %11507 = vmatprep.subr.bf16.mxu1 %v12199_v0  ;;  %11669 = vmatprep.subr.bf16.mxu0 %v12199_v0  ;;  %v1051_v21 = vmul.f32 %v987_v38, %v795_v34  ;;  %v1970_v1 = vld [vmem:[#allocation6 + $0x1c68] sm:$0xff]  ;;  %v1880_v38 = vld [vmem:[#allocation6 + $0x1998] sm:$0xff] }
 0x459   :  { %10009 = vmatprep.mubr.msk.f32.mxu0 %vm12200_vm1, %v13899_v7 }
 0x45b   :  { %11509 = vmatpush3.bf16.msra.mxu1 %v11508_v2  ;;  %11671 = vmatpush3.bf16.msra.mxu0 %v11670_v17  ;;  %v13610_v2 = vld [vmem:[#allocation4] ss:$0 sm:$0xff] }
 0x45c   :  { %11510 = vmatprep.subr.bf16.mxu1 %v12199_v0  ;;  %11672 = vmatprep.subr.bf16.mxu0 %v12199_v0  ;;  %v13614_v17 = vadd.f32 %v13610_v2, %v12816_v28  ;;  %v11556_v28 = vpack.c.bf16 %v1852_v11, %v1851_v6  ;;  %v1882_v11 = vld [vmem:[#allocation6 + $0x19a8] sm:$0xff] }
 0x45e   :  { %v854_v31 = vmul.f32 0.70710677, %v13614_v17  ;;  %v790_v63 = vmul.f32 0.5, %v13614_v17  ;;  %v11598_v17 = vpack.c.bf16 %v1880_v38, %v1879_v45  ;;  %v1910_v38 = vld [vmem:[#allocation6 + $0x1a88] sm:$0xff] }
 0x45f   :  { %11512 = vmatpush3.bf16.msra.mxu1 %v11511_v43  ;;  %11674 = vmatpush3.bf16.msra.mxu0 %v11673_v37  ;;  %v1959_v43 = vld [vmem:[#allocation6 + $0x1c10] sm:$0xff]  ;;  %v1960_v37 = vld [vmem:[#allocation6 + $0x1c18] sm:$0xff] }
 0x460   :  { %11513 = vmatprep.subr.bf16.mxu1 %v12199_v0  ;;  %11675 = vmatprep.subr.bf16.mxu0 %v12199_v0  ;;  %v11718_v35 = vpack.c.bf16 %v1960_v37, %v1959_v43  ;;  %12044 = verf.f32 %v854_v31  ;;  %v1989_v43 = vld [vmem:[#allocation6 + $0x1d00] sm:$0xff]  ;;  %v1990_v37 = vld [vmem:[#allocation6 + $0x1d08] sm:$0xff]  ;;  %v13652_v31 = vadd.f32 %v13610_v2, %v12830_v3 }
 0x461   :  { %v4461_v56 = vpop.f32.mrb[36].mxu1 }
 0x462   :  { %v6597_v47 = vadd.f32 %v13558_v26, %v4461_v56  ;;  %v9276_v58 = vpop.f32.mrb[37].mxu1  ;;  %v11520_v26 = vpack.c.bf16 %v1828_v22, %v1827_v20  ;;  %v1963_v56 = vld [vmem:[#allocation6 + $0x1c30] sm:$0xff]  ;;  %v1858_v20 = vld [vmem:[#allocation6 + $0x18e8] sm:$0xff]  ;;  %v1965_v22 = vld [vmem:[#allocation6 + $0x1c40] sm:$0xff]  ;;  %v792_v45 = vmul.f32 0.5, %v13652_v31 }
 0x463   :  { %11515 = vmatpush3.bf16.msra.mxu1 %v11514_v9  ;;  %11677 = vmatpush3.bf16.msra.mxu0 %v11676_v19  ;;  %v1962_v9 = vld [vmem:[#allocation6 + $0x1c28] sm:$0xff]  ;;  %v13625_v19 = vadd.f32 %v13610_v2, %v12855_v59  ;;  %v1857_v59 = vld [vmem:[#allocation6 + $0x18e0] sm:$0xff]  ;;  %v11727_v27 = vpack.c.bf16 %v1966_v39, %v1965_v22  ;;  %v1888_v22 = vld [vmem:[#allocation6 + $0x19d8] sm:$0xff] }
 0x464   :  { %11516 = vmatprep.subr.bf16.mxu1 %v12199_v0  ;;  %11678 = vmatprep.subr.bf16.mxu0 %v12199_v0  ;;  %v13596_v42 = vadd.f32 %v6597_v47, %v13487_v8  ;;  %v11721_v23 = vpack.c.bf16 %v1962_v9, %v1961_v48  ;;  %v1964_v47 = vld [vmem:[#allocation6 + $0x1c38] sm:$0xff]  ;;  %v1991_v9 = vld [vmem:[#allocation6 + $0x1d10] sm:$0xff] }
 0x465   :  { %v861_v58 = vmul.f32 0.70710677, %v13625_v19  ;;  %v797_v6 = vmul.f32 0.5, %v13625_v19  ;;  %v1884_v48 = vld [vmem:[#allocation6 + $0x19b8] sm:$0xff]  ;;  %v1995_v39 = vld [vmem:[#allocation6 + $0x1d30] sm:$0xff] }
 0x466   :  { %v1992_v19 = vld [vmem:[#allocation6 + $0x1d18] sm:$0xff]  ;;  %v11604_v3 = vpack.c.bf16 %v1884_v48, %v1883_v33  ;;  %v1914_v48 = vld [vmem:[#allocation6 + $0x1aa8] sm:$0xff] }
 0x467   :  { %11518 = vmatpush3.bf16.msra.mxu1 %v11517_v62  ;;  %11680 = vmatpush3.bf16.msra.mxu0 %v11679_v51  ;;  %v11562_v62 = vpack.c.bf16 %v1856_v54, %v1855_v24  ;;  %v11724_v51 = vpack.c.bf16 %v1964_v47, %v1963_v56  ;;  %12046 = verf.f32 %v861_v58  ;;  %v1885_v24 = vld [vmem:[#allocation6 + $0x19c0] sm:$0xff]  ;;  %v1886_v54 = vld [vmem:[#allocation6 + $0x19c8] sm:$0xff] }
 0x468   :  { %11519 = vmatprep.subr.bf16.mxu1 %v12199_v0  ;;  %11681 = vmatprep.subr.bf16.mxu0 %v12199_v0  ;;  %v1993_v56 = vld [vmem:[#allocation6 + $0x1d20] sm:$0xff]  ;;  %v1994_v47 = vld [vmem:[#allocation6 + $0x1d28] sm:$0xff] }
 0x469   :  { %v13601_v14 = vpop.f32.mrb[100].mxu0  ;;  %v13900_v58 = vld [vmem:[#allocation17_spill] sm:$0xff] }
 0x46a   :  { %v9521_v8 = vpop.f32.mrb[101].mxu0 }
 0x46b   :  { %11521 = vmatpush3.bf16.msra.mxu1 %v11520_v26  ;;  %11683 = vmatpush3.bf16.msra.mxu0 %v11682_v16  ;;  %v11565_v16 = vpack.c.bf16 %v1858_v20, %v1857_v59  ;;  %v12045_v8 = vpop.eup %12044  ;;  %v11769_v59 = vpack.c.bf16 %v1994_v47, %v1993_v56  ;;  %v1887_v20 = vld [vmem:[#allocation6 + $0x19d0] sm:$0xff]  ;;  %v1916_v47 = vld [vmem:[#allocation6 + $0x1ab8] sm:$0xff] }
 0x46c   :  { %11546 = vmatprep.subr.bf16.mxu1 %v12199_v0  ;;  %11684 = vmatprep.subr.bf16.mxu0 %v12199_v0 }
 0x46e   :  { %9765 = vmatmul.mubr.f32.vlgmr.msra.gmra.mrb[50].mxu1 %v1044_v50  ;;  %v982_v50 = vadd.f32 1.0, %v12045_v8 }
 0x46f   :  { %11548 = vmatpush3.bf16.msra.mxu1 %v11547_v13  ;;  %11686 = vmatpush3.bf16.msra.mxu0 %v11685_v5  ;;  %v11730_v13 = vpack.c.bf16 %v1968_v40, %v1967_v4  ;;  %v1877_v5 = vld [vmem:[#allocation6 + $0x1980] sm:$0xff]  ;;  %v1998_v4 = vld [vmem:[#allocation6 + $0x1d48] sm:$0xff] }
 0x470   :  { %11549 = vmatprep.subr.bf16.mxu1 %v12199_v0  ;;  %11687 = vmatprep.subr.bf16.mxu0 %v12199_v0  ;;  %v1046_v34 = vmul.f32 %v982_v50, %v790_v63  ;;  %v1891_v63 = vld [vmem:[#allocation6 + $0x19f0] sm:$0xff]  ;;  %v1892_v50 = vld [vmem:[#allocation6 + $0x19f8] sm:$0xff] }
 0x471   :  { %9834 = vmatprep.mubr.msk.f32.mxu1 %vm12200_vm1, %v13899_v7  ;;  %v12047_v61 = vpop.eup %12046 }
 0x473   :  { %11551 = vmatpush3.bf16.msra.mxu1 %v11550_v32  ;;  %11689 = vmatpush3.bf16.msra.mxu0 %v11688_v25  ;;  %v11595_v32 = vpack.c.bf16 %v1878_v52, %v1877_v5  ;;  %v11733_v25 = vpack.c.bf16 %v1970_v1, %v1969_v12  ;;  %v1999_v52 = vld [vmem:[#allocation6 + $0x1d50] sm:$0xff]  ;;  %v2000_v12 = vld [vmem:[#allocation6 + $0x1d58] sm:$0xff] }
 0x474   :  { %11552 = vmatprep.subr.bf16.mxu1 %v12199_v0  ;;  %11714 = vmatprep.subr.bf16.mxu0 %v12199_v0 }
 0x476   :  { %10010 = vmatmul.mubr.f32.vlgmr.msra.gmra.mrb[114].mxu0 %v1051_v21  ;;  %v989_v21 = vadd.f32 1.0, %v12047_v61 }
 0x477   :  { %11554 = vmatpush3.bf16.msra.mxu1 %v11553_v60  ;;  %11716 = vmatpush3.bf16.msra.mxu0 %v11715_v46  ;;  %v11736_v60 = vpack.c.bf16 %v1972_v18, %v1971_v53  ;;  %v1881_v46 = vld [vmem:[#allocation6 + $0x19a0] sm:$0xff]  ;;  %v2002_v18 = vld [vmem:[#allocation6 + $0x1d68] sm:$0xff] }
 0x478   :  { %11555 = vmatprep.subr.bf16.mxu1 %v12199_v0  ;;  %11717 = vmatprep.subr.bf16.mxu0 %v12199_v0  ;;  %v1053_v36 = vmul.f32 %v989_v21, %v797_v6  ;;  %v2001_v53 = vld [vmem:[#allocation6 + $0x1d60] sm:$0xff]  ;;  %v1912_v21 = vld [vmem:[#allocation6 + $0x1a98] sm:$0xff] }
 0x479   :  { %10079 = vmatprep.mubr.msk.f32.mxu0 %vm12200_vm1, %v13899_v7 }
 0x47b   :  { %11557 = vmatpush3.bf16.msra.mxu1 %v11556_v28  ;;  %11719 = vmatpush3.bf16.msra.mxu0 %v11718_v35  ;;  %v11601_v28 = vpack.c.bf16 %v1882_v11, %v1881_v46  ;;  %v11763_v35 = vpack.c.bf16 %v1990_v37, %v1989_v43  ;;  %v1911_v46 = vld [vmem:[#allocation6 + $0x1a90] sm:$0xff]  ;;  %v2004_v43 = vld [vmem:[#allocation6 + $0x1d78] sm:$0xff] }
 0x47c   :  { %11558 = vmatprep.subr.bf16.mxu1 %v12199_v0  ;;  %11720 = vmatprep.subr.bf16.mxu0 %v12199_v0  ;;  %v2003_v11 = vld [vmem:[#allocation6 + $0x1d70] sm:$0xff] }
 0x47f   :  { %11560 = vmatpush3.bf16.msra.mxu1 %v11559_v41  ;;  %11722 = vmatpush3.bf16.msra.mxu0 %v11721_v23  ;;  %v856_v41 = vmul.f32 0.70710677, %v13652_v31  ;;  %v11766_v23 = vpack.c.bf16 %v1992_v19, %v1991_v9  ;;  %v11646_v31 = vpack.c.bf16 %v1912_v21, %v1911_v46  ;;  %v2021_v9 = vld [vmem:[#allocation6 + $0x1e00] sm:$0xff]  ;;  %v2022_v19 = vld [vmem:[#allocation6 + $0x1e08] sm:$0xff] }
 0x480   :  { %11561 = vmatprep.subr.bf16.mxu1 %v12199_v0  ;;  %11723 = vmatprep.subr.bf16.mxu0 %v12199_v0  ;;  %v1941_v46 = vld [vmem:[#allocation6 + $0x1b80] sm:$0xff] }
 0x481   :  { %v4601_v10 = vpop.f32.mrb[38].mxu1  ;;  %12048 = verf.f32 %v856_v41  ;;  %v13901_v41 = vld [vmem:[#allocation13_spill] sm:$0xff] }
 0x482   :  { %v6599_v49 = vadd.f32 %v13596_v42, %v4601_v10  ;;  %v9346_v26 = vpop.f32.mrb[39].mxu1  ;;  %v11568_v42 = vpack.c.bf16 %v1860_v29, %v1859_v57  ;;  %v1996_v10 = vld [vmem:[#allocation6 + $0x1d38] sm:$0xff]  ;;  %v1890_v57 = vld [vmem:[#allocation6 + $0x19e8] sm:$0xff]  ;;  %v1997_v29 = vld [vmem:[#allocation6 + $0x1d40] sm:$0xff] }
 0x483   :  { %11563 = vmatpush3.bf16.msra.mxu1 %v11562_v62  ;;  %11725 = vmatpush3.bf16.msra.mxu0 %v11724_v51  ;;  %v13663_v62 = vadd.f32 %v13610_v2, %v13900_v58  ;;  %v11607_v51 = vpack.c.bf16 %v1886_v54, %v1885_v24  ;;  %v11610_v26 = vpack.c.bf16 %v1888_v22, %v1887_v20  ;;  %v1915_v54 = vld [vmem:[#allocation6 + $0x1ab0] sm:$0xff]  ;;  %v1917_v22 = vld [vmem:[#allocation6 + $0x1ac0] sm:$0xff] }
 0x484   :  { %11564 = vmatprep.subr.bf16.mxu1 %v12199_v0  ;;  %11726 = vmatprep.subr.bf16.mxu0 %v12199_v0  ;;  %v13636_v55 = vadd.f32 %v6599_v49, %v13525_v30  ;;  %v11775_v5 = vpack.c.bf16 %v1998_v4, %v1997_v29  ;;  %v11811_v24 = vpack.c.bf16 %v2022_v19, %v2021_v9  ;;  %v2023_v58 = vld [vmem:[#allocation6 + $0x1e10] sm:$0xff]  ;;  %v1920_v4 = vld [vmem:[#allocation6 + $0x1ad8] sm:$0xff] }
 0x485   :  { %v863_v49 = vmul.f32 0.70710677, %v13663_v62  ;;  %v799_v33 = vmul.f32 0.5, %v13663_v62  ;;  %v2024_v62 = vld [vmem:[#allocation6 + $0x1e18] sm:$0xff]  ;;  %v1919_v29 = vld [vmem:[#allocation6 + $0x1ad0] sm:$0xff] }
 0x486   :  { %v11814_v20 = vpack.c.bf16 %v2024_v62, %v2023_v58  ;;  %v2035_v9 = vld [vmem:[#allocation6 + $0x1e70] sm:$0xff]  ;;  %v2036_v19 = vld [vmem:[#allocation6 + $0x1e78] sm:$0xff]  ;;  %v2053_v58 = vld [vmem:[#allocation6 + $0x1f00] sm:$0xff] }
 0x487   :  { %11566 = vmatpush3.bf16.msra.mxu1 %v11565_v16  ;;  %11728 = vmatpush3.bf16.msra.mxu0 %v11727_v27  ;;  %v11772_v16 = vpack.c.bf16 %v1996_v10, %v1995_v39  ;;  %v1889_v27 = vld [vmem:[#allocation6 + $0x19e0] sm:$0xff]  ;;  %12050 = verf.f32 %v863_v49  ;;  %v1918_v39 = vld [vmem:[#allocation6 + $0x1ac8] sm:$0xff] }
 0x488   :  { %11567 = vmatprep.subr.bf16.mxu1 %v12199_v0  ;;  %11729 = vmatprep.subr.bf16.mxu0 %v12199_v0  ;;  %v2025_v10 = vld [vmem:[#allocation6 + $0x1e20] sm:$0xff]  ;;  %v2026_v49 = vld [vmem:[#allocation6 + $0x1e28] sm:$0xff] }
 0x489   :  { %v13641_v15 = vpop.f32.mrb[102].mxu0  ;;  %v2054_v62 = vld [vmem:[#allocation6 + $0x1f08] sm:$0xff] }
 0x48a   :  { %v9591_v30 = vpop.f32.mrb[103].mxu0 }
 0x48b   :  { %11569 = vmatpush3.bf16.msra.mxu1 %v11568_v42  ;;  %11731 = vmatpush3.bf16.msra.mxu0 %v11730_v13  ;;  %v11613_v13 = vpack.c.bf16 %v1890_v57, %v1889_v27  ;;  %v12049_v30 = vpop.eup %12048  ;;  %v11655_v27 = vpack.c.bf16 %v1918_v39, %v1917_v22  ;;  %v11817_v57 = vpack.c.bf16 %v2026_v49, %v2025_v10  ;;  %v1947_v39 = vld [vmem:[#allocation6 + $0x1bb0] sm:$0xff]  ;;  %v1948_v49 = vld [vmem:[#allocation6 + $0x1bb8] sm:$0xff] }
 0x48c   :  { %11594 = vmatprep.subr.bf16.mxu1 %v12199_v0  ;;  %11732 = vmatprep.subr.bf16.mxu0 %v12199_v0  ;;  %v11859_v22 = vpack.c.bf16 %v2054_v62, %v2053_v58  ;;  %v2067_v58 = vld [vmem:[#allocation6 + $0x1f70] sm:$0xff]  ;;  %v2068_v62 = vld [vmem:[#allocation6 + $0x1f78] sm:$0xff] }
 0x48e   :  { %9835 = vmatmul.mubr.f32.vlgmr.msra.gmra.mrb[52].mxu1 %v1046_v34  ;;  %v984_v34 = vadd.f32 1.0, %v12049_v30 }
 0x48f   :  { %11596 = vmatpush3.bf16.msra.mxu1 %v11595_v32  ;;  %11734 = vmatpush3.bf16.msra.mxu0 %v11733_v25  ;;  %v11778_v32 = vpack.c.bf16 %v2000_v12, %v1999_v52  ;;  %v1909_v25 = vld [vmem:[#allocation6 + $0x1a80] sm:$0xff]  ;;  %v2030_v12 = vld [vmem:[#allocation6 + $0x1e48] sm:$0xff] }
 0x490   :  { %11597 = vmatprep.subr.bf16.mxu1 %v12199_v0  ;;  %11735 = vmatprep.subr.bf16.mxu0 %v12199_v0  ;;  %v1048_v6 = vmul.f32 %v984_v34, %v792_v45  ;;  %v2029_v52 = vld [vmem:[#allocation6 + $0x1e40] sm:$0xff]  ;;  %v1923_v34 = vld [vmem:[#allocation6 + $0x1af0] sm:$0xff] }
 0x491   :  { %9904 = vmatprep.mubr.msk.f32.mxu1 %vm12200_vm1, %v13899_v7  ;;  %v12051_v37 = vpop.eup %12050  ;;  %v11823_v45 = vpack.c.bf16 %v2030_v12, %v2029_v52  ;;  %v1951_v52 = vld [vmem:[#allocation6 + $0x1bd0] sm:$0xff]  ;;  %v1952_v12 = vld [vmem:[#allocation6 + $0x1bd8] sm:$0xff] }
 0x493   :  { %11599 = vmatpush3.bf16.msra.mxu1 %v11598_v17  ;;  %11737 = vmatpush3.bf16.msra.mxu0 %v11736_v60  ;;  %v11643_v17 = vpack.c.bf16 %v1910_v38, %v1909_v25  ;;  %v11781_v60 = vpack.c.bf16 %v2002_v18, %v2001_v53  ;;  %v1924_v38 = vld [vmem:[#allocation6 + $0x1af8] sm:$0xff]  ;;  %v2031_v53 = vld [vmem:[#allocation6 + $0x1e50] sm:$0xff] }
 0x494   :  { %11600 = vmatprep.subr.bf16.mxu1 %v12199_v0  ;;  %11762 = vmatprep.subr.bf16.mxu0 %v12199_v0  ;;  %v2032_v18 = vld [vmem:[#allocation6 + $0x1e58] sm:$0xff] }
 0x496   :  { %10080 = vmatmul.mubr.f32.vlgmr.msra.gmra.mrb[116].mxu0 %v1053_v36  ;;  %v991_v36 = vadd.f32 1.0, %v12051_v37  ;;  %v2034_v37 = vld [vmem:[#allocation6 + $0x1e68] sm:$0xff] }
 0x497   :  { %11602 = vmatpush3.bf16.msra.mxu1 %v11601_v28  ;;  %11764 = vmatpush3.bf16.msra.mxu0 %v11763_v35  ;;  %v11784_v28 = vpack.c.bf16 %v2004_v43, %v2003_v11  ;;  %v1913_v35 = vld [vmem:[#allocation6 + $0x1aa0] sm:$0xff]  ;;  %v1942_v11 = vld [vmem:[#allocation6 + $0x1b88] sm:$0xff] }
 0x498   :  { %11603 = vmatprep.subr.bf16.mxu1 %v12199_v0  ;;  %11765 = vmatprep.subr.bf16.mxu0 %v12199_v0  ;;  %v1055_v56 = vmul.f32 %v991_v36, %v799_v33  ;;  %v2033_v43 = vld [vmem:[#allocation6 + $0x1e60] sm:$0xff]  ;;  %v1943_v33 = vld [vmem:[#allocation6 + $0x1b90] sm:$0xff] }
 0x499   :  { %10149 = vmatprep.mubr.msk.f32.mxu0 %vm12200_vm1, %v13899_v7 }
 0x49b   :  { %11605 = vmatpush3.bf16.msra.mxu1 %v11604_v3  ;;  %11767 = vmatpush3.bf16.msra.mxu0 %v11766_v23  ;;  %v13690_v3 = vadd.f32 %v13610_v2, %v13901_v41  ;;  %v11649_v23 = vpack.c.bf16 %v1914_v48, %v1913_v35  ;;  %v11829_v35 = vpack.c.bf16 %v2034_v37, %v2033_v43  ;;  %v1944_v48 = vld [vmem:[#allocation6 + $0x1b98] sm:$0xff]  ;;  %v2063_v43 = vld [vmem:[#allocation6 + $0x1f50] sm:$0xff] }
 0x49c   :  { %11606 = vmatprep.subr.bf16.mxu1 %v12199_v0  ;;  %11768 = vmatprep.subr.bf16.mxu0 %v12199_v0  ;;  %v2064_v37 = vld [vmem:[#allocation6 + $0x1f58] sm:$0xff] }
 0x49f   :  { %11608 = vmatpush3.bf16.msra.mxu1 %v11607_v51  ;;  %11770 = vmatpush3.bf16.msra.mxu0 %v11769_v59  ;;  %v858_v51 = vmul.f32 0.70710677, %v13690_v3  ;;  %v11652_v59 = vpack.c.bf16 %v1916_v47, %v1915_v54  ;;  %v1946_v47 = vld [vmem:[#allocation6 + $0x1ba8] sm:$0xff] }
 0x4a0   :  { %11609 = vmatprep.subr.bf16.mxu1 %v12199_v0  ;;  %11771 = vmatprep.subr.bf16.mxu0 %v12199_v0 }
 0x4a1   :  { %v4741_v40 = vpop.f32.mrb[40].mxu1  ;;  %12052 = verf.f32 %v858_v51  ;;  %v13903_v51 = vld [vmem:[#allocation14_spill] sm:$0xff] }
 0x4a2   :  { %v6601_v8 = vadd.f32 %v13636_v55, %v4741_v40  ;;  %v9416_v42 = vpop.f32.mrb[41].mxu1  ;;  %v11616_v55 = vpack.c.bf16 %v1892_v50, %v1891_v63  ;;  %v2027_v40 = vld [vmem:[#allocation6 + $0x1e30] sm:$0xff]  ;;  %v1921_v63 = vld [vmem:[#allocation6 + $0x1ae0] sm:$0xff]  ;;  %v1922_v50 = vld [vmem:[#allocation6 + $0x1ae8] sm:$0xff] }
 0x4a3   :  { %11611 = vmatpush3.bf16.msra.mxu1 %v11610_v26  ;;  %11773 = vmatpush3.bf16.msra.mxu0 %v11772_v16  ;;  %v13902_v26 = vld [vmem:[#allocation19_spill] sm:$0xff]  ;;  %v11661_v25 = vpack.c.bf16 %v1922_v50, %v1921_v63 }
 0x4a4   :  { %11612 = vmatprep.subr.bf16.mxu1 %v12199_v0  ;;  %11774 = vmatprep.subr.bf16.mxu0 %v12199_v0  ;;  %v13674_v1 = vadd.f32 %v6601_v8, %v13563_v44  ;;  %v13701_v16 = vadd.f32 %v13610_v2, %v13902_v26  ;;  %v2028_v8 = vld [vmem:[#allocation6 + $0x1e38] sm:$0xff]  ;;  %v2055_v26 = vld [vmem:[#allocation6 + $0x1f10] sm:$0xff] }
 0x4a6   :  { %v865_v42 = vmul.f32 0.70710677, %v13701_v16  ;;  %v801_v54 = vmul.f32 0.5, %v13701_v16  ;;  %v2056_v16 = vld [vmem:[#allocation6 + $0x1f18] sm:$0xff] }
 0x4a7   :  { %11614 = vmatpush3.bf16.msra.mxu1 %v11613_v13  ;;  %11776 = vmatpush3.bf16.msra.mxu0 %v11775_v5  ;;  %v11658_v13 = vpack.c.bf16 %v1920_v4, %v1919_v29  ;;  %v11820_v5 = vpack.c.bf16 %v2028_v8, %v2027_v40  ;;  %v11862_v29 = vpack.c.bf16 %v2056_v16, %v2055_v26  ;;  %v1949_v4 = vld [vmem:[#allocation6 + $0x1bc0] sm:$0xff]  ;;  %v1950_v40 = vld [vmem:[#allocation6 + $0x1bc8] sm:$0xff]  ;;  %v13905_v26 = vld [vmem:[#allocation15_spill] sm:$0xff] }
 0x4a8   :  { %11615 = vmatprep.subr.bf16.mxu1 %v12199_v0  ;;  %11777 = vmatprep.subr.bf16.mxu0 %v12199_v0  ;;  %12054 = verf.f32 %v865_v42  ;;  %v2057_v8 = vld [vmem:[#allocation6 + $0x1f20] sm:$0xff]  ;;  %v2058_v42 = vld [vmem:[#allocation6 + $0x1f28] sm:$0xff]  ;;  %v11703_v63 = vpack.c.bf16 %v1950_v40, %v1949_v4  ;;  %v708_v16 = vadd.f32 %v13610_v2, %v13905_v26  ;;  %v1980_v4 = vld [vmem:[#allocation6 + $0x1cb8] sm:$0xff] }
 0x4a9   :  { %v13679_v61 = vpop.f32.mrb[104].mxu0  ;;  %v11865_v50 = vpack.c.bf16 %v2058_v42, %v2057_v8  ;;  %v1981_v42 = vld [vmem:[#allocation6 + $0x1cc0] sm:$0xff] }
 0x4aa   :  { %v9661_v44 = vpop.f32.mrb[105].mxu0  ;;  %v862_v40 = vmul.f32 0.70710677, %v708_v16 }
 0x4ab   :  { %11617 = vmatpush3.bf16.msra.mxu1 %v11616_v55  ;;  %11779 = vmatpush3.bf16.msra.mxu0 %v11778_v32 }
 0x4ac   :  { %11642 = vmatprep.subr.bf16.mxu1 %v12199_v0  ;;  %11780 = vmatprep.subr.bf16.mxu0 %v12199_v0 }
 0x4ae   :  { %9905 = vmatmul.mubr.f32.vlgmr.msra.gmra.mrb[54].mxu1 %v1048_v6  ;;  %v794_v6 = vmul.f32 0.5, %v13690_v3  ;;  %v11694_v3 = vpack.c.bf16 %v1944_v48, %v1943_v33  ;;  %v1973_v33 = vld [vmem:[#allocation6 + $0x1c80] sm:$0xff] }
 0x4af   :  { %11644 = vmatpush3.bf16.msra.mxu1 %v11643_v17  ;;  %11782 = vmatpush3.bf16.msra.mxu0 %v11781_v60  ;;  %v12053_v17 = vpop.eup %12052  ;;  %v11826_v60 = vpack.c.bf16 %v2032_v18, %v2031_v53  ;;  %v2061_v53 = vld [vmem:[#allocation6 + $0x1f40] sm:$0xff]  ;;  %v2062_v18 = vld [vmem:[#allocation6 + $0x1f48] sm:$0xff] }
 0x4b0   :  { %11645 = vmatprep.subr.bf16.mxu1 %v12199_v0  ;;  %11783 = vmatprep.subr.bf16.mxu0 %v12199_v0  ;;  %v986_v21 = vadd.f32 1.0, %v12053_v17 }
 0x4b1   :  { %9974 = vmatprep.mubr.msk.f32.mxu1 %vm12200_vm1, %v13899_v7 }
 0x4b2   :  { %v1050_v36 = vmul.f32 %v986_v21, %v794_v6  ;;  %v12055_v41 = vpop.eup %12054  ;;  %v11871_v6 = vpack.c.bf16 %v2062_v18, %v2061_v53  ;;  %v1955_v21 = vld [vmem:[#allocation6 + $0x1bf0] sm:$0xff] }
 0x4b3   :  { %11647 = vmatpush3.bf16.msra.mxu1 %v11646_v31  ;;  %11785 = vmatpush3.bf16.msra.mxu0 %v11784_v28  ;;  %v11691_v28 = vpack.c.bf16 %v1942_v11, %v1941_v46  ;;  %v1956_v11 = vld [vmem:[#allocation6 + $0x1bf8] sm:$0xff] }
 0x4b4   :  { %11648 = vmatprep.subr.bf16.mxu1 %v12199_v0  ;;  %11810 = vmatprep.subr.bf16.mxu0 %v12199_v0 }
 0x4b6   :  { %10150 = vmatmul.mubr.f32.vlgmr.msra.gmra.mrb[118].mxu0 %v1055_v56  ;;  %v993_v56 = vadd.f32 1.0, %v12055_v41  ;;  %v2066_v41 = vld [vmem:[#allocation6 + $0x1f68] sm:$0xff] }
 0x4b7   :  { %11650 = vmatpush3.bf16.msra.mxu1 %v11649_v23  ;;  %11812 = vmatpush3.bf16.msra.mxu0 %v11811_v24  ;;  %v11832_v23 = vpack.c.bf16 %v2036_v19, %v2035_v9  ;;  %v1945_v24 = vld [vmem:[#allocation6 + $0x1ba0] sm:$0xff]  ;;  %v1974_v9 = vld [vmem:[#allocation6 + $0x1c88] sm:$0xff] }
 0x4b8   :  { %11651 = vmatprep.subr.bf16.mxu1 %v12199_v0  ;;  %11813 = vmatprep.subr.bf16.mxu0 %v12199_v0  ;;  %v1057_v10 = vmul.f32 %v993_v56, %v801_v54  ;;  %v2065_v19 = vld [vmem:[#allocation6 + $0x1f60] sm:$0xff]  ;;  %v1975_v54 = vld [vmem:[#allocation6 + $0x1c90] sm:$0xff] }
 0x4b9   :  { %10219 = vmatprep.mubr.msk.f32.mxu0 %vm12200_vm1, %v13899_v7 }
 0x4bb   :  { %11653 = vmatpush3.bf16.msra.mxu1 %v11652_v59  ;;  %11815 = vmatpush3.bf16.msra.mxu0 %v11814_v20  ;;  %v13728_v59 = vadd.f32 %v13610_v2, %v13903_v51  ;;  %v11697_v20 = vpack.c.bf16 %v1946_v47, %v1945_v24  ;;  %v11877_v24 = vpack.c.bf16 %v2066_v41, %v2065_v19  ;;  %v1976_v47 = vld [vmem:[#allocation6 + $0x1c98] sm:$0xff] }
 0x4bc   :  { %11654 = vmatprep.subr.bf16.mxu1 %v12199_v0  ;;  %11816 = vmatprep.subr.bf16.mxu0 %v12199_v0  ;;  %v2012_v19 = vld [vmem:[#allocation6 + $0x1db8] sm:$0xff] }
 0x4bf   :  { %11656 = vmatpush3.bf16.msra.mxu1 %v11655_v27  ;;  %11818 = vmatpush3.bf16.msra.mxu0 %v11817_v57  ;;  %v860_v27 = vmul.f32 0.70710677, %v13728_v59  ;;  %v11700_v57 = vpack.c.bf16 %v1948_v49, %v1947_v39  ;;  %v1978_v49 = vld [vmem:[#allocation6 + $0x1ca8] sm:$0xff] }
 0x4c0   :  { %11657 = vmatprep.subr.bf16.mxu1 %v12199_v0  ;;  %11819 = vmatprep.subr.bf16.mxu0 %v12199_v0 }
 0x4c1   :  { %v4881_v30 = vpop.f32.mrb[42].mxu1  ;;  %12056 = verf.f32 %v860_v27 }
 0x4c2   :  { %v6603_v55 = vadd.f32 %v13674_v1, %v4881_v30  ;;  %v9486_v32 = vpop.f32.mrb[43].mxu1  ;;  %v11664_v1 = vpack.c.bf16 %v1924_v38, %v1923_v34  ;;  %v2059_v30 = vld [vmem:[#allocation6 + $0x1f30] sm:$0xff]  ;;  %v1953_v34 = vld [vmem:[#allocation6 + $0x1be0] sm:$0xff]  ;;  %v1954_v38 = vld [vmem:[#allocation6 + $0x1be8] sm:$0xff] }
 0x4c3   :  { %11659 = vmatpush3.bf16.msra.mxu1 %v11658_v13  ;;  %11821 = vmatpush3.bf16.msra.mxu0 %v11820_v5  ;;  %v13904_v13 = vld [vmem:[#allocation21_spill] sm:$0xff]  ;;  %v11709_v46 = vpack.c.bf16 %v1954_v38, %v1953_v34  ;;  %v1987_v34 = vld [vmem:[#allocation6 + $0x1cf0] sm:$0xff]  ;;  %v1988_v38 = vld [vmem:[#allocation6 + $0x1cf8] sm:$0xff] }
 0x4c4   :  { %11660 = vmatprep.subr.bf16.mxu1 %v12199_v0  ;;  %11822 = vmatprep.subr.bf16.mxu0 %v12199_v0  ;;  %v13712_v44 = vadd.f32 %v6603_v55, %v13601_v14  ;;  %v13739_v5 = vadd.f32 %v13610_v2, %v13904_v13  ;;  %v2060_v55 = vld [vmem:[#allocation6 + $0x1f38] sm:$0xff]  ;;  %v1982_v13 = vld [vmem:[#allocation6 + $0x1cc8] sm:$0xff] }
 0x4c6   :  { %v867_v32 = vmul.f32 0.70710677, %v13739_v5 }
 0x4c7   :  { %11662 = vmatpush3.bf16.msra.mxu1 %v11661_v25  ;;  %11824 = vmatpush3.bf16.msra.mxu0 %v11823_v45  ;;  %v11706_v25 = vpack.c.bf16 %v1952_v12, %v1951_v52  ;;  %v11868_v45 = vpack.c.bf16 %v2060_v55, %v2059_v30  ;;  %v1985_v12 = vld [vmem:[#allocation6 + $0x1ce0] sm:$0xff]  ;;  %v1986_v30 = vld [vmem:[#allocation6 + $0x1ce8] sm:$0xff] }
 0x4c8   :  { %11663 = vmatprep.subr.bf16.mxu1 %v12199_v0  ;;  %11825 = vmatprep.subr.bf16.mxu0 %v12199_v0  ;;  %12058 = verf.f32 %v867_v32 }
 0x4c9   :  { %v13717_v31 = vpop.f32.mrb[106].mxu0  ;;  %12060 = verf.f32 %v862_v40 }
 0x4ca   :  { %v9731_v14 = vpop.f32.mrb[107].mxu0 }
 0x4cb   :  { %11665 = vmatpush3.bf16.msra.mxu1 %v11664_v1  ;;  %11827 = vmatpush3.bf16.msra.mxu0 %v11826_v60 }
 0x4cc   :  { %11690 = vmatprep.subr.bf16.mxu1 %v12199_v0  ;;  %11828 = vmatprep.subr.bf16.mxu0 %v12199_v0 }
 0x4ce   :  { %9975 = vmatmul.mubr.f32.vlgmr.msra.gmra.mrb[56].mxu1 %v1050_v36  ;;  %v796_v36 = vmul.f32 0.5, %v13728_v59  ;;  %v11742_v59 = vpack.c.bf16 %v1976_v47, %v1975_v54 }
 0x4cf   :  { %11692 = vmatpush3.bf16.msra.mxu1 %v11691_v28  ;;  %11830 = vmatpush3.bf16.msra.mxu0 %v11829_v35  ;;  %v12057_v28 = vpop.eup %12056  ;;  %v11874_v35 = vpack.c.bf16 %v2064_v37, %v2063_v43 }
 0x4d0   :  { %11693 = vmatprep.subr.bf16.mxu1 %v12199_v0  ;;  %11831 = vmatprep.subr.bf16.mxu0 %v12199_v0  ;;  %v988_v48 = vadd.f32 1.0, %v12057_v28  ;;  %v2008_v28 = vld [vmem:[#allocation6 + $0x1d98] sm:$0xff] }
 0x4d1   :  { %10044 = vmatprep.mubr.msk.f32.mxu1 %vm12200_vm1, %v13899_v7 }
 0x4d2   :  { %v1052_v56 = vmul.f32 %v988_v48, %v796_v36  ;;  %v12059_v51 = vpop.eup %12058 }
 0x4d3   :  { %11695 = vmatpush3.bf16.msra.mxu1 %v11694_v3  ;;  %11833 = vmatpush3.bf16.msra.mxu0 %v11832_v23  ;;  %v11739_v23 = vpack.c.bf16 %v1974_v9, %v1973_v33  ;;  %v995_v39 = vadd.f32 1.0, %v12059_v51  ;;  %v12061_v18 = vpop.eup %12060  ;;  %v13906_v33 = vld [vmem:[#allocation16_spill] sm:$0xff]  ;;  %v2011_v9 = vld [vmem:[#allocation6 + $0x1db0] sm:$0xff] }
 0x4d4   :  { %11696 = vmatprep.subr.bf16.mxu1 %v12199_v0  ;;  %11858 = vmatprep.subr.bf16.mxu0 %v12199_v0  ;;  %v718_v36 = vadd.f32 %v13610_v2, %v13906_v33  ;;  %v2016_v2 = vld [vmem:[#allocation6 + $0x1dd8] sm:$0xff] }
 0x4d6   :  { %10220 = vmatmul.mubr.f32.vlgmr.msra.gmra.mrb[120].mxu0 %v1057_v10  ;;  %v1977_v10 = vld [vmem:[#allocation6 + $0x1ca0] sm:$0xff]  ;;  %v864_v41 = vmul.f32 0.70710677, %v718_v36 }
 0x4d7   :  { %11698 = vmatpush3.bf16.msra.mxu1 %v11697_v20  ;;  %11860 = vmatpush3.bf16.msra.mxu0 %v11859_v22  ;;  %v11880_v20 = vpack.c.bf16 %v2068_v62, %v2067_v58  ;;  %v803_v22 = vmul.f32 0.5, %v13739_v5  ;;  %v11745_v27 = vpack.c.bf16 %v1978_v49, %v1977_v10  ;;  %v11751_v5 = vpack.c.bf16 %v1982_v13, %v1981_v42  ;;  %v2017_v58 = vld [vmem:[#allocation6 + $0x1de0] sm:$0xff]  ;;  %v2018_v62 = vld [vmem:[#allocation6 + $0x1de8] sm:$0xff]  ;;  %v2020_v10 = vld [vmem:[#allocation6 + $0x1df8] sm:$0xff] }
 0x4d8   :  { %11699 = vmatprep.subr.bf16.mxu1 %v12199_v0  ;;  %11861 = vmatprep.subr.bf16.mxu0 %v12199_v0  ;;  %12062 = verf.f32 %v864_v41  ;;  %v2070_v41 = vld [vmem:[#allocation6 + $0x1f88] sm:$0xff] }
 0x4d9   :  { %10289 = vmatprep.mubr.msk.f32.mxu0 %vm12200_vm1, %v13899_v7 }
 0x4db   :  { %11701 = vmatpush3.bf16.msra.mxu1 %v11700_v57  ;;  %11863 = vmatpush3.bf16.msra.mxu0 %v11862_v29  ;;  %v1059_v57 = vmul.f32 %v995_v39, %v803_v22  ;;  %v1979_v29 = vld [vmem:[#allocation6 + $0x1cb0] sm:$0xff]  ;;  %v11805_v22 = vpack.c.bf16 %v2018_v62, %v2017_v58  ;;  %v2074_v58 = vld [vmem:[#allocation6 + $0x1fa8] sm:$0xff]  ;;  %v13908_v62 = vld [vmem:[#allocation20_spill] sm:$0xff] }
 0x4dc   :  { %11702 = vmatprep.subr.bf16.mxu1 %v12199_v0  ;;  %11864 = vmatprep.subr.bf16.mxu0 %v12199_v0  ;;  %v11748_v8 = vpack.c.bf16 %v1980_v4, %v1979_v29  ;;  %v2019_v39 = vld [vmem:[#allocation6 + $0x1df0] sm:$0xff]  ;;  %v2037_v29 = vld [vmem:[#allocation6 + $0x1e80] sm:$0xff]  ;;  %v2038_v4 = vld [vmem:[#allocation6 + $0x1e88] sm:$0xff] }
 0x4dd   :  { %v11835_v42 = vpack.c.bf16 %v2038_v4, %v2037_v29  ;;  %v2081_v29 = vld [vmem:[#allocation6 + $0x1fe0] sm:$0xff]  ;;  %v2082_v4 = vld [vmem:[#allocation6 + $0x1fe8] sm:$0xff] }
 0x4df   :  { %11704 = vmatpush3.bf16.msra.mxu1 %v11703_v63  ;;  %11866 = vmatpush3.bf16.msra.mxu0 %v11865_v50  ;;  %v1983_v63 = vld [vmem:[#allocation6 + $0x1cd0] sm:$0xff]  ;;  %v1984_v50 = vld [vmem:[#allocation6 + $0x1cd8] sm:$0xff] }
 0x4e0   :  { %11705 = vmatprep.subr.bf16.mxu1 %v12199_v0  ;;  %11867 = vmatprep.subr.bf16.mxu0 %v12199_v0  ;;  %v11754_v52 = vpack.c.bf16 %v1984_v50, %v1983_v63  ;;  %v2040_v63 = vld [vmem:[#allocation6 + $0x1e98] sm:$0xff]  ;;  %v2041_v50 = vld [vmem:[#allocation6 + $0x1ea0] sm:$0xff] }
 0x4e1   :  { %v5021_v17 = vpop.f32.mrb[44].mxu1 }
 0x4e2   :  { %v6605_v1 = vadd.f32 %v13712_v44, %v5021_v17  ;;  %v9556_v60 = vpop.f32.mrb[45].mxu1  ;;  %v11712_v44 = vpack.c.bf16 %v1956_v11, %v1955_v21  ;;  %v11760_v17 = vpack.c.bf16 %v1988_v38, %v1987_v34  ;;  %v12063_v26 = vpop.eup %12062 }
 0x4e3   :  { %11707 = vmatpush3.bf16.msra.mxu1 %v11706_v25  ;;  %11869 = vmatpush3.bf16.msra.mxu0 %v11868_v45  ;;  %v11757_v45 = vpack.c.bf16 %v1986_v30, %v1985_v12  ;;  %v990_v60 = vadd.f32 1.0, %v12061_v18  ;;  %v12075_v12 = vld [vmem:[#allocation4] ss:$0 sm:$0xff]  ;;  %v13907_v30 = vld [vmem:[#allocation18_spill] sm:$0xff] }
 0x4e4   :  { %11708 = vmatprep.subr.bf16.mxu1 %v12199_v0  ;;  %11870 = vmatprep.subr.bf16.mxu0 %v12199_v0  ;;  %v13750_v14 = vadd.f32 %v6605_v1, %v13641_v15  ;;  %v798_v1 = vmul.f32 0.5, %v708_v16  ;;  %v11808_v16 = vpack.c.bf16 %v2020_v10, %v2019_v39  ;;  %v2046_v18 = vld [vmem:[#allocation6 + $0x1ec8] sm:$0xff] }
 0x4e6   :  { %v1054_v37 = vmul.f32 %v990_v60, %v798_v1  ;;  %v2047_v1 = vld [vmem:[#allocation6 + $0x1ed0] sm:$0xff]  ;;  %v2048_v60 = vld [vmem:[#allocation6 + $0x1ed8] sm:$0xff] }
 0x4e7   :  { %11710 = vmatpush3.bf16.msra.mxu1 %v11709_v46  ;;  %11872 = vmatpush3.bf16.msra.mxu0 %v11871_v6  ;;  %v2005_v46 = vld [vmem:[#allocation6 + $0x1d80] sm:$0xff]  ;;  %v2006_v6 = vld [vmem:[#allocation6 + $0x1d88] sm:$0xff] }
 0x4e8   :  { %11711 = vmatprep.subr.bf16.mxu1 %v12199_v0  ;;  %11873 = vmatprep.subr.bf16.mxu0 %v12199_v0  ;;  %v11787_v43 = vpack.c.bf16 %v2006_v6, %v2005_v46  ;;  %v11850_v46 = vpack.c.bf16 %v2048_v60, %v2047_v1  ;;  %v2049_v6 = vld [vmem:[#allocation6 + $0x1ee0] sm:$0xff] }
 0x4e9   :  { %v13755_v3 = vpop.f32.mrb[108].mxu0 }
 0x4ea   :  { %v9801_v15 = vpop.f32.mrb[109].mxu0 }
 0x4eb   :  { %11713 = vmatpush3.bf16.msra.mxu1 %v11712_v44  ;;  %11875 = vmatpush3.bf16.msra.mxu0 %v11874_v35  ;;  %v2009_v44 = vld [vmem:[#allocation6 + $0x1da0] sm:$0xff]  ;;  %v2010_v35 = vld [vmem:[#allocation6 + $0x1da8] sm:$0xff]  ;;  %v11796_v15 = vpack.c.bf16 %v2012_v19, %v2011_v9 }
 0x4ec   :  { %11738 = vmatprep.subr.bf16.mxu1 %v12199_v0  ;;  %11876 = vmatprep.subr.bf16.mxu0 %v12199_v0  ;;  %v11793_v48 = vpack.c.bf16 %v2010_v35, %v2009_v44  ;;  %v2052_v44 = vld [vmem:[#allocation6 + $0x1ef8] sm:$0xff]  ;;  %v2069_v19 = vld [vmem:[#allocation6 + $0x1f80] sm:$0xff] }
 0x4ee   :  { %10045 = vmatmul.mubr.f32.vlgmr.msra.gmra.mrb[58].mxu1 %v1052_v56  ;;  %v2015_v56 = vld [vmem:[#allocation6 + $0x1dd0] sm:$0xff] }
 0x4ef   :  { %11740 = vmatpush3.bf16.msra.mxu1 %v11739_v23  ;;  %11878 = vmatpush3.bf16.msra.mxu0 %v11877_v24  ;;  %v2013_v23 = vld [vmem:[#allocation6 + $0x1dc0] sm:$0xff]  ;;  %v2014_v24 = vld [vmem:[#allocation6 + $0x1dc8] sm:$0xff]  ;;  %v11802_v47 = vpack.c.bf16 %v2016_v2, %v2015_v56  ;;  %v2071_v56 = vld [vmem:[#allocation6 + $0x1f90] sm:$0xff] }
 0x4f0   :  { %11741 = vmatprep.subr.bf16.mxu1 %v12199_v0  ;;  %11879 = vmatprep.subr.bf16.mxu0 %v12199_v0  ;;  %v11799_v54 = vpack.c.bf16 %v2014_v24, %v2013_v23  ;;  %v11883_v24 = vpack.c.bf16 %v2070_v41, %v2069_v19  ;;  %v2072_v2 = vld [vmem:[#allocation6 + $0x1f98] sm:$0xff] }
 0x4f1   :  { %10114 = vmatprep.mubr.msk.f32.mxu1 %vm12200_vm1, %v13899_v7  ;;  %v6648_v19 = vld [vmem:[%s13885_s5 + $0x38] sm:$0xff] }
 0x4f3   :  { %11743 = vmatpush3.bf16.msra.mxu1 %v11742_v59  ;;  %11881 = vmatpush3.bf16.msra.mxu0 %v11880_v20 }
 0x4f4   :  { %11744 = vmatprep.subr.bf16.mxu1 %v12199_v0  ;;  %11906 = vmatprep.subr.bf16.mxu0 %v12199_v0 }
 0x4f6   :  { %10290 = vmatmul.mubr.f32.vlgmr.msra.gmra.mrb[122].mxu0 %v1059_v57  ;;  %v992_v57 = vadd.f32 1.0, %v12063_v26  ;;  %v2078_v26 = vld [vmem:[#allocation6 + $0x1fc8] sm:$0xff] }
 0x4f7   :  { %11746 = vmatpush3.bf16.msra.mxu1 %v11745_v27  ;;  %10359 = vmatprep.mubr.msk.f32.mxu0 %vm12200_vm1, %v13899_v7  ;;  %v800_v27 = vmul.f32 0.5, %v718_v36 }
 0x4f8   :  { %11747 = vmatprep.subr.bf16.mxu1 %v12199_v0 }
 0x4f9   :  { %v1056_v13 = vmul.f32 %v992_v57, %v800_v27  ;;  %v2080_v27 = vld [vmem:[#allocation6 + $0x1fd8] sm:$0xff] }
 0x4fb   :  { %11749 = vmatpush3.bf16.msra.mxu1 %v11748_v8 }
 0x4fc   :  { %11750 = vmatprep.subr.bf16.mxu1 %v12199_v0 }
 0x4ff   :  { %11752 = vmatpush3.bf16.msra.mxu1 %v11751_v5  ;;  %v2039_v5 = vld [vmem:[#allocation6 + $0x1e90] sm:$0xff] }
 0x500   :  { %11753 = vmatprep.subr.bf16.mxu1 %v12199_v0 }
 0x501   :  { %v5161_v55 = vpop.f32.mrb[46].mxu1 }
 0x502   :  { %v6607_v32 = vadd.f32 %v13750_v14, %v5161_v55  ;;  %v9626_v25 = vpop.f32.mrb[47].mxu1  ;;  %v2007_v14 = vld [vmem:[#allocation6 + $0x1d90] sm:$0xff]  ;;  %v728_v55 = vadd.f32 %v12075_v12, %v13907_v30 }
 0x503   :  { %11755 = vmatpush3.bf16.msra.mxu1 %v11754_v52  ;;  %v2042_v52 = vld [vmem:[#allocation6 + $0x1ea8] sm:$0xff]  ;;  %v2043_v25 = vld [vmem:[#allocation6 + $0x1eb0] sm:$0xff] }
 0x504   :  { %11756 = vmatprep.subr.bf16.mxu1 %v12199_v0  ;;  %v6608_v53 = vadd.f32 %v6607_v32, %v13679_v61  ;;  %v11790_v61 = vpack.c.bf16 %v2008_v28, %v2007_v14  ;;  %v11841_v32 = vpack.c.bf16 %v2042_v52, %v2041_v50  ;;  %v866_v34 = vmul.f32 0.70710677, %v728_v55 }
 0x506   :  { %12064 = verf.f32 %v866_v34 }
 0x507   :  { %11758 = vmatpush3.bf16.msra.mxu1 %v11757_v45  ;;  %v2044_v45 = vld [vmem:[#allocation6 + $0x1eb8] sm:$0xff] }
 0x508   :  { %11759 = vmatprep.subr.bf16.mxu1 %v12199_v0  ;;  %v11844_v38 = vpack.c.bf16 %v2044_v45, %v2043_v25 }
 0x509   :  { %v13777_v21 = vpop.f32.mrb[110].mxu0 }
 0x50a   :  { %v9871_v11 = vpop.f32.mrb[111].mxu0 }
 0x50b   :  { %11761 = vmatpush3.bf16.msra.mxu1 %v11760_v17  ;;  %v2050_v11 = vld [vmem:[#allocation6 + $0x1ee8] sm:$0xff] }
 0x50c   :  { %11786 = vmatprep.subr.bf16.mxu1 %v12199_v0  ;;  %v11853_v28 = vpack.c.bf16 %v2050_v11, %v2049_v6  ;;  %v6641_v6 = vld [vmem:[%s13885_s5] sm:$0xff]  ;;  %v6642_v11 = vld [vmem:[%s13885_s5 + $0x8] sm:$0xff] }
 0x50e   :  { %10115 = vmatmul.mubr.f32.vlgmr.msra.gmra.mrb[60].mxu1 %v1054_v37 }
 0x50f   :  { %11788 = vmatpush3.bf16.msra.mxu1 %v11787_v43  ;;  %10184 = vmatprep.mubr.msk.f32.mxu1 %vm12200_vm1, %v13899_v7 }
 0x510   :  { %11789 = vmatprep.subr.bf16.mxu1 %v12199_v0  ;;  %v12065_v33 = vpop.eup %12064 }
 0x511   :  { %v994_v9 = vadd.f32 1.0, %v12065_v33 }
 0x513   :  { %11791 = vmatpush3.bf16.msra.mxu1 %v11790_v61  ;;  %v2051_v61 = vld [vmem:[#allocation6 + $0x1ef0] sm:$0xff] }
 0x514   :  { %11792 = vmatprep.subr.bf16.mxu1 %v12199_v0  ;;  %v11856_v36 = vpack.c.bf16 %v2052_v44, %v2051_v61  ;;  %v6645_v61 = vld [vmem:[%s13885_s5 + $0x20] sm:$0xff]  ;;  %v6646_v44 = vld [vmem:[%s13885_s5 + $0x28] sm:$0xff] }
 0x515   :  { %v11913_v33 = vpack.c.bf16 %v6646_v44, %v6645_v61 }
 0x517   :  { %11794 = vmatpush3.bf16.msra.mxu1 %v11793_v48  ;;  %v802_v48 = vmul.f32 0.5, %v728_v55 }
 0x518   :  { %11795 = vmatprep.subr.bf16.mxu1 %v12199_v0 }
 0x51b   :  { %11797 = vmatpush3.bf16.msra.mxu1 %v11796_v15 }
 0x51c   :  { %11798 = vmatprep.subr.bf16.mxu1 %v12199_v0 }
 0x51f   :  { %11800 = vmatpush3.bf16.msra.mxu1 %v11799_v54  ;;  %v1058_v54 = vmul.f32 %v994_v9, %v802_v48  ;;  %v6647_v9 = vld [vmem:[%s13885_s5 + $0x30] sm:$0xff] }
 0x520   :  { %11801 = vmatprep.subr.bf16.mxu1 %v12199_v0 }
 0x521   :  { %v5301_v51 = vpop.f32.mrb[48].mxu1 }
 0x522   :  { %v6609_v59 = vadd.f32 %v6608_v53, %v5301_v51  ;;  %v9696_v20 = vpop.f32.mrb[49].mxu1  ;;  %v2045_v53 = vld [vmem:[#allocation6 + $0x1ec0] sm:$0xff]  ;;  %v738_v51 = vadd.f32 %v12075_v12, %v13908_v62 }
 0x523   :  { %11803 = vmatpush3.bf16.msra.mxu1 %v11802_v47  ;;  %v11847_v17 = vpack.c.bf16 %v2046_v18, %v2045_v53  ;;  %v2073_v47 = vld [vmem:[#allocation6 + $0x1fa0] sm:$0xff]  ;;  %v2075_v20 = vld [vmem:[#allocation6 + $0x1fb0] sm:$0xff] }
 0x524   :  { %11804 = vmatprep.subr.bf16.mxu1 %v12199_v0  ;;  %v6610_v49 = vadd.f32 %v6609_v59, %v13717_v31  ;;  %v11838_v31 = vpack.c.bf16 %v2040_v63, %v2039_v5  ;;  %v11889_v59 = vpack.c.bf16 %v2074_v58, %v2073_v47  ;;  %v868_v39 = vmul.f32 0.70710677, %v738_v51  ;;  %v2083_v63 = vld [vmem:[#allocation6 + $0x1ff0] sm:$0xff] }
 0x525   :  { %v11901_v5 = vpack.c.bf16 %v2082_v4, %v2081_v29  ;;  %v804_v30 = vmul.f32 0.5, %v738_v51  ;;  %v6651_v47 = vld [vmem:[%s13885_s5 + $0x50] sm:$0xff]  ;;  %v6652_v58 = vld [vmem:[%s13885_s5 + $0x58] sm:$0xff] }
 0x526   :  { %12066 = verf.f32 %v868_v39  ;;  %v11922_v51 = vpack.c.bf16 %v6652_v58, %v6651_v47  ;;  %v6655_v39 = vld [vmem:[%s13885_s5 + $0x70] sm:$0xff] }
 0x527   :  { %11806 = vmatpush3.bf16.msra.mxu1 %v11805_v22  ;;  %v2076_v22 = vld [vmem:[#allocation6 + $0x1fb8] sm:$0xff] }
 0x528   :  { %11807 = vmatprep.subr.bf16.mxu1 %v12199_v0  ;;  %v11892_v10 = vpack.c.bf16 %v2076_v22, %v2075_v20  ;;  %v6654_v20 = vld [vmem:[%s13885_s5 + $0x68] sm:$0xff] }
 0x529   :  { %v13792_v40 = vpop.f32.mrb[112].mxu0 }
 0x52a   :  { %v9941_v8 = vpop.f32.mrb[113].mxu0 }
 0x52b   :  { %11809 = vmatpush3.bf16.msra.mxu1 %v11808_v16  ;;  %v2079_v16 = vld [vmem:[#allocation6 + $0x1fd0] sm:$0xff] }
 0x52c   :  { %11834 = vmatprep.subr.bf16.mxu1 %v12199_v0  ;;  %v11898_v57 = vpack.c.bf16 %v2080_v27, %v2079_v16 }
 0x52e   :  { %10185 = vmatmul.mubr.f32.vlgmr.msra.gmra.mrb[62].mxu1 %v1056_v13 }
 0x52f   :  { %11836 = vmatpush3.bf16.msra.mxu1 %v11835_v42  ;;  %10254 = vmatprep.mubr.msk.f32.mxu1 %vm12200_vm1, %v13899_v7 }
 0x530   :  { %11837 = vmatprep.subr.bf16.mxu1 %v12199_v0  ;;  %v12067_v52 = vpop.eup %12066 }
 0x531   :  { %v996_v55 = vadd.f32 1.0, %v12067_v52 }
 0x533   :  { %11839 = vmatpush3.bf16.msra.mxu1 %v11838_v31  ;;  %v2084_v31 = vld [vmem:[#allocation6 + $0x1ff8] sm:$0xff]  ;;  %v1060_v45 = vmul.f32 %v996_v55, %v804_v30 }
 0x534   :  { %11840 = vmatprep.subr.bf16.mxu1 %v12199_v0  ;;  %v11904_v12 = vpack.c.bf16 %v2084_v31, %v2083_v63  ;;  %v6808_v31 = vld [vmem:[#allocation7] ss:$0 sm:$0xff] }
 0x537   :  { %11842 = vmatpush3.bf16.msra.mxu1 %v11841_v32 }
 0x538   :  { %11843 = vmatprep.subr.bf16.mxu1 %v12199_v0 }
 0x53b   :  { %11845 = vmatpush3.bf16.msra.mxu1 %v11844_v38 }
 0x53c   :  { %11846 = vmatprep.subr.bf16.mxu1 %v12199_v0 }
 0x53f   :  { %11848 = vmatpush3.bf16.msra.mxu1 %v11847_v17 }
 0x540   :  { %11849 = vmatprep.subr.bf16.mxu1 %v12199_v0 }
 0x541   :  { %v5441_v43 = vpop.f32.mrb[50].mxu1 }
 0x542   :  { %v6611_v37 = vadd.f32 %v6610_v49, %v5441_v43  ;;  %v9766_v14 = vpop.f32.mrb[51].mxu1  ;;  %v2077_v49 = vld [vmem:[#allocation6 + $0x1fc0] sm:$0xff]  ;;  %v6643_v43 = vld [vmem:[%s13885_s5 + $0x10] sm:$0xff] }
 0x543   :  { %11851 = vmatpush3.bf16.msra.mxu1 %v11850_v46 }
 0x544   :  { %11852 = vmatprep.subr.bf16.mxu1 %v12199_v0  ;;  %v6612_v35 = vadd.f32 %v6611_v37, %v13755_v3  ;;  %v11886_v3 = vpack.c.bf16 %v2072_v2, %v2071_v56  ;;  %v11907_v37 = vpack.c.bf16 %v6642_v11, %v6641_v6  ;;  %v6650_v56 = vld [vmem:[%s13885_s5 + $0x48] sm:$0xff] }
 0x546   :  { %11908 = vmatpush3.bf16.msra.mxu0 %v11907_v37 }
 0x547   :  { %11854 = vmatpush3.bf16.msra.mxu1 %v11853_v28  ;;  %11909 = vmatprep.subr.bf16.mxu0 %v12199_v0 }
 0x548   :  { %11855 = vmatprep.subr.bf16.mxu1 %v12199_v0 }
 0x549   :  { %v13806_v15 = vpop.f32.mrb[114].mxu0 }
 0x54a   :  { %v10011_v23 = vpop.f32.mrb[115].mxu0 }
 0x54b   :  { %11857 = vmatpush3.bf16.msra.mxu1 %v11856_v36  ;;  %v11916_v23 = vpack.c.bf16 %v6648_v19, %v6647_v9 }
 0x54c   :  { %11882 = vmatprep.subr.bf16.mxu1 %v12199_v0 }
 0x54e   :  { %10255 = vmatmul.mubr.f32.vlgmr.msra.gmra.mrb[64].mxu1 %v1058_v54  ;;  %v6649_v54 = vld [vmem:[%s13885_s5 + $0x40] sm:$0xff] }
 0x54f   :  { %11884 = vmatpush3.bf16.msra.mxu1 %v11883_v24  ;;  %10324 = vmatprep.mubr.msk.f32.mxu1 %vm12200_vm1, %v13899_v7  ;;  %v11895_v7 = vpack.c.bf16 %v2078_v26, %v2077_v49  ;;  %v11919_v2 = vpack.c.bf16 %v6650_v56, %v6649_v54 }
 0x550   :  { %11885 = vmatprep.subr.bf16.mxu1 %v12199_v0 }
 0x553   :  { %11887 = vmatpush3.bf16.msra.mxu1 %v11886_v3 }
 0x554   :  { %11888 = vmatprep.subr.bf16.mxu1 %v12199_v0 }
 0x557   :  { %11890 = vmatpush3.bf16.msra.mxu1 %v11889_v59  ;;  %v6653_v59 = vld [vmem:[%s13885_s5 + $0x60] sm:$0xff] }
 0x558   :  { %11891 = vmatprep.subr.bf16.mxu1 %v12199_v0  ;;  %v11925_v22 = vpack.c.bf16 %v6654_v20, %v6653_v59 }
 0x55b   :  { %11893 = vmatpush3.bf16.msra.mxu1 %v11892_v10  ;;  %v6656_v10 = vld [vmem:[%s13885_s5 + $0x78] sm:$0xff] }
 0x55c   :  { %11894 = vmatprep.subr.bf16.mxu1 %v12199_v0  ;;  %v11928_v49 = vpack.c.bf16 %v6656_v10, %v6655_v39 }
 0x55f   :  { %11896 = vmatpush3.bf16.msra.mxu1 %v11895_v7 }
 0x560   :  { %11897 = vmatprep.subr.bf16.mxu1 %v12199_v0 }
 0x561   :  { %v5581_v8 = vpop.f32.mrb[52].mxu1 }
 0x562   :  { %v6613_v42 = vadd.f32 %v6612_v35, %v5581_v8  ;;  %v9836_v13 = vpop.f32.mrb[53].mxu1 }
 0x563   :  { %11899 = vmatpush3.bf16.msra.mxu1 %v11898_v57 }
 0x564   :  { %11900 = vmatprep.subr.bf16.mxu1 %v12199_v0  ;;  %v6614_v50 = vadd.f32 %v6613_v42, %v13777_v21 }
 0x567   :  { %11902 = vmatpush3.bf16.msra.mxu1 %v11901_v5 }
 0x568   :  { %11903 = vmatprep.subr.bf16.mxu1 %v12199_v0 }
 0x569   :  { %v6071_v32 = vpop.f32.mrb[116].mxu0 }
 0x56a   :  { %v10081_v25 = vpop.f32.mrb[117].mxu0 }
 0x56b   :  { %11905 = vmatpush3.bf16.msra.mxu1 %v11904_v12 }
 0x56e   :  { %10325 = vmatmul.mubr.f32.vlgmr.msra.gmra.mrb[66].mxu1 %v1060_v45 }
 0x581   :  { %v5721_v34 = vpop.f32.mrb[54].mxu1 }
 0x582   :  { %v6615_v38 = vadd.f32 %v6614_v50, %v5721_v34  ;;  %v9906_v53 = vpop.f32.mrb[55].mxu1  ;;  %v6809_v34 = vld [vmem:[#allocation9] ss:$0 sm:$0xff] }
 0x584   :  { %v6616_v18 = vadd.f32 %v6615_v38, %v13792_v40  ;;  %v6644_v40 = vld [vmem:[%s13885_s5 + $0x18] sm:$0xff] }
 0x585   :  { %v11910_v28 = vpack.c.bf16 %v6644_v40, %v6643_v43 }
 0x587   :  { %11911 = vmatpush3.bf16.msra.mxu0 %v11910_v28 }
 0x588   :  { %11912 = vmatprep.subr.bf16.mxu0 %v12199_v0 }
 0x589   :  { %v6211_v17 = vpop.f32.mrb[118].mxu0 }
 0x58a   :  { %v10151_v1 = vpop.f32.mrb[119].mxu0 }
 0x58b   :  { %11914 = vmatpush3.bf16.msra.mxu0 %v11913_v33 }
 0x58c   :  { %11915 = vmatprep.subr.bf16.mxu0 %v12199_v0 }
 0x58f   :  { %11917 = vmatpush3.bf16.msra.mxu0 %v11916_v23 }
 0x590   :  { %11918 = vmatprep.subr.bf16.mxu0 %v12199_v0 }
 0x593   :  { %11920 = vmatpush3.bf16.msra.mxu0 %v11919_v2 }
 0x594   :  { %11921 = vmatprep.subr.bf16.mxu0 %v12199_v0 }
 0x597   :  { %11923 = vmatpush3.bf16.msra.mxu0 %v11922_v51 }
 0x598   :  { %11924 = vmatprep.subr.bf16.mxu0 %v12199_v0 }
 0x59b   :  { %11926 = vmatpush3.bf16.msra.mxu0 %v11925_v22 }
 0x59c   :  { %11927 = vmatprep.subr.bf16.mxu0 %v12199_v0 }
 0x59f   :  { %11929 = vmatpush3.bf16.msra.mxu0 %v11928_v49 }
 0x5a1   :  { %v5861_v21 = vpop.f32.mrb[56].mxu1 }
 0x5a2   :  { %v6617_v60 = vadd.f32 %v6616_v18, %v5861_v21  ;;  %v9976_v46 = vpop.f32.mrb[57].mxu1 }
 0x5a4   :  { %v6618_v14 = vadd.f32 %v6617_v60, %v13806_v15 }
 0x5a9   :  { %v6351_v35 = vpop.f32.mrb[120].mxu0 }
 0x5aa   :  { %v10221_v36 = vpop.f32.mrb[121].mxu0 }
 0x5c1   :  { %v6001_v48 = vpop.f32.mrb[58].mxu1 }
 0x5c2   :  { %v6619_v41 = vadd.f32 %v6618_v14, %v6001_v48  ;;  %v10046_v15 = vpop.f32.mrb[59].mxu1 }
 0x5c4   :  { %v6620_v24 = vadd.f32 %v6619_v41, %v6071_v32 }
 0x5c9   :  { %v6491_v3 = vpop.f32.mrb[122].mxu0 }
 0x5ca   :  { %v10291_v62 = vpop.f32.mrb[123].mxu0 }
 0x5e1   :  { %v6141_v26 = vpop.f32.mrb[60].mxu1 }
 0x5e2   :  { %v6621_v7 = vadd.f32 %v6620_v24, %v6141_v26  ;;  %v10116_v16 = vpop.f32.mrb[61].mxu1 }
 0x5e4   :  { %v6622_v27 = vadd.f32 %v6621_v7, %v6211_v17 }
 0x601   :  { %v6281_v57 = vpop.f32.mrb[62].mxu1 }
 0x602   :  { %v6623_v29 = vadd.f32 %v6622_v27, %v6281_v57  ;;  %v10186_v4 = vpop.f32.mrb[63].mxu1 }
 0x604   :  { %v6624_v8 = vadd.f32 %v6623_v29, %v6351_v35 }
 0x621   :  { %v6421_v42 = vpop.f32.mrb[64].mxu1 }
 0x622   :  { %v6625_v0 = vadd.f32 %v6624_v8, %v6421_v42  ;;  %v10256_v13 = vpop.f32.mrb[65].mxu1 }
 0x624   :  { %v6626_v5 = vadd.f32 %v6625_v0, %v6491_v3 }
 0x641   :  { %v6561_v63 = vpop.f32.mrb[66].mxu1 }
 0x642   :  { %v6627_v50 = vadd.f32 %v6626_v5, %v6561_v63  ;;  %v10326_v52 = vpop.f32.mrb[67].mxu1 }
 0x644   :  { %v6635_v12 = vadd.f32 %v6808_v31, %v6627_v50 }
 0x646   :  { %v6637_v30 = vmul.f32 0.70710677, %v6635_v12  ;;  %v6636_v32 = vmul.f32 0.5, %v6635_v12 }
 0x648   :  { %12068 = verf.f32 %v6637_v30 }
 0x652   :  { %v12069_v55 = vpop.eup %12068 }
 0x653   :  { %v6639_v25 = vadd.f32 1.0, %v12069_v55 }
 0x655   :  { %v6640_v45 = vmul.f32 %v6639_v25, %v6636_v32 }
 0x657   :  { %10360 = vmatmul.mubr.f32.vlgmr.msra.gmra.mrb[124].mxu0 %v6640_v45 }
 0x72a   :  { %v6730_v38 = vpop.f32.mrb[124].mxu0 }
 0x72b   :  { %v6731_v53 = vadd.f32 %v6809_v34, %v6730_v38  ;;  %v10361_v18 = vpop.f32.mrb[125].mxu0 }
 0x72d   :  { %6735 = vst.msk [vmem:[%s13887_s7] sm:$0xff] %vm6734_vm2, %v6731_v53 }
 0x72e   :  { %6740 = vsyncpa [#allocation3], 1 }
 0x72f   :  { %6741 = vsyncpa [#allocation5], 1 }
 0x730   :  { %6742 = vsyncpa [#allocation8], 1 }

</bundles_post_ra>
